<compile_context>
chip_gen: v6e
topology: v6e:2x2x1
jax: 0.10.0
libtpu: 0.0.40
codegen_flags: <defaults>
</compile_context>

<pallas_src>
import jax
import jax.numpy as jnp
from jax.experimental import pallas as pl
from jax.experimental.pallas import tpu as pltpu

# ---- problem sizes (small, consistent with the module) ----
B = 2              # batch
S = 8              # seq_len
D = 64             # model_dim
NUM_HEADS = 8
HEAD_DIM = D // NUM_HEADS        # 8
HID = D // 2                     # 32, LSTM hidden per direction
OUT_DIM = 64

BP = 8                           # sublane-padded batch (full 8-sublane tile)
SBP = S * BP                     # 64 padded time-major activation rows
SB = S * B                       # 16 valid (compacted) time-major rows
NSB = NUM_HEADS * SB             # 128 block-diagonal score columns

# ---- bf16 slab layout: (_W_ROWS, 256) ----
_R_L0   = 0      # layer 0: Wih_fwd(64) | Wih_bwd(64) | Whh_fused(64)
_R_B0   = 192    # 1 row: layer-0 fused LSTM bias (b_ih + b_hh, both dirs)
_SPLIT  = 208    # manual-DMA split point (16-row aligned for bf16 tiles)
_R_L1   = 208    # layer 1: same layout as layer 0
_R_B1   = 400    # 1 row: layer-1 fused LSTM bias
_R_ATT  = 416    # 64 rows: [Wq | Wk | Wv | Wout]
_R_ATTB = 480    # 1 row:   [bq | bk | bv | bout]
_R_MLP1 = 496    # 64 rows, cols 0:32  : mlp w1^T
_R_MLP2 = 560    # 32 rows, cols 0:64  : mlp w2^T
_R_MLPB = 592    # row 592: b1 (0:32), row 593: b2 (0:64)
_R_SEL  = 608    # 16 rows, cols 0:64  : padded-row -> compact-row selection
_R_MK   = 624    # 64 rows, cols 0:128 : block-diag K^T mask
_R_NEG  = 688    # 16 rows, cols 0:128 : additive cross-batch mask (0 / -1e30)
_R_BLK  = 704    # 128 rows, cols 0:128: per-head block-ones (softmax denom bcast)
_R_MV   = 832    # 128 rows, cols 0:64 : block-diag V mask
_R_POOL = 960    # 8 rows,  cols 0:16  : mean-pool selection (rows >= B zero)
_W_ROWS = 976    # multiple of 16 (bf16 sublane packing)


def emotion_kernel(x_ref, w_hbm, out_ref, w_ref, sem):
    # ---- split slab DMA: layer-0 weights first, the rest behind layer-0 compute ----
    cp_a = pltpu.make_async_copy(w_hbm.at[0:_SPLIT], w_ref.at[0:_SPLIT], sem.at[0])
    cp_b = pltpu.make_async_copy(w_hbm.at[_SPLIT:_W_ROWS], w_ref.at[_SPLIT:_W_ROWS], sem.at[1])
    cp_a.start()
    cp_b.start()
    cp_a.wait()

    # ---------------- fused bidirectional LSTM layer ----------------
    # Fused lane layout (8*HID = 256 wide), gate-type major:
    #   [ i_f i_b | f_f f_b | o_f o_b | g_f g_b ]   (each sub-block HID lanes)
    # State h / c: [ fwd(0:HID) , bwd(HID:2*HID) ].  Rows b >= B are padding.
    def bilstm_layer(xin, row0, bias_row):
        x_bf = xin.astype(jnp.bfloat16)
        wif = w_ref[row0:row0 + 64, :]                 # (D_in, 8*HID) bf16, fwd cols
        wib = w_ref[row0 + 64:row0 + 128, :]           # (D_in, 8*HID) bf16, bwd cols
        whh = w_ref[row0 + 128:row0 + 192, :]          # (2*HID, 8*HID) block-diagonal
        bias = w_ref[bias_row:bias_row + 1, :].astype(jnp.float32)   # (1, 8*HID)

        # Hoisted input projections: one matmul per direction covers all S timesteps.
        ih_f = jnp.dot(x_bf, wif, preferred_element_type=jnp.float32) + bias
        ih_b = jnp.dot(x_bf, wib, preferred_element_type=jnp.float32)
        # Hoist the fwd/bwd combine off the recurrence critical path (8-sublane
        # aligned block reverse + one vectorized add).
        ih_b_rev = jnp.concatenate(
            [ih_b[(S - 1 - s) * BP:(S - s) * BP, :] for s in range(S)], axis=0)
        ih_sum = ih_f + ih_b_rev                       # (S*8, 8*HID) f32

        h = jnp.zeros((BP, 2 * HID), jnp.float32)
        c = jnp.zeros((BP, 2 * HID), jnp.float32)
        outs_f = [None] * S
        outs_b = [None] * S
        for s in range(S):                             # serial recurrence, static unroll
            gates = ih_sum[s * BP:(s + 1) * BP, :] + jnp.dot(
                h.astype(jnp.bfloat16), whh, preferred_element_type=jnp.float32)
            sg = jax.nn.sigmoid(gates[:, 0:6 * HID])   # i | f | o in one EUP pass
            gg = jnp.tanh(gates[:, 6 * HID:8 * HID])   # g
            c = sg[:, 2 * HID:4 * HID] * c + sg[:, 0:2 * HID] * gg
            h = sg[:, 4 * HID:6 * HID] * jnp.tanh(c)
            outs_f[s] = h                              # fwd half valid at time s
            outs_b[S - 1 - s] = h                      # bwd half valid at time S-1-s
        hf = jnp.concatenate(outs_f, axis=0)           # (S*8, 2*HID), 8-row aligned blocks
        hb = jnp.concatenate(outs_b, axis=0)
        return jnp.concatenate([hf[:, 0:HID], hb[:, HID:2 * HID]], axis=-1)   # (S*8, 2*HID)

    xf = x_ref[...]                                    # (S*8, D) f32, padded time-major
    y0 = bilstm_layer(xf, _R_L0, _R_B0)                # uses only the first DMA segment

    cp_b.wait()                                        # rest of the slab has landed
    sig = bilstm_layer(y0, _R_L1, _R_B1)               # signal_features, (S*8, D)

    # ---- compact padded rows (s*8+b) -> valid time-major rows (s*B+b), one tiny matmul ----
    sel = w_ref[_R_SEL:_R_SEL + SB, 0:SBP]                                   # (16, 64) bf16
    sig_c = jnp.dot(sel, sig.astype(jnp.bfloat16), preferred_element_type=jnp.float32)
    sc_bf = sig_c.astype(jnp.bfloat16)

    # ---------------- MultiheadAttention: all batches & heads in one pass ----------------
    att_w = w_ref[_R_ATT:_R_ATT + D, :]                                      # (D, 4D) bf16
    att_b = w_ref[_R_ATTB:_R_ATTB + 1, :].astype(jnp.float32)                # (1, 4D)
    scale = 1.0 / (HEAD_DIM ** 0.5)
    q = (jnp.dot(sc_bf, att_w[:, 0:D], preferred_element_type=jnp.float32) + att_b[:, 0:D]) * scale
    k = jnp.dot(sc_bf, att_w[:, D:2 * D], preferred_element_type=jnp.float32) + att_b[:, D:2 * D]
    v = jnp.dot(sc_bf, att_w[:, 2 * D:3 * D], preferred_element_type=jnp.float32) + att_b[:, 2 * D:3 * D]

    m_k = w_ref[_R_MK:_R_MK + D, 0:NSB]                                      # (64, 128) bf16
    neg = w_ref[_R_NEG:_R_NEG + SB, 0:NSB].astype(jnp.float32)               # (16, 128) additive
    blk = w_ref[_R_BLK:_R_BLK + NSB, 0:NSB]                                  # (128, 128) bf16
    m_v = w_ref[_R_MV:_R_MV + NSB, 0:D]                                      # (128, 64) bf16

    k_big = jnp.tile(k.astype(jnp.bfloat16).T, (1, NUM_HEADS)) * m_k         # block-diag K^T
    sc = jnp.dot(q.astype(jnp.bfloat16), k_big, preferred_element_type=jnp.float32)  # (16, 128)
    sc = sc + neg                                                            # mask cross-batch keys
    sc = sc - jnp.max(sc, axis=-1, keepdims=True)                            # softmax-invariant shift
    e = jnp.exp(sc)                                                          # one EUP pass, all heads
    denom = jnp.dot(e.astype(jnp.bfloat16), blk, preferred_element_type=jnp.float32)
    p = e * pl.reciprocal(denom, approx=True)                                # per-(batch, head) softmax
    v_big = jnp.tile(v.astype(jnp.bfloat16), (NUM_HEADS, 1)) * m_v           # block-diag V
    ctx = jnp.dot(p.astype(jnp.bfloat16), v_big, preferred_element_type=jnp.float32)   # (16, 64)
    attn = (jnp.dot(ctx.astype(jnp.bfloat16), att_w[:, 3 * D:4 * D],
                    preferred_element_type=jnp.float32) + att_b[:, 3 * D:4 * D])       # (16, 64)

    # Mean pool over seq (attention_mask is None): one tiny matmul with a selection matrix.
    pool = w_ref[_R_POOL:_R_POOL + BP, 0:SB]                                 # (8, 16) bf16
    pooled = jnp.dot(pool, attn.astype(jnp.bfloat16), preferred_element_type=jnp.float32)  # (8, D)

    # ---------------- emotion_projection MLP (Dropout = identity in eval) ----------------
    w1 = w_ref[_R_MLP1:_R_MLP1 + D, 0:D // 2]
    w2 = w_ref[_R_MLP2:_R_MLP2 + D // 2, 0:OUT_DIM]
    b1 = w_ref[_R_MLPB:_R_MLPB + 1, 0:D // 2].astype(jnp.float32)
    b2 = w_ref[_R_MLPB + 1:_R_MLPB + 2, 0:OUT_DIM].astype(jnp.float32)
    h1 = jnp.maximum(
        jnp.dot(pooled.astype(jnp.bfloat16), w1, preferred_element_type=jnp.float32) + b1, 0.0)
    emo = jnp.tanh(
        jnp.dot(h1.astype(jnp.bfloat16), w2, preferred_element_type=jnp.float32) + b2)
    out_ref[...] = emo.astype(out_ref.dtype)           # rows >= B are padding, sliced in wrapper


# ------------------------- host-side parameter packing -------------------------
def init_torch_shaped_params(key):
    """Deterministic synthetic parameters in PyTorch shapes / gate order (i, f, g, o)."""
    ks = iter(jax.random.split(key, 64))

    def nrm(shape, scale=0.1):
        return scale * jax.random.normal(next(ks), shape, jnp.float32)

    lstm = []
    for layer in range(2):
        d_in = D if layer == 0 else 2 * HID
        dirs = []
        for _direction in range(2):             # 0 = forward, 1 = backward
            dirs.append(dict(w_ih=nrm((4 * HID, d_in)), w_hh=nrm((4 * HID, HID)),
                             b_ih=nrm((4 * HID,)), b_hh=nrm((4 * HID,))))
        lstm.append(dirs)
    attn = dict(in_proj_w=nrm((3 * D, D)), in_proj_b=nrm((3 * D,)),
                out_proj_w=nrm((D, D)), out_proj_b=nrm((D,)))
    mlp = dict(w1=nrm((D // 2, D)), b1=nrm((D // 2,)),
               w2=nrm((OUT_DIM, D // 2)), b2=nrm((OUT_DIM,)))
    return lstm, attn, mlp


def _perm_gates_ifog(w):
    """Reorder PyTorch gate row blocks (i, f, g, o) -> (i, f, o, g)."""
    h = HID
    return jnp.concatenate([w[0:h], w[h:2 * h], w[3 * h:4 * h], w[2 * h:3 * h]], axis=0)


def _scatter_dir(w_t, direction):
    """Place a per-direction (rows, 4*HID) matrix (cols i,f,o,g) into the fused (rows, 8*HID) layout."""
    rows = w_t.shape[0]
    out = jnp.zeros((rows, 8 * HID), jnp.float32)
    off = direction * HID
    for gi in range(4):
        out = out.at[:, gi * 2 * HID + off: gi * 2 * HID + off + HID].set(
            w_t[:, gi * HID:(gi + 1) * HID])
    return out


def _iota2(shape, dim):
    return jax.lax.broadcasted_iota(jnp.int32, shape, dim)


def pack_params(lstm, attn, mlp):
    """Pack all weights, biases and precomputed mask constants into one bf16 slab."""
    w = jnp.zeros((_W_ROWS, 8 * HID), jnp.float32)

    for layer in range(2):
        r0 = _R_L0 if layer == 0 else _R_L1
        brow = _R_B0 if layer == 0 else _R_B1
        whh = jnp.zeros((2 * HID, 8 * HID), jnp.float32)
        bias = jnp.zeros((8 * HID,), jnp.float32)
        for dr, prm in enumerate(lstm[layer]):
            w_ih_t = _perm_gates_ifog(prm['w_ih']).T                               # (d_in, 4*HID)
            w_hh_t = _perm_gates_ifog(prm['w_hh']).T                               # (HID, 4*HID)
            bb = _perm_gates_ifog((prm['b_ih'] + prm['b_hh']).reshape(4 * HID, 1)).T
            w = w.at[r0 + 64 * dr: r0 + 64 * dr + 64, :].set(_scatter_dir(w_ih_t, dr))
            whh = whh.at[dr * HID:(dr + 1) * HID, :].set(_scatter_dir(w_hh_t, dr))
            bias = bias + _scatter_dir(bb, dr)[0]
        w = w.at[r0 + 128: r0 + 192, :].set(whh)
        w = w.at[brow, :].set(bias)

    ipw, ipb = attn['in_proj_w'], attn['in_proj_b']
    w = w.at[_R_ATT:_R_ATT + D, 0:D].set(ipw[0:D, :].T)
    w = w.at[_R_ATT:_R_ATT + D, D:2 * D].set(ipw[D:2 * D, :].T)
    w = w.at[_R_ATT:_R_ATT + D, 2 * D:3 * D].set(ipw[2 * D:3 * D, :].T)
    w = w.at[_R_ATT:_R_ATT + D, 3 * D:4 * D].set(attn['out_proj_w'].T)
    w = w.at[_R_ATTB, 0:3 * D].set(ipb)
    w = w.at[_R_ATTB, 3 * D:4 * D].set(attn['out_proj_b'])

    w = w.at[_R_MLP1:_R_MLP1 + D, 0:D // 2].set(mlp['w1'].T)
    w = w.at[_R_MLP2:_R_MLP2 + D // 2, 0:OUT_DIM].set(mlp['w2'].T)
    w = w.at[_R_MLPB, 0:D // 2].set(mlp['b1'])
    w = w.at[_R_MLPB + 1, 0:OUT_DIM].set(mlp['b2'])

    # ---- precomputed attention / pooling constants (review item: no in-kernel iota math) ----
    r, j = _iota2((SB, SBP), 0), _iota2((SB, SBP), 1)
    w = w.at[_R_SEL:_R_SEL + SB, 0:SBP].set(
        (j == (r // B) * BP + (r % B)).astype(jnp.float32))

    i0, j0 = _iota2((D, NSB), 0), _iota2((D, NSB), 1)
    w = w.at[_R_MK:_R_MK + D, 0:NSB].set(((i0 // HEAD_DIM) == (j0 // SB)).astype(jnp.float32))

    i1, j1 = _iota2((SB, NSB), 0), _iota2((SB, NSB), 1)
    w = w.at[_R_NEG:_R_NEG + SB, 0:NSB].set(
        jnp.where((i1 % B) == (j1 % B), 0.0, -1e30).astype(jnp.float32))

    i2, j2 = _iota2((NSB, NSB), 0), _iota2((NSB, NSB), 1)
    w = w.at[_R_BLK:_R_BLK + NSB, 0:NSB].set(((i2 // SB) == (j2 // SB)).astype(jnp.float32))

    i3, j3 = _iota2((NSB, D), 0), _iota2((NSB, D), 1)
    w = w.at[_R_MV:_R_MV + NSB, 0:D].set(((i3 // SB) == (j3 // HEAD_DIM)).astype(jnp.float32))

    i4, j4 = _iota2((BP, SB), 0), _iota2((BP, SB), 1)
    w = w.at[_R_POOL:_R_POOL + BP, 0:SB].set(
        jnp.where((i4 < B) & ((j4 % B) == i4), 1.0 / S, 0.0).astype(jnp.float32))

    return w.astype(jnp.bfloat16)


@jax.jit
def emotion_detector_forward(hidden_states, w_slab):
    # XLA-side layout plumbing: time-major, batch padded to a full 8-sublane tile.
    x_tm = jnp.transpose(hidden_states, (1, 0, 2))                        # (S, B, D)
    x_pad = jnp.zeros((S, BP, D), hidden_states.dtype).at[:, :B, :].set(x_tm)
    x_pad = x_pad.reshape(S * BP, D)
    # Single grid step, fused batch (no TC split): the serial LSTM dominates and
    # batch=2 rides in otherwise-idle sublanes; working set << VMEM on v5e/v6e/v7x.
    out = pl.pallas_call(
        emotion_kernel,
        out_shape=jax.ShapeDtypeStruct((BP, OUT_DIM), jnp.float32),
        in_specs=[pl.BlockSpec(memory_space=pltpu.MemorySpace.VMEM),
                  pl.BlockSpec(memory_space=pl.ANY)],       # slab stays in HBM, manual DMA
        out_specs=pl.BlockSpec(memory_space=pltpu.MemorySpace.VMEM),
        scratch_shapes=[pltpu.VMEM((_W_ROWS, 8 * HID), jnp.bfloat16),
                        pltpu.SemaphoreType.DMA((2,))],
    )(x_pad, w_slab)
    return out[:B]


if __name__ == "__main__":
    key = jax.random.PRNGKey(0)
    k_x, k_p = jax.random.split(key)
    hidden_states = jax.random.normal(k_x, (B, S, D), jnp.float32)
    lstm_p, attn_p, mlp_p = init_torch_shaped_params(k_p)
    w_slab = pack_params(lstm_p, attn_p, mlp_p)

    emotion_vector = emotion_detector_forward(hidden_states, w_slab)
    jax.block_until_ready(emotion_vector)
    assert emotion_vector.shape == (B, OUT_DIM)
    print("KERNEL_OK")
</pallas_src>

<mosaic_0001>
module attributes {stable_mosaic.version = 11 : i64} {
  func.func @emotion_kernel(%arg0: memref<64x64xf32, #tpu.memory_space<vmem>>, %arg1: memref<976x256xbf16, #tpu.memory_space<any>>, %arg2: memref<8x64xf32, #tpu.memory_space<vmem>>, %arg3: memref<976x256xbf16, #tpu.memory_space<vmem>>, %arg4: memref<2x!tpu.dma_semaphore, #tpu.memory_space<semaphore_mem>>) attributes {dimension_semantics = [], scalar_prefetch = 0 : i64, scratch_operands = 2 : i64, tpu.core_type = #tpu.core_type<tc>} {
    %c0_i32 = arith.constant 0 : i32
    %c0_i32_0 = arith.constant 0 : i32
    %c0_i32_1 = arith.constant 0 : i32
    %0 = tpu.memref_slice %arg1[%c0_i32_0, %c0_i32_1] : memref<976x256xbf16, #tpu.memory_space<any>> -> memref<208x256xbf16, #tpu.memory_space<any>>
    %c0_i32_2 = arith.constant 0 : i32
    %c0_i32_3 = arith.constant 0 : i32
    %1 = tpu.memref_slice %arg3[%c0_i32_2, %c0_i32_3] : memref<976x256xbf16, #tpu.memory_space<vmem>> -> memref<208x256xbf16, #tpu.memory_space<vmem>>
    %2 = tpu.memref_slice %arg4[%c0_i32] : memref<2x!tpu.dma_semaphore, #tpu.memory_space<semaphore_mem>> -> memref<1x!tpu.dma_semaphore, #tpu.memory_space<semaphore_mem>>
    %3 = tpu.memref_squeeze %2 : memref<1x!tpu.dma_semaphore, #tpu.memory_space<semaphore_mem>> -> memref<!tpu.dma_semaphore, #tpu.memory_space<semaphore_mem>>
    tpu.enqueue_dma source(%0 : memref<208x256xbf16, #tpu.memory_space<any>>) target(%1 : memref<208x256xbf16, #tpu.memory_space<vmem>>) target_semaphore(%3 : memref<!tpu.dma_semaphore, #tpu.memory_space<semaphore_mem>>)
    %c1_i32 = arith.constant 1 : i32
    %c208_i32 = arith.constant 208 : i32
    %c0_i32_4 = arith.constant 0 : i32
    %4 = tpu.memref_slice %arg1[%c208_i32, %c0_i32_4] : memref<976x256xbf16, #tpu.memory_space<any>> -> memref<768x256xbf16, #tpu.memory_space<any>>
    %c208_i32_5 = arith.constant 208 : i32
    %c0_i32_6 = arith.constant 0 : i32
    %5 = tpu.memref_slice %arg3[%c208_i32_5, %c0_i32_6] : memref<976x256xbf16, #tpu.memory_space<vmem>> -> memref<768x256xbf16, #tpu.memory_space<vmem>>
    %6 = tpu.memref_slice %arg4[%c1_i32] : memref<2x!tpu.dma_semaphore, #tpu.memory_space<semaphore_mem>> -> memref<1x!tpu.dma_semaphore, #tpu.memory_space<semaphore_mem>>
    %7 = tpu.memref_squeeze %6 : memref<1x!tpu.dma_semaphore, #tpu.memory_space<semaphore_mem>> -> memref<!tpu.dma_semaphore, #tpu.memory_space<semaphore_mem>>
    tpu.enqueue_dma source(%4 : memref<768x256xbf16, #tpu.memory_space<any>>) target(%5 : memref<768x256xbf16, #tpu.memory_space<vmem>>) target_semaphore(%7 : memref<!tpu.dma_semaphore, #tpu.memory_space<semaphore_mem>>)
    %c0_i32_7 = arith.constant 0 : i32
    %c0_i32_8 = arith.constant 0 : i32
    %c0_i32_9 = arith.constant 0 : i32
    %8 = tpu.memref_slice %arg1[%c0_i32_8, %c0_i32_9] : memref<976x256xbf16, #tpu.memory_space<any>> -> memref<208x256xbf16, #tpu.memory_space<any>>
    %c0_i32_10 = arith.constant 0 : i32
    %c0_i32_11 = arith.constant 0 : i32
    %9 = tpu.memref_slice %arg3[%c0_i32_10, %c0_i32_11] : memref<976x256xbf16, #tpu.memory_space<vmem>> -> memref<208x256xbf16, #tpu.memory_space<vmem>>
    %10 = tpu.memref_slice %arg4[%c0_i32_7] : memref<2x!tpu.dma_semaphore, #tpu.memory_space<semaphore_mem>> -> memref<1x!tpu.dma_semaphore, #tpu.memory_space<semaphore_mem>>
    %11 = tpu.memref_squeeze %10 : memref<1x!tpu.dma_semaphore, #tpu.memory_space<semaphore_mem>> -> memref<!tpu.dma_semaphore, #tpu.memory_space<semaphore_mem>>
    tpu.wait_dma2 semaphore(%11 : memref<!tpu.dma_semaphore, #tpu.memory_space<semaphore_mem>>) src(%8 : memref<208x256xbf16, #tpu.memory_space<any>>) dst(%9 : memref<208x256xbf16, #tpu.memory_space<vmem>>)
    %c0 = arith.constant 0 : index
    %c0_12 = arith.constant 0 : index
    %12 = vector.load %arg0[%c0, %c0_12] : memref<64x64xf32, #tpu.memory_space<vmem>>, vector<64x64xf32>
    %13 = arith.truncf %12 : vector<64x64xf32> to vector<64x64xbf16>
    %c0_13 = arith.constant 0 : index
    %c0_14 = arith.constant 0 : index
    %14 = vector.load %arg3[%c0_13, %c0_14] : memref<976x256xbf16, #tpu.memory_space<vmem>>, vector<64x256xbf16>
    %c64 = arith.constant 64 : index
    %c0_15 = arith.constant 0 : index
    %15 = vector.load %arg3[%c64, %c0_15] : memref<976x256xbf16, #tpu.memory_space<vmem>>, vector<64x256xbf16>
    %c128 = arith.constant 128 : index
    %c0_16 = arith.constant 0 : index
    %16 = vector.load %arg3[%c128, %c0_16] : memref<976x256xbf16, #tpu.memory_space<vmem>>, vector<64x256xbf16>
    %c192 = arith.constant 192 : index
    %c0_17 = arith.constant 0 : index
    %17 = vector.load %arg3[%c192, %c0_17] : memref<976x256xbf16, #tpu.memory_space<vmem>>, vector<1x256xbf16>
    %18 = arith.extf %17 : vector<1x256xbf16> to vector<1x256xf32>
    %cst = arith.constant dense<0.000000e+00> : vector<64x256xf32>
    %19 = tpu.matmul %13, %14, %cst {dimension_numbers = #tpu.dot_dimension_numbers<[1], [0], [0], [1], [0, 0, 1, 1], [], []>} : vector<64x64xbf16>, vector<64x256xbf16>, vector<64x256xf32> -> vector<64x256xf32>
    %20 = vector.broadcast %18 : vector<1x256xf32> to vector<64x256xf32>
    %21 = arith.addf %19, %20 : vector<64x256xf32>
    %cst_18 = arith.constant dense<0.000000e+00> : vector<64x256xf32>
    %22 = tpu.matmul %13, %15, %cst_18 {dimension_numbers = #tpu.dot_dimension_numbers<[1], [0], [0], [1], [0, 0, 1, 1], [], []>} : vector<64x64xbf16>, vector<64x256xbf16>, vector<64x256xf32> -> vector<64x256xf32>
    %23 = vector.extract_strided_slice %22 {offsets = [56, 0], sizes = [8, 256], strides = [1, 1]} : vector<64x256xf32> to vector<8x256xf32>
    %24 = vector.extract_strided_slice %22 {offsets = [48, 0], sizes = [8, 256], strides = [1, 1]} : vector<64x256xf32> to vector<8x256xf32>
    %25 = vector.extract_strided_slice %22 {offsets = [40, 0], sizes = [8, 256], strides = [1, 1]} : vector<64x256xf32> to vector<8x256xf32>
    %26 = vector.extract_strided_slice %22 {offsets = [32, 0], sizes = [8, 256], strides = [1, 1]} : vector<64x256xf32> to vector<8x256xf32>
    %27 = vector.extract_strided_slice %22 {offsets = [24, 0], sizes = [8, 256], strides = [1, 1]} : vector<64x256xf32> to vector<8x256xf32>
    %28 = vector.extract_strided_slice %22 {offsets = [16, 0], sizes = [8, 256], strides = [1, 1]} : vector<64x256xf32> to vector<8x256xf32>
    %29 = vector.extract_strided_slice %22 {offsets = [8, 0], sizes = [8, 256], strides = [1, 1]} : vector<64x256xf32> to vector<8x256xf32>
    %30 = vector.extract_strided_slice %22 {offsets = [0, 0], sizes = [8, 256], strides = [1, 1]} : vector<64x256xf32> to vector<8x256xf32>
    %31 = tpu.concatenate %23, %24, %25, %26, %27, %28, %29, %30 in 0 : vector<8x256xf32>, vector<8x256xf32>, vector<8x256xf32>, vector<8x256xf32>, vector<8x256xf32>, vector<8x256xf32>, vector<8x256xf32>, vector<8x256xf32> -> vector<64x256xf32>
    %32 = arith.addf %21, %31 : vector<64x256xf32>
    %cst_19 = arith.constant 0.000000e+00 : f32
    %33 = vector.broadcast %cst_19 : f32 to vector<8x64xf32>
    %cst_20 = arith.constant 0.000000e+00 : f32
    %34 = vector.broadcast %cst_20 : f32 to vector<8x64xf32>
    %35 = vector.extract_strided_slice %32 {offsets = [0, 0], sizes = [8, 256], strides = [1, 1]} : vector<64x256xf32> to vector<8x256xf32>
    %36 = arith.truncf %33 : vector<8x64xf32> to vector<8x64xbf16>
    %cst_21 = arith.constant dense<0.000000e+00> : vector<8x256xf32>
    %37 = tpu.matmul %36, %16, %cst_21 {dimension_numbers = #tpu.dot_dimension_numbers<[1], [0], [0], [1], [0, 0, 1, 1], [], []>} : vector<8x64xbf16>, vector<64x256xbf16>, vector<8x256xf32> -> vector<8x256xf32>
    %38 = arith.addf %35, %37 : vector<8x256xf32>
    %39 = vector.extract_strided_slice %38 {offsets = [0, 0], sizes = [8, 192], strides = [1, 1]} : vector<8x256xf32> to vector<8x192xf32>
    %40 = arith.negf %39 : vector<8x192xf32>
    %41 = math.exp %40 : vector<8x192xf32>
    %cst_22 = arith.constant 1.000000e+00 : f32
    %42 = vector.broadcast %cst_22 : f32 to vector<8x192xf32>
    %43 = arith.addf %42, %41 : vector<8x192xf32>
    %44 = arith.divf %42, %43 : vector<8x192xf32>
    %45 = vector.extract_strided_slice %38 {offsets = [0, 192], sizes = [8, 64], strides = [1, 1]} : vector<8x256xf32> to vector<8x64xf32>
    %46 = math.tanh %45 : vector<8x64xf32>
    %47 = vector.extract_strided_slice %44 {offsets = [0, 64], sizes = [8, 64], strides = [1, 1]} : vector<8x192xf32> to vector<8x64xf32>
    %48 = arith.mulf %47, %34 : vector<8x64xf32>
    %49 = vector.extract_strided_slice %44 {offsets = [0, 0], sizes = [8, 64], strides = [1, 1]} : vector<8x192xf32> to vector<8x64xf32>
    %50 = arith.mulf %49, %46 : vector<8x64xf32>
    %51 = arith.addf %48, %50 : vector<8x64xf32>
    %52 = vector.extract_strided_slice %44 {offsets = [0, 128], sizes = [8, 64], strides = [1, 1]} : vector<8x192xf32> to vector<8x64xf32>
    %53 = math.tanh %51 : vector<8x64xf32>
    %54 = arith.mulf %52, %53 : vector<8x64xf32>
    %55 = vector.extract_strided_slice %32 {offsets = [8, 0], sizes = [8, 256], strides = [1, 1]} : vector<64x256xf32> to vector<8x256xf32>
    %56 = arith.truncf %54 : vector<8x64xf32> to vector<8x64xbf16>
    %cst_23 = arith.constant dense<0.000000e+00> : vector<8x256xf32>
    %57 = tpu.matmul %56, %16, %cst_23 {dimension_numbers = #tpu.dot_dimension_numbers<[1], [0], [0], [1], [0, 0, 1, 1], [], []>} : vector<8x64xbf16>, vector<64x256xbf16>, vector<8x256xf32> -> vector<8x256xf32>
    %58 = arith.addf %55, %57 : vector<8x256xf32>
    %59 = vector.extract_strided_slice %58 {offsets = [0, 0], sizes = [8, 192], strides = [1, 1]} : vector<8x256xf32> to vector<8x192xf32>
    %60 = arith.negf %59 : vector<8x192xf32>
    %61 = math.exp %60 : vector<8x192xf32>
    %cst_24 = arith.constant 1.000000e+00 : f32
    %62 = vector.broadcast %cst_24 : f32 to vector<8x192xf32>
    %63 = arith.addf %62, %61 : vector<8x192xf32>
    %64 = arith.divf %62, %63 : vector<8x192xf32>
    %65 = vector.extract_strided_slice %58 {offsets = [0, 192], sizes = [8, 64], strides = [1, 1]} : vector<8x256xf32> to vector<8x64xf32>
    %66 = math.tanh %65 : vector<8x64xf32>
    %67 = vector.extract_strided_slice %64 {offsets = [0, 64], sizes = [8, 64], strides = [1, 1]} : vector<8x192xf32> to vector<8x64xf32>
    %68 = arith.mulf %67, %51 : vector<8x64xf32>
    %69 = vector.extract_strided_slice %64 {offsets = [0, 0], sizes = [8, 64], strides = [1, 1]} : vector<8x192xf32> to vector<8x64xf32>
    %70 = arith.mulf %69, %66 : vector<8x64xf32>
    %71 = arith.addf %68, %70 : vector<8x64xf32>
    %72 = vector.extract_strided_slice %64 {offsets = [0, 128], sizes = [8, 64], strides = [1, 1]} : vector<8x192xf32> to vector<8x64xf32>
    %73 = math.tanh %71 : vector<8x64xf32>
    %74 = arith.mulf %72, %73 : vector<8x64xf32>
    %75 = vector.extract_strided_slice %32 {offsets = [16, 0], sizes = [8, 256], strides = [1, 1]} : vector<64x256xf32> to vector<8x256xf32>
    %76 = arith.truncf %74 : vector<8x64xf32> to vector<8x64xbf16>
    %cst_25 = arith.constant dense<0.000000e+00> : vector<8x256xf32>
    %77 = tpu.matmul %76, %16, %cst_25 {dimension_numbers = #tpu.dot_dimension_numbers<[1], [0], [0], [1], [0, 0, 1, 1], [], []>} : vector<8x64xbf16>, vector<64x256xbf16>, vector<8x256xf32> -> vector<8x256xf32>
    %78 = arith.addf %75, %77 : vector<8x256xf32>
    %79 = vector.extract_strided_slice %78 {offsets = [0, 0], sizes = [8, 192], strides = [1, 1]} : vector<8x256xf32> to vector<8x192xf32>
    %80 = arith.negf %79 : vector<8x192xf32>
    %81 = math.exp %80 : vector<8x192xf32>
    %cst_26 = arith.constant 1.000000e+00 : f32
    %82 = vector.broadcast %cst_26 : f32 to vector<8x192xf32>
    %83 = arith.addf %82, %81 : vector<8x192xf32>
    %84 = arith.divf %82, %83 : vector<8x192xf32>
    %85 = vector.extract_strided_slice %78 {offsets = [0, 192], sizes = [8, 64], strides = [1, 1]} : vector<8x256xf32> to vector<8x64xf32>
    %86 = math.tanh %85 : vector<8x64xf32>
    %87 = vector.extract_strided_slice %84 {offsets = [0, 64], sizes = [8, 64], strides = [1, 1]} : vector<8x192xf32> to vector<8x64xf32>
    %88 = arith.mulf %87, %71 : vector<8x64xf32>
    %89 = vector.extract_strided_slice %84 {offsets = [0, 0], sizes = [8, 64], strides = [1, 1]} : vector<8x192xf32> to vector<8x64xf32>
    %90 = arith.mulf %89, %86 : vector<8x64xf32>
    %91 = arith.addf %88, %90 : vector<8x64xf32>
    %92 = vector.extract_strided_slice %84 {offsets = [0, 128], sizes = [8, 64], strides = [1, 1]} : vector<8x192xf32> to vector<8x64xf32>
    %93 = math.tanh %91 : vector<8x64xf32>
    %94 = arith.mulf %92, %93 : vector<8x64xf32>
    %95 = vector.extract_strided_slice %32 {offsets = [24, 0], sizes = [8, 256], strides = [1, 1]} : vector<64x256xf32> to vector<8x256xf32>
    %96 = arith.truncf %94 : vector<8x64xf32> to vector<8x64xbf16>
    %cst_27 = arith.constant dense<0.000000e+00> : vector<8x256xf32>
    %97 = tpu.matmul %96, %16, %cst_27 {dimension_numbers = #tpu.dot_dimension_numbers<[1], [0], [0], [1], [0, 0, 1, 1], [], []>} : vector<8x64xbf16>, vector<64x256xbf16>, vector<8x256xf32> -> vector<8x256xf32>
    %98 = arith.addf %95, %97 : vector<8x256xf32>
    %99 = vector.extract_strided_slice %98 {offsets = [0, 0], sizes = [8, 192], strides = [1, 1]} : vector<8x256xf32> to vector<8x192xf32>
    %100 = arith.negf %99 : vector<8x192xf32>
    %101 = math.exp %100 : vector<8x192xf32>
    %cst_28 = arith.constant 1.000000e+00 : f32
    %102 = vector.broadcast %cst_28 : f32 to vector<8x192xf32>
    %103 = arith.addf %102, %101 : vector<8x192xf32>
    %104 = arith.divf %102, %103 : vector<8x192xf32>
    %105 = vector.extract_strided_slice %98 {offsets = [0, 192], sizes = [8, 64], strides = [1, 1]} : vector<8x256xf32> to vector<8x64xf32>
    %106 = math.tanh %105 : vector<8x64xf32>
    %107 = vector.extract_strided_slice %104 {offsets = [0, 64], sizes = [8, 64], strides = [1, 1]} : vector<8x192xf32> to vector<8x64xf32>
    %108 = arith.mulf %107, %91 : vector<8x64xf32>
    %109 = vector.extract_strided_slice %104 {offsets = [0, 0], sizes = [8, 64], strides = [1, 1]} : vector<8x192xf32> to vector<8x64xf32>
    %110 = arith.mulf %109, %106 : vector<8x64xf32>
    %111 = arith.addf %108, %110 : vector<8x64xf32>
    %112 = vector.extract_strided_slice %104 {offsets = [0, 128], sizes = [8, 64], strides = [1, 1]} : vector<8x192xf32> to vector<8x64xf32>
    %113 = math.tanh %111 : vector<8x64xf32>
    %114 = arith.mulf %112, %113 : vector<8x64xf32>
    %115 = vector.extract_strided_slice %32 {offsets = [32, 0], sizes = [8, 256], strides = [1, 1]} : vector<64x256xf32> to vector<8x256xf32>
    %116 = arith.truncf %114 : vector<8x64xf32> to vector<8x64xbf16>
    %cst_29 = arith.constant dense<0.000000e+00> : vector<8x256xf32>
    %117 = tpu.matmul %116, %16, %cst_29 {dimension_numbers = #tpu.dot_dimension_numbers<[1], [0], [0], [1], [0, 0, 1, 1], [], []>} : vector<8x64xbf16>, vector<64x256xbf16>, vector<8x256xf32> -> vector<8x256xf32>
    %118 = arith.addf %115, %117 : vector<8x256xf32>
    %119 = vector.extract_strided_slice %118 {offsets = [0, 0], sizes = [8, 192], strides = [1, 1]} : vector<8x256xf32> to vector<8x192xf32>
    %120 = arith.negf %119 : vector<8x192xf32>
    %121 = math.exp %120 : vector<8x192xf32>
    %cst_30 = arith.constant 1.000000e+00 : f32
    %122 = vector.broadcast %cst_30 : f32 to vector<8x192xf32>
    %123 = arith.addf %122, %121 : vector<8x192xf32>
    %124 = arith.divf %122, %123 : vector<8x192xf32>
    %125 = vector.extract_strided_slice %118 {offsets = [0, 192], sizes = [8, 64], strides = [1, 1]} : vector<8x256xf32> to vector<8x64xf32>
    %126 = math.tanh %125 : vector<8x64xf32>
    %127 = vector.extract_strided_slice %124 {offsets = [0, 64], sizes = [8, 64], strides = [1, 1]} : vector<8x192xf32> to vector<8x64xf32>
    %128 = arith.mulf %127, %111 : vector<8x64xf32>
    %129 = vector.extract_strided_slice %124 {offsets = [0, 0], sizes = [8, 64], strides = [1, 1]} : vector<8x192xf32> to vector<8x64xf32>
    %130 = arith.mulf %129, %126 : vector<8x64xf32>
    %131 = arith.addf %128, %130 : vector<8x64xf32>
    %132 = vector.extract_strided_slice %124 {offsets = [0, 128], sizes = [8, 64], strides = [1, 1]} : vector<8x192xf32> to vector<8x64xf32>
    %133 = math.tanh %131 : vector<8x64xf32>
    %134 = arith.mulf %132, %133 : vector<8x64xf32>
    %135 = vector.extract_strided_slice %32 {offsets = [40, 0], sizes = [8, 256], strides = [1, 1]} : vector<64x256xf32> to vector<8x256xf32>
    %136 = arith.truncf %134 : vector<8x64xf32> to vector<8x64xbf16>
    %cst_31 = arith.constant dense<0.000000e+00> : vector<8x256xf32>
    %137 = tpu.matmul %136, %16, %cst_31 {dimension_numbers = #tpu.dot_dimension_numbers<[1], [0], [0], [1], [0, 0, 1, 1], [], []>} : vector<8x64xbf16>, vector<64x256xbf16>, vector<8x256xf32> -> vector<8x256xf32>
    %138 = arith.addf %135, %137 : vector<8x256xf32>
    %139 = vector.extract_strided_slice %138 {offsets = [0, 0], sizes = [8, 192], strides = [1, 1]} : vector<8x256xf32> to vector<8x192xf32>
    %140 = arith.negf %139 : vector<8x192xf32>
    %141 = math.exp %140 : vector<8x192xf32>
    %cst_32 = arith.constant 1.000000e+00 : f32
    %142 = vector.broadcast %cst_32 : f32 to vector<8x192xf32>
    %143 = arith.addf %142, %141 : vector<8x192xf32>
    %144 = arith.divf %142, %143 : vector<8x192xf32>
    %145 = vector.extract_strided_slice %138 {offsets = [0, 192], sizes = [8, 64], strides = [1, 1]} : vector<8x256xf32> to vector<8x64xf32>
    %146 = math.tanh %145 : vector<8x64xf32>
    %147 = vector.extract_strided_slice %144 {offsets = [0, 64], sizes = [8, 64], strides = [1, 1]} : vector<8x192xf32> to vector<8x64xf32>
    %148 = arith.mulf %147, %131 : vector<8x64xf32>
    %149 = vector.extract_strided_slice %144 {offsets = [0, 0], sizes = [8, 64], strides = [1, 1]} : vector<8x192xf32> to vector<8x64xf32>
    %150 = arith.mulf %149, %146 : vector<8x64xf32>
    %151 = arith.addf %148, %150 : vector<8x64xf32>
    %152 = vector.extract_strided_slice %144 {offsets = [0, 128], sizes = [8, 64], strides = [1, 1]} : vector<8x192xf32> to vector<8x64xf32>
    %153 = math.tanh %151 : vector<8x64xf32>
    %154 = arith.mulf %152, %153 : vector<8x64xf32>
    %155 = vector.extract_strided_slice %32 {offsets = [48, 0], sizes = [8, 256], strides = [1, 1]} : vector<64x256xf32> to vector<8x256xf32>
    %156 = arith.truncf %154 : vector<8x64xf32> to vector<8x64xbf16>
    %cst_33 = arith.constant dense<0.000000e+00> : vector<8x256xf32>
    %157 = tpu.matmul %156, %16, %cst_33 {dimension_numbers = #tpu.dot_dimension_numbers<[1], [0], [0], [1], [0, 0, 1, 1], [], []>} : vector<8x64xbf16>, vector<64x256xbf16>, vector<8x256xf32> -> vector<8x256xf32>
    %158 = arith.addf %155, %157 : vector<8x256xf32>
    %159 = vector.extract_strided_slice %158 {offsets = [0, 0], sizes = [8, 192], strides = [1, 1]} : vector<8x256xf32> to vector<8x192xf32>
    %160 = arith.negf %159 : vector<8x192xf32>
    %161 = math.exp %160 : vector<8x192xf32>
    %cst_34 = arith.constant 1.000000e+00 : f32
    %162 = vector.broadcast %cst_34 : f32 to vector<8x192xf32>
    %163 = arith.addf %162, %161 : vector<8x192xf32>
    %164 = arith.divf %162, %163 : vector<8x192xf32>
    %165 = vector.extract_strided_slice %158 {offsets = [0, 192], sizes = [8, 64], strides = [1, 1]} : vector<8x256xf32> to vector<8x64xf32>
    %166 = math.tanh %165 : vector<8x64xf32>
    %167 = vector.extract_strided_slice %164 {offsets = [0, 64], sizes = [8, 64], strides = [1, 1]} : vector<8x192xf32> to vector<8x64xf32>
    %168 = arith.mulf %167, %151 : vector<8x64xf32>
    %169 = vector.extract_strided_slice %164 {offsets = [0, 0], sizes = [8, 64], strides = [1, 1]} : vector<8x192xf32> to vector<8x64xf32>
    %170 = arith.mulf %169, %166 : vector<8x64xf32>
    %171 = arith.addf %168, %170 : vector<8x64xf32>
    %172 = vector.extract_strided_slice %164 {offsets = [0, 128], sizes = [8, 64], strides = [1, 1]} : vector<8x192xf32> to vector<8x64xf32>
    %173 = math.tanh %171 : vector<8x64xf32>
    %174 = arith.mulf %172, %173 : vector<8x64xf32>
    %175 = vector.extract_strided_slice %32 {offsets = [56, 0], sizes = [8, 256], strides = [1, 1]} : vector<64x256xf32> to vector<8x256xf32>
    %176 = arith.truncf %174 : vector<8x64xf32> to vector<8x64xbf16>
    %cst_35 = arith.constant dense<0.000000e+00> : vector<8x256xf32>
    %177 = tpu.matmul %176, %16, %cst_35 {dimension_numbers = #tpu.dot_dimension_numbers<[1], [0], [0], [1], [0, 0, 1, 1], [], []>} : vector<8x64xbf16>, vector<64x256xbf16>, vector<8x256xf32> -> vector<8x256xf32>
    %178 = arith.addf %175, %177 : vector<8x256xf32>
    %179 = vector.extract_strided_slice %178 {offsets = [0, 0], sizes = [8, 192], strides = [1, 1]} : vector<8x256xf32> to vector<8x192xf32>
    %180 = arith.negf %179 : vector<8x192xf32>
    %181 = math.exp %180 : vector<8x192xf32>
    %cst_36 = arith.constant 1.000000e+00 : f32
    %182 = vector.broadcast %cst_36 : f32 to vector<8x192xf32>
    %183 = arith.addf %182, %181 : vector<8x192xf32>
    %184 = arith.divf %182, %183 : vector<8x192xf32>
    %185 = vector.extract_strided_slice %178 {offsets = [0, 192], sizes = [8, 64], strides = [1, 1]} : vector<8x256xf32> to vector<8x64xf32>
    %186 = math.tanh %185 : vector<8x64xf32>
    %187 = vector.extract_strided_slice %184 {offsets = [0, 64], sizes = [8, 64], strides = [1, 1]} : vector<8x192xf32> to vector<8x64xf32>
    %188 = arith.mulf %187, %171 : vector<8x64xf32>
    %189 = vector.extract_strided_slice %184 {offsets = [0, 0], sizes = [8, 64], strides = [1, 1]} : vector<8x192xf32> to vector<8x64xf32>
    %190 = arith.mulf %189, %186 : vector<8x64xf32>
    %191 = arith.addf %188, %190 : vector<8x64xf32>
    %192 = vector.extract_strided_slice %184 {offsets = [0, 128], sizes = [8, 64], strides = [1, 1]} : vector<8x192xf32> to vector<8x64xf32>
    %193 = math.tanh %191 : vector<8x64xf32>
    %194 = arith.mulf %192, %193 : vector<8x64xf32>
    %195 = tpu.concatenate %54, %74, %94, %114, %134, %154, %174, %194 in 0 : vector<8x64xf32>, vector<8x64xf32>, vector<8x64xf32>, vector<8x64xf32>, vector<8x64xf32>, vector<8x64xf32>, vector<8x64xf32>, vector<8x64xf32> -> vector<64x64xf32>
    %196 = tpu.concatenate %194, %174, %154, %134, %114, %94, %74, %54 in 0 : vector<8x64xf32>, vector<8x64xf32>, vector<8x64xf32>, vector<8x64xf32>, vector<8x64xf32>, vector<8x64xf32>, vector<8x64xf32>, vector<8x64xf32> -> vector<64x64xf32>
    %197 = vector.extract_strided_slice %195 {offsets = [0, 0], sizes = [64, 32], strides = [1, 1]} : vector<64x64xf32> to vector<64x32xf32>
    %198 = vector.extract_strided_slice %196 {offsets = [0, 32], sizes = [64, 32], strides = [1, 1]} : vector<64x64xf32> to vector<64x32xf32>
    %199 = tpu.concatenate %197, %198 in 1 : vector<64x32xf32>, vector<64x32xf32> -> vector<64x64xf32>
    %c1_i32_37 = arith.constant 1 : i32
    %c208_i32_38 = arith.constant 208 : i32
    %c0_i32_39 = arith.constant 0 : i32
    %200 = tpu.memref_slice %arg1[%c208_i32_38, %c0_i32_39] : memref<976x256xbf16, #tpu.memory_space<any>> -> memref<768x256xbf16, #tpu.memory_space<any>>
    %c208_i32_40 = arith.constant 208 : i32
    %c0_i32_41 = arith.constant 0 : i32
    %201 = tpu.memref_slice %arg3[%c208_i32_40, %c0_i32_41] : memref<976x256xbf16, #tpu.memory_space<vmem>> -> memref<768x256xbf16, #tpu.memory_space<vmem>>
    %202 = tpu.memref_slice %arg4[%c1_i32_37] : memref<2x!tpu.dma_semaphore, #tpu.memory_space<semaphore_mem>> -> memref<1x!tpu.dma_semaphore, #tpu.memory_space<semaphore_mem>>
    %203 = tpu.memref_squeeze %202 : memref<1x!tpu.dma_semaphore, #tpu.memory_space<semaphore_mem>> -> memref<!tpu.dma_semaphore, #tpu.memory_space<semaphore_mem>>
    tpu.wait_dma2 semaphore(%203 : memref<!tpu.dma_semaphore, #tpu.memory_space<semaphore_mem>>) src(%200 : memref<768x256xbf16, #tpu.memory_space<any>>) dst(%201 : memref<768x256xbf16, #tpu.memory_space<vmem>>)
    %204 = arith.truncf %199 : vector<64x64xf32> to vector<64x64xbf16>
    %c208 = arith.constant 208 : index
    %c0_42 = arith.constant 0 : index
    %205 = vector.load %arg3[%c208, %c0_42] : memref<976x256xbf16, #tpu.memory_space<vmem>>, vector<64x256xbf16>
    %c272 = arith.constant 272 : index
    %c0_43 = arith.constant 0 : index
    %206 = vector.load %arg3[%c272, %c0_43] : memref<976x256xbf16, #tpu.memory_space<vmem>>, vector<64x256xbf16>
    %c336 = arith.constant 336 : index
    %c0_44 = arith.constant 0 : index
    %207 = vector.load %arg3[%c336, %c0_44] : memref<976x256xbf16, #tpu.memory_space<vmem>>, vector<64x256xbf16>
    %c400 = arith.constant 400 : index
    %c0_45 = arith.constant 0 : index
    %208 = vector.load %arg3[%c400, %c0_45] : memref<976x256xbf16, #tpu.memory_space<vmem>>, vector<1x256xbf16>
    %209 = arith.extf %208 : vector<1x256xbf16> to vector<1x256xf32>
    %cst_46 = arith.constant dense<0.000000e+00> : vector<64x256xf32>
    %210 = tpu.matmul %204, %205, %cst_46 {dimension_numbers = #tpu.dot_dimension_numbers<[1], [0], [0], [1], [0, 0, 1, 1], [], []>} : vector<64x64xbf16>, vector<64x256xbf16>, vector<64x256xf32> -> vector<64x256xf32>
    %211 = vector.broadcast %209 : vector<1x256xf32> to vector<64x256xf32>
    %212 = arith.addf %210, %211 : vector<64x256xf32>
    %cst_47 = arith.constant dense<0.000000e+00> : vector<64x256xf32>
    %213 = tpu.matmul %204, %206, %cst_47 {dimension_numbers = #tpu.dot_dimension_numbers<[1], [0], [0], [1], [0, 0, 1, 1], [], []>} : vector<64x64xbf16>, vector<64x256xbf16>, vector<64x256xf32> -> vector<64x256xf32>
    %214 = vector.extract_strided_slice %213 {offsets = [56, 0], sizes = [8, 256], strides = [1, 1]} : vector<64x256xf32> to vector<8x256xf32>
    %215 = vector.extract_strided_slice %213 {offsets = [48, 0], sizes = [8, 256], strides = [1, 1]} : vector<64x256xf32> to vector<8x256xf32>
    %216 = vector.extract_strided_slice %213 {offsets = [40, 0], sizes = [8, 256], strides = [1, 1]} : vector<64x256xf32> to vector<8x256xf32>
    %217 = vector.extract_strided_slice %213 {offsets = [32, 0], sizes = [8, 256], strides = [1, 1]} : vector<64x256xf32> to vector<8x256xf32>
    %218 = vector.extract_strided_slice %213 {offsets = [24, 0], sizes = [8, 256], strides = [1, 1]} : vector<64x256xf32> to vector<8x256xf32>
    %219 = vector.extract_strided_slice %213 {offsets = [16, 0], sizes = [8, 256], strides = [1, 1]} : vector<64x256xf32> to vector<8x256xf32>
    %220 = vector.extract_strided_slice %213 {offsets = [8, 0], sizes = [8, 256], strides = [1, 1]} : vector<64x256xf32> to vector<8x256xf32>
    %221 = vector.extract_strided_slice %213 {offsets = [0, 0], sizes = [8, 256], strides = [1, 1]} : vector<64x256xf32> to vector<8x256xf32>
    %222 = tpu.concatenate %214, %215, %216, %217, %218, %219, %220, %221 in 0 : vector<8x256xf32>, vector<8x256xf32>, vector<8x256xf32>, vector<8x256xf32>, vector<8x256xf32>, vector<8x256xf32>, vector<8x256xf32>, vector<8x256xf32> -> vector<64x256xf32>
    %223 = arith.addf %212, %222 : vector<64x256xf32>
    %cst_48 = arith.constant 0.000000e+00 : f32
    %224 = vector.broadcast %cst_48 : f32 to vector<8x64xf32>
    %cst_49 = arith.constant 0.000000e+00 : f32
    %225 = vector.broadcast %cst_49 : f32 to vector<8x64xf32>
    %226 = vector.extract_strided_slice %223 {offsets = [0, 0], sizes = [8, 256], strides = [1, 1]} : vector<64x256xf32> to vector<8x256xf32>
    %227 = arith.truncf %224 : vector<8x64xf32> to vector<8x64xbf16>
    %cst_50 = arith.constant dense<0.000000e+00> : vector<8x256xf32>
    %228 = tpu.matmul %227, %207, %cst_50 {dimension_numbers = #tpu.dot_dimension_numbers<[1], [0], [0], [1], [0, 0, 1, 1], [], []>} : vector<8x64xbf16>, vector<64x256xbf16>, vector<8x256xf32> -> vector<8x256xf32>
    %229 = arith.addf %226, %228 : vector<8x256xf32>
    %230 = vector.extract_strided_slice %229 {offsets = [0, 0], sizes = [8, 192], strides = [1, 1]} : vector<8x256xf32> to vector<8x192xf32>
    %231 = arith.negf %230 : vector<8x192xf32>
    %232 = math.exp %231 : vector<8x192xf32>
    %cst_51 = arith.constant 1.000000e+00 : f32
    %233 = vector.broadcast %cst_51 : f32 to vector<8x192xf32>
    %234 = arith.addf %233, %232 : vector<8x192xf32>
    %235 = arith.divf %233, %234 : vector<8x192xf32>
    %236 = vector.extract_strided_slice %229 {offsets = [0, 192], sizes = [8, 64], strides = [1, 1]} : vector<8x256xf32> to vector<8x64xf32>
    %237 = math.tanh %236 : vector<8x64xf32>
    %238 = vector.extract_strided_slice %235 {offsets = [0, 64], sizes = [8, 64], strides = [1, 1]} : vector<8x192xf32> to vector<8x64xf32>
    %239 = arith.mulf %238, %225 : vector<8x64xf32>
    %240 = vector.extract_strided_slice %235 {offsets = [0, 0], sizes = [8, 64], strides = [1, 1]} : vector<8x192xf32> to vector<8x64xf32>
    %241 = arith.mulf %240, %237 : vector<8x64xf32>
    %242 = arith.addf %239, %241 : vector<8x64xf32>
    %243 = vector.extract_strided_slice %235 {offsets = [0, 128], sizes = [8, 64], strides = [1, 1]} : vector<8x192xf32> to vector<8x64xf32>
    %244 = math.tanh %242 : vector<8x64xf32>
    %245 = arith.mulf %243, %244 : vector<8x64xf32>
    %246 = vector.extract_strided_slice %223 {offsets = [8, 0], sizes = [8, 256], strides = [1, 1]} : vector<64x256xf32> to vector<8x256xf32>
    %247 = arith.truncf %245 : vector<8x64xf32> to vector<8x64xbf16>
    %cst_52 = arith.constant dense<0.000000e+00> : vector<8x256xf32>
    %248 = tpu.matmul %247, %207, %cst_52 {dimension_numbers = #tpu.dot_dimension_numbers<[1], [0], [0], [1], [0, 0, 1, 1], [], []>} : vector<8x64xbf16>, vector<64x256xbf16>, vector<8x256xf32> -> vector<8x256xf32>
    %249 = arith.addf %246, %248 : vector<8x256xf32>
    %250 = vector.extract_strided_slice %249 {offsets = [0, 0], sizes = [8, 192], strides = [1, 1]} : vector<8x256xf32> to vector<8x192xf32>
    %251 = arith.negf %250 : vector<8x192xf32>
    %252 = math.exp %251 : vector<8x192xf32>
    %cst_53 = arith.constant 1.000000e+00 : f32
    %253 = vector.broadcast %cst_53 : f32 to vector<8x192xf32>
    %254 = arith.addf %253, %252 : vector<8x192xf32>
    %255 = arith.divf %253, %254 : vector<8x192xf32>
    %256 = vector.extract_strided_slice %249 {offsets = [0, 192], sizes = [8, 64], strides = [1, 1]} : vector<8x256xf32> to vector<8x64xf32>
    %257 = math.tanh %256 : vector<8x64xf32>
    %258 = vector.extract_strided_slice %255 {offsets = [0, 64], sizes = [8, 64], strides = [1, 1]} : vector<8x192xf32> to vector<8x64xf32>
    %259 = arith.mulf %258, %242 : vector<8x64xf32>
    %260 = vector.extract_strided_slice %255 {offsets = [0, 0], sizes = [8, 64], strides = [1, 1]} : vector<8x192xf32> to vector<8x64xf32>
    %261 = arith.mulf %260, %257 : vector<8x64xf32>
    %262 = arith.addf %259, %261 : vector<8x64xf32>
    %263 = vector.extract_strided_slice %255 {offsets = [0, 128], sizes = [8, 64], strides = [1, 1]} : vector<8x192xf32> to vector<8x64xf32>
    %264 = math.tanh %262 : vector<8x64xf32>
    %265 = arith.mulf %263, %264 : vector<8x64xf32>
    %266 = vector.extract_strided_slice %223 {offsets = [16, 0], sizes = [8, 256], strides = [1, 1]} : vector<64x256xf32> to vector<8x256xf32>
    %267 = arith.truncf %265 : vector<8x64xf32> to vector<8x64xbf16>
    %cst_54 = arith.constant dense<0.000000e+00> : vector<8x256xf32>
    %268 = tpu.matmul %267, %207, %cst_54 {dimension_numbers = #tpu.dot_dimension_numbers<[1], [0], [0], [1], [0, 0, 1, 1], [], []>} : vector<8x64xbf16>, vector<64x256xbf16>, vector<8x256xf32> -> vector<8x256xf32>
    %269 = arith.addf %266, %268 : vector<8x256xf32>
    %270 = vector.extract_strided_slice %269 {offsets = [0, 0], sizes = [8, 192], strides = [1, 1]} : vector<8x256xf32> to vector<8x192xf32>
    %271 = arith.negf %270 : vector<8x192xf32>
    %272 = math.exp %271 : vector<8x192xf32>
    %cst_55 = arith.constant 1.000000e+00 : f32
    %273 = vector.broadcast %cst_55 : f32 to vector<8x192xf32>
    %274 = arith.addf %273, %272 : vector<8x192xf32>
    %275 = arith.divf %273, %274 : vector<8x192xf32>
    %276 = vector.extract_strided_slice %269 {offsets = [0, 192], sizes = [8, 64], strides = [1, 1]} : vector<8x256xf32> to vector<8x64xf32>
    %277 = math.tanh %276 : vector<8x64xf32>
    %278 = vector.extract_strided_slice %275 {offsets = [0, 64], sizes = [8, 64], strides = [1, 1]} : vector<8x192xf32> to vector<8x64xf32>
    %279 = arith.mulf %278, %262 : vector<8x64xf32>
    %280 = vector.extract_strided_slice %275 {offsets = [0, 0], sizes = [8, 64], strides = [1, 1]} : vector<8x192xf32> to vector<8x64xf32>
    %281 = arith.mulf %280, %277 : vector<8x64xf32>
    %282 = arith.addf %279, %281 : vector<8x64xf32>
    %283 = vector.extract_strided_slice %275 {offsets = [0, 128], sizes = [8, 64], strides = [1, 1]} : vector<8x192xf32> to vector<8x64xf32>
    %284 = math.tanh %282 : vector<8x64xf32>
    %285 = arith.mulf %283, %284 : vector<8x64xf32>
    %286 = vector.extract_strided_slice %223 {offsets = [24, 0], sizes = [8, 256], strides = [1, 1]} : vector<64x256xf32> to vector<8x256xf32>
    %287 = arith.truncf %285 : vector<8x64xf32> to vector<8x64xbf16>
    %cst_56 = arith.constant dense<0.000000e+00> : vector<8x256xf32>
    %288 = tpu.matmul %287, %207, %cst_56 {dimension_numbers = #tpu.dot_dimension_numbers<[1], [0], [0], [1], [0, 0, 1, 1], [], []>} : vector<8x64xbf16>, vector<64x256xbf16>, vector<8x256xf32> -> vector<8x256xf32>
    %289 = arith.addf %286, %288 : vector<8x256xf32>
    %290 = vector.extract_strided_slice %289 {offsets = [0, 0], sizes = [8, 192], strides = [1, 1]} : vector<8x256xf32> to vector<8x192xf32>
    %291 = arith.negf %290 : vector<8x192xf32>
    %292 = math.exp %291 : vector<8x192xf32>
    %cst_57 = arith.constant 1.000000e+00 : f32
    %293 = vector.broadcast %cst_57 : f32 to vector<8x192xf32>
    %294 = arith.addf %293, %292 : vector<8x192xf32>
    %295 = arith.divf %293, %294 : vector<8x192xf32>
    %296 = vector.extract_strided_slice %289 {offsets = [0, 192], sizes = [8, 64], strides = [1, 1]} : vector<8x256xf32> to vector<8x64xf32>
    %297 = math.tanh %296 : vector<8x64xf32>
    %298 = vector.extract_strided_slice %295 {offsets = [0, 64], sizes = [8, 64], strides = [1, 1]} : vector<8x192xf32> to vector<8x64xf32>
    %299 = arith.mulf %298, %282 : vector<8x64xf32>
    %300 = vector.extract_strided_slice %295 {offsets = [0, 0], sizes = [8, 64], strides = [1, 1]} : vector<8x192xf32> to vector<8x64xf32>
    %301 = arith.mulf %300, %297 : vector<8x64xf32>
    %302 = arith.addf %299, %301 : vector<8x64xf32>
    %303 = vector.extract_strided_slice %295 {offsets = [0, 128], sizes = [8, 64], strides = [1, 1]} : vector<8x192xf32> to vector<8x64xf32>
    %304 = math.tanh %302 : vector<8x64xf32>
    %305 = arith.mulf %303, %304 : vector<8x64xf32>
    %306 = vector.extract_strided_slice %223 {offsets = [32, 0], sizes = [8, 256], strides = [1, 1]} : vector<64x256xf32> to vector<8x256xf32>
    %307 = arith.truncf %305 : vector<8x64xf32> to vector<8x64xbf16>
    %cst_58 = arith.constant dense<0.000000e+00> : vector<8x256xf32>
    %308 = tpu.matmul %307, %207, %cst_58 {dimension_numbers = #tpu.dot_dimension_numbers<[1], [0], [0], [1], [0, 0, 1, 1], [], []>} : vector<8x64xbf16>, vector<64x256xbf16>, vector<8x256xf32> -> vector<8x256xf32>
    %309 = arith.addf %306, %308 : vector<8x256xf32>
    %310 = vector.extract_strided_slice %309 {offsets = [0, 0], sizes = [8, 192], strides = [1, 1]} : vector<8x256xf32> to vector<8x192xf32>
    %311 = arith.negf %310 : vector<8x192xf32>
    %312 = math.exp %311 : vector<8x192xf32>
    %cst_59 = arith.constant 1.000000e+00 : f32
    %313 = vector.broadcast %cst_59 : f32 to vector<8x192xf32>
    %314 = arith.addf %313, %312 : vector<8x192xf32>
    %315 = arith.divf %313, %314 : vector<8x192xf32>
    %316 = vector.extract_strided_slice %309 {offsets = [0, 192], sizes = [8, 64], strides = [1, 1]} : vector<8x256xf32> to vector<8x64xf32>
    %317 = math.tanh %316 : vector<8x64xf32>
    %318 = vector.extract_strided_slice %315 {offsets = [0, 64], sizes = [8, 64], strides = [1, 1]} : vector<8x192xf32> to vector<8x64xf32>
    %319 = arith.mulf %318, %302 : vector<8x64xf32>
    %320 = vector.extract_strided_slice %315 {offsets = [0, 0], sizes = [8, 64], strides = [1, 1]} : vector<8x192xf32> to vector<8x64xf32>
    %321 = arith.mulf %320, %317 : vector<8x64xf32>
    %322 = arith.addf %319, %321 : vector<8x64xf32>
    %323 = vector.extract_strided_slice %315 {offsets = [0, 128], sizes = [8, 64], strides = [1, 1]} : vector<8x192xf32> to vector<8x64xf32>
    %324 = math.tanh %322 : vector<8x64xf32>
    %325 = arith.mulf %323, %324 : vector<8x64xf32>
    %326 = vector.extract_strided_slice %223 {offsets = [40, 0], sizes = [8, 256], strides = [1, 1]} : vector<64x256xf32> to vector<8x256xf32>
    %327 = arith.truncf %325 : vector<8x64xf32> to vector<8x64xbf16>
    %cst_60 = arith.constant dense<0.000000e+00> : vector<8x256xf32>
    %328 = tpu.matmul %327, %207, %cst_60 {dimension_numbers = #tpu.dot_dimension_numbers<[1], [0], [0], [1], [0, 0, 1, 1], [], []>} : vector<8x64xbf16>, vector<64x256xbf16>, vector<8x256xf32> -> vector<8x256xf32>
    %329 = arith.addf %326, %328 : vector<8x256xf32>
    %330 = vector.extract_strided_slice %329 {offsets = [0, 0], sizes = [8, 192], strides = [1, 1]} : vector<8x256xf32> to vector<8x192xf32>
    %331 = arith.negf %330 : vector<8x192xf32>
    %332 = math.exp %331 : vector<8x192xf32>
    %cst_61 = arith.constant 1.000000e+00 : f32
    %333 = vector.broadcast %cst_61 : f32 to vector<8x192xf32>
    %334 = arith.addf %333, %332 : vector<8x192xf32>
    %335 = arith.divf %333, %334 : vector<8x192xf32>
    %336 = vector.extract_strided_slice %329 {offsets = [0, 192], sizes = [8, 64], strides = [1, 1]} : vector<8x256xf32> to vector<8x64xf32>
    %337 = math.tanh %336 : vector<8x64xf32>
    %338 = vector.extract_strided_slice %335 {offsets = [0, 64], sizes = [8, 64], strides = [1, 1]} : vector<8x192xf32> to vector<8x64xf32>
    %339 = arith.mulf %338, %322 : vector<8x64xf32>
    %340 = vector.extract_strided_slice %335 {offsets = [0, 0], sizes = [8, 64], strides = [1, 1]} : vector<8x192xf32> to vector<8x64xf32>
    %341 = arith.mulf %340, %337 : vector<8x64xf32>
    %342 = arith.addf %339, %341 : vector<8x64xf32>
    %343 = vector.extract_strided_slice %335 {offsets = [0, 128], sizes = [8, 64], strides = [1, 1]} : vector<8x192xf32> to vector<8x64xf32>
    %344 = math.tanh %342 : vector<8x64xf32>
    %345 = arith.mulf %343, %344 : vector<8x64xf32>
    %346 = vector.extract_strided_slice %223 {offsets = [48, 0], sizes = [8, 256], strides = [1, 1]} : vector<64x256xf32> to vector<8x256xf32>
    %347 = arith.truncf %345 : vector<8x64xf32> to vector<8x64xbf16>
    %cst_62 = arith.constant dense<0.000000e+00> : vector<8x256xf32>
    %348 = tpu.matmul %347, %207, %cst_62 {dimension_numbers = #tpu.dot_dimension_numbers<[1], [0], [0], [1], [0, 0, 1, 1], [], []>} : vector<8x64xbf16>, vector<64x256xbf16>, vector<8x256xf32> -> vector<8x256xf32>
    %349 = arith.addf %346, %348 : vector<8x256xf32>
    %350 = vector.extract_strided_slice %349 {offsets = [0, 0], sizes = [8, 192], strides = [1, 1]} : vector<8x256xf32> to vector<8x192xf32>
    %351 = arith.negf %350 : vector<8x192xf32>
    %352 = math.exp %351 : vector<8x192xf32>
    %cst_63 = arith.constant 1.000000e+00 : f32
    %353 = vector.broadcast %cst_63 : f32 to vector<8x192xf32>
    %354 = arith.addf %353, %352 : vector<8x192xf32>
    %355 = arith.divf %353, %354 : vector<8x192xf32>
    %356 = vector.extract_strided_slice %349 {offsets = [0, 192], sizes = [8, 64], strides = [1, 1]} : vector<8x256xf32> to vector<8x64xf32>
    %357 = math.tanh %356 : vector<8x64xf32>
    %358 = vector.extract_strided_slice %355 {offsets = [0, 64], sizes = [8, 64], strides = [1, 1]} : vector<8x192xf32> to vector<8x64xf32>
    %359 = arith.mulf %358, %342 : vector<8x64xf32>
    %360 = vector.extract_strided_slice %355 {offsets = [0, 0], sizes = [8, 64], strides = [1, 1]} : vector<8x192xf32> to vector<8x64xf32>
    %361 = arith.mulf %360, %357 : vector<8x64xf32>
    %362 = arith.addf %359, %361 : vector<8x64xf32>
    %363 = vector.extract_strided_slice %355 {offsets = [0, 128], sizes = [8, 64], strides = [1, 1]} : vector<8x192xf32> to vector<8x64xf32>
    %364 = math.tanh %362 : vector<8x64xf32>
    %365 = arith.mulf %363, %364 : vector<8x64xf32>
    %366 = vector.extract_strided_slice %223 {offsets = [56, 0], sizes = [8, 256], strides = [1, 1]} : vector<64x256xf32> to vector<8x256xf32>
    %367 = arith.truncf %365 : vector<8x64xf32> to vector<8x64xbf16>
    %cst_64 = arith.constant dense<0.000000e+00> : vector<8x256xf32>
    %368 = tpu.matmul %367, %207, %cst_64 {dimension_numbers = #tpu.dot_dimension_numbers<[1], [0], [0], [1], [0, 0, 1, 1], [], []>} : vector<8x64xbf16>, vector<64x256xbf16>, vector<8x256xf32> -> vector<8x256xf32>
    %369 = arith.addf %366, %368 : vector<8x256xf32>
    %370 = vector.extract_strided_slice %369 {offsets = [0, 0], sizes = [8, 192], strides = [1, 1]} : vector<8x256xf32> to vector<8x192xf32>
    %371 = arith.negf %370 : vector<8x192xf32>
    %372 = math.exp %371 : vector<8x192xf32>
    %cst_65 = arith.constant 1.000000e+00 : f32
    %373 = vector.broadcast %cst_65 : f32 to vector<8x192xf32>
    %374 = arith.addf %373, %372 : vector<8x192xf32>
    %375 = arith.divf %373, %374 : vector<8x192xf32>
    %376 = vector.extract_strided_slice %369 {offsets = [0, 192], sizes = [8, 64], strides = [1, 1]} : vector<8x256xf32> to vector<8x64xf32>
    %377 = math.tanh %376 : vector<8x64xf32>
    %378 = vector.extract_strided_slice %375 {offsets = [0, 64], sizes = [8, 64], strides = [1, 1]} : vector<8x192xf32> to vector<8x64xf32>
    %379 = arith.mulf %378, %362 : vector<8x64xf32>
    %380 = vector.extract_strided_slice %375 {offsets = [0, 0], sizes = [8, 64], strides = [1, 1]} : vector<8x192xf32> to vector<8x64xf32>
    %381 = arith.mulf %380, %377 : vector<8x64xf32>
    %382 = arith.addf %379, %381 : vector<8x64xf32>
    %383 = vector.extract_strided_slice %375 {offsets = [0, 128], sizes = [8, 64], strides = [1, 1]} : vector<8x192xf32> to vector<8x64xf32>
    %384 = math.tanh %382 : vector<8x64xf32>
    %385 = arith.mulf %383, %384 : vector<8x64xf32>
    %386 = tpu.concatenate %245, %265, %285, %305, %325, %345, %365, %385 in 0 : vector<8x64xf32>, vector<8x64xf32>, vector<8x64xf32>, vector<8x64xf32>, vector<8x64xf32>, vector<8x64xf32>, vector<8x64xf32>, vector<8x64xf32> -> vector<64x64xf32>
    %387 = tpu.concatenate %385, %365, %345, %325, %305, %285, %265, %245 in 0 : vector<8x64xf32>, vector<8x64xf32>, vector<8x64xf32>, vector<8x64xf32>, vector<8x64xf32>, vector<8x64xf32>, vector<8x64xf32>, vector<8x64xf32> -> vector<64x64xf32>
    %388 = vector.extract_strided_slice %386 {offsets = [0, 0], sizes = [64, 32], strides = [1, 1]} : vector<64x64xf32> to vector<64x32xf32>
    %389 = vector.extract_strided_slice %387 {offsets = [0, 32], sizes = [64, 32], strides = [1, 1]} : vector<64x64xf32> to vector<64x32xf32>
    %390 = tpu.concatenate %388, %389 in 1 : vector<64x32xf32>, vector<64x32xf32> -> vector<64x64xf32>
    %c608 = arith.constant 608 : index
    %c0_66 = arith.constant 0 : index
    %391 = vector.load %arg3[%c608, %c0_66] : memref<976x256xbf16, #tpu.memory_space<vmem>>, vector<16x64xbf16>
    %392 = arith.truncf %390 : vector<64x64xf32> to vector<64x64xbf16>
    %cst_67 = arith.constant dense<0.000000e+00> : vector<16x64xf32>
    %393 = tpu.matmul %391, %392, %cst_67 {dimension_numbers = #tpu.dot_dimension_numbers<[1], [0], [0], [1], [0, 0, 1, 1], [], []>} : vector<16x64xbf16>, vector<64x64xbf16>, vector<16x64xf32> -> vector<16x64xf32>
    %394 = arith.truncf %393 : vector<16x64xf32> to vector<16x64xbf16>
    %c416 = arith.constant 416 : index
    %c0_68 = arith.constant 0 : index
    %395 = vector.load %arg3[%c416, %c0_68] : memref<976x256xbf16, #tpu.memory_space<vmem>>, vector<64x256xbf16>
    %c480 = arith.constant 480 : index
    %c0_69 = arith.constant 0 : index
    %396 = vector.load %arg3[%c480, %c0_69] : memref<976x256xbf16, #tpu.memory_space<vmem>>, vector<1x256xbf16>
    %397 = arith.extf %396 : vector<1x256xbf16> to vector<1x256xf32>
    %398 = vector.extract_strided_slice %395 {offsets = [0, 0], sizes = [64, 64], strides = [1, 1]} : vector<64x256xbf16> to vector<64x64xbf16>
    %cst_70 = arith.constant dense<0.000000e+00> : vector<16x64xf32>
    %399 = tpu.matmul %394, %398, %cst_70 {dimension_numbers = #tpu.dot_dimension_numbers<[1], [0], [0], [1], [0, 0, 1, 1], [], []>} : vector<16x64xbf16>, vector<64x64xbf16>, vector<16x64xf32> -> vector<16x64xf32>
    %400 = vector.extract_strided_slice %397 {offsets = [0, 0], sizes = [1, 64], strides = [1, 1]} : vector<1x256xf32> to vector<1x64xf32>
    %401 = vector.broadcast %400 : vector<1x64xf32> to vector<16x64xf32>
    %402 = arith.addf %399, %401 : vector<16x64xf32>
    %cst_71 = arith.constant 0.353553385 : f32
    %403 = vector.broadcast %cst_71 : f32 to vector<16x64xf32>
    %404 = arith.mulf %402, %403 : vector<16x64xf32>
    %405 = vector.extract_strided_slice %395 {offsets = [0, 64], sizes = [64, 64], strides = [1, 1]} : vector<64x256xbf16> to vector<64x64xbf16>
    %cst_72 = arith.constant dense<0.000000e+00> : vector<16x64xf32>
    %406 = tpu.matmul %394, %405, %cst_72 {dimension_numbers = #tpu.dot_dimension_numbers<[1], [0], [0], [1], [0, 0, 1, 1], [], []>} : vector<16x64xbf16>, vector<64x64xbf16>, vector<16x64xf32> -> vector<16x64xf32>
    %407 = vector.extract_strided_slice %397 {offsets = [0, 64], sizes = [1, 64], strides = [1, 1]} : vector<1x256xf32> to vector<1x64xf32>
    %408 = vector.broadcast %407 : vector<1x64xf32> to vector<16x64xf32>
    %409 = arith.addf %406, %408 : vector<16x64xf32>
    %410 = vector.extract_strided_slice %395 {offsets = [0, 128], sizes = [64, 64], strides = [1, 1]} : vector<64x256xbf16> to vector<64x64xbf16>
    %cst_73 = arith.constant dense<0.000000e+00> : vector<16x64xf32>
    %411 = tpu.matmul %394, %410, %cst_73 {dimension_numbers = #tpu.dot_dimension_numbers<[1], [0], [0], [1], [0, 0, 1, 1], [], []>} : vector<16x64xbf16>, vector<64x64xbf16>, vector<16x64xf32> -> vector<16x64xf32>
    %412 = vector.extract_strided_slice %397 {offsets = [0, 128], sizes = [1, 64], strides = [1, 1]} : vector<1x256xf32> to vector<1x64xf32>
    %413 = vector.broadcast %412 : vector<1x64xf32> to vector<16x64xf32>
    %414 = arith.addf %411, %413 : vector<16x64xf32>
    %c624 = arith.constant 624 : index
    %c0_74 = arith.constant 0 : index
    %415 = vector.load %arg3[%c624, %c0_74] : memref<976x256xbf16, #tpu.memory_space<vmem>>, vector<64x128xbf16>
    %c688 = arith.constant 688 : index
    %c0_75 = arith.constant 0 : index
    %416 = vector.load %arg3[%c688, %c0_75] : memref<976x256xbf16, #tpu.memory_space<vmem>>, vector<16x128xbf16>
    %417 = arith.extf %416 : vector<16x128xbf16> to vector<16x128xf32>
    %c704 = arith.constant 704 : index
    %c0_76 = arith.constant 0 : index
    %418 = vector.load %arg3[%c704, %c0_76] : memref<976x256xbf16, #tpu.memory_space<vmem>>, vector<128x128xbf16>
    %c832 = arith.constant 832 : index
    %c0_77 = arith.constant 0 : index
    %419 = vector.load %arg3[%c832, %c0_77] : memref<976x256xbf16, #tpu.memory_space<vmem>>, vector<128x64xbf16>
    %420 = arith.truncf %409 : vector<16x64xf32> to vector<16x64xbf16>
    %421 = tpu.transpose %420, [1, 0] : vector<16x64xbf16> -> vector<64x16xbf16>
    %422 = tpu.concatenate %421, %421, %421, %421, %421, %421, %421, %421 in 1 : vector<64x16xbf16>, vector<64x16xbf16>, vector<64x16xbf16>, vector<64x16xbf16>, vector<64x16xbf16>, vector<64x16xbf16>, vector<64x16xbf16>, vector<64x16xbf16> -> vector<64x128xbf16>
    %423 = arith.mulf %422, %415 : vector<64x128xbf16>
    %424 = arith.truncf %404 : vector<16x64xf32> to vector<16x64xbf16>
    %cst_78 = arith.constant dense<0.000000e+00> : vector<16x128xf32>
    %425 = tpu.matmul %424, %423, %cst_78 {dimension_numbers = #tpu.dot_dimension_numbers<[1], [0], [0], [1], [0, 0, 1, 1], [], []>} : vector<16x64xbf16>, vector<64x128xbf16>, vector<16x128xf32> -> vector<16x128xf32>
    %426 = arith.addf %425, %417 : vector<16x128xf32>
    %cst_79 = arith.constant dense<0xFF800000> : vector<16xf32>
    %427 = vector.multi_reduction <maximumf>, %426, %cst_79 [1] : vector<16x128xf32> to vector<16xf32>
    %428 = vector.shape_cast %427 : vector<16xf32> to vector<16x1xf32>
    %429 = vector.broadcast %428 : vector<16x1xf32> to vector<16x128xf32>
    %430 = arith.subf %426, %429 : vector<16x128xf32>
    %431 = math.exp %430 : vector<16x128xf32>
    %432 = arith.truncf %431 : vector<16x128xf32> to vector<16x128xbf16>
    %cst_80 = arith.constant dense<0.000000e+00> : vector<16x128xf32>
    %433 = tpu.matmul %432, %418, %cst_80 {dimension_numbers = #tpu.dot_dimension_numbers<[1], [0], [0], [1], [0, 0, 1, 1], [], []>} : vector<16x128xbf16>, vector<128x128xbf16>, vector<16x128xf32> -> vector<16x128xf32>
    %434 = tpu.reciprocal %433 {approx = true} : vector<16x128xf32> -> vector<16x128xf32>
    %435 = arith.mulf %431, %434 : vector<16x128xf32>
    %436 = arith.truncf %414 : vector<16x64xf32> to vector<16x64xbf16>
    %437 = tpu.concatenate %436, %436, %436, %436, %436, %436, %436, %436 in 0 : vector<16x64xbf16>, vector<16x64xbf16>, vector<16x64xbf16>, vector<16x64xbf16>, vector<16x64xbf16>, vector<16x64xbf16>, vector<16x64xbf16>, vector<16x64xbf16> -> vector<128x64xbf16>
    %438 = arith.mulf %437, %419 : vector<128x64xbf16>
    %439 = arith.truncf %435 : vector<16x128xf32> to vector<16x128xbf16>
    %cst_81 = arith.constant dense<0.000000e+00> : vector<16x64xf32>
    %440 = tpu.matmul %439, %438, %cst_81 {dimension_numbers = #tpu.dot_dimension_numbers<[1], [0], [0], [1], [0, 0, 1, 1], [], []>} : vector<16x128xbf16>, vector<128x64xbf16>, vector<16x64xf32> -> vector<16x64xf32>
    %441 = arith.truncf %440 : vector<16x64xf32> to vector<16x64xbf16>
    %442 = vector.extract_strided_slice %395 {offsets = [0, 192], sizes = [64, 64], strides = [1, 1]} : vector<64x256xbf16> to vector<64x64xbf16>
    %cst_82 = arith.constant dense<0.000000e+00> : vector<16x64xf32>
    %443 = tpu.matmul %441, %442, %cst_82 {dimension_numbers = #tpu.dot_dimension_numbers<[1], [0], [0], [1], [0, 0, 1, 1], [], []>} : vector<16x64xbf16>, vector<64x64xbf16>, vector<16x64xf32> -> vector<16x64xf32>
    %444 = vector.extract_strided_slice %397 {offsets = [0, 192], sizes = [1, 64], strides = [1, 1]} : vector<1x256xf32> to vector<1x64xf32>
    %445 = vector.broadcast %444 : vector<1x64xf32> to vector<16x64xf32>
    %446 = arith.addf %443, %445 : vector<16x64xf32>
    %c960 = arith.constant 960 : index
    %c0_83 = arith.constant 0 : index
    %447 = vector.load %arg3[%c960, %c0_83] : memref<976x256xbf16, #tpu.memory_space<vmem>>, vector<8x16xbf16>
    %448 = arith.truncf %446 : vector<16x64xf32> to vector<16x64xbf16>
    %cst_84 = arith.constant dense<0.000000e+00> : vector<8x64xf32>
    %449 = tpu.matmul %447, %448, %cst_84 {dimension_numbers = #tpu.dot_dimension_numbers<[1], [0], [0], [1], [0, 0, 1, 1], [], []>} : vector<8x16xbf16>, vector<16x64xbf16>, vector<8x64xf32> -> vector<8x64xf32>
    %c496 = arith.constant 496 : index
    %c0_85 = arith.constant 0 : index
    %450 = vector.load %arg3[%c496, %c0_85] : memref<976x256xbf16, #tpu.memory_space<vmem>>, vector<64x32xbf16>
    %c560 = arith.constant 560 : index
    %c0_86 = arith.constant 0 : index
    %451 = vector.load %arg3[%c560, %c0_86] : memref<976x256xbf16, #tpu.memory_space<vmem>>, vector<32x64xbf16>
    %c592 = arith.constant 592 : index
    %c0_87 = arith.constant 0 : index
    %452 = vector.load %arg3[%c592, %c0_87] : memref<976x256xbf16, #tpu.memory_space<vmem>>, vector<1x32xbf16>
    %453 = arith.extf %452 : vector<1x32xbf16> to vector<1x32xf32>
    %c593 = arith.constant 593 : index
    %c0_88 = arith.constant 0 : index
    %454 = vector.load %arg3[%c593, %c0_88] : memref<976x256xbf16, #tpu.memory_space<vmem>>, vector<1x64xbf16>
    %455 = arith.extf %454 : vector<1x64xbf16> to vector<1x64xf32>
    %456 = arith.truncf %449 : vector<8x64xf32> to vector<8x64xbf16>
    %cst_89 = arith.constant dense<0.000000e+00> : vector<8x32xf32>
    %457 = tpu.matmul %456, %450, %cst_89 {dimension_numbers = #tpu.dot_dimension_numbers<[1], [0], [0], [1], [0, 0, 1, 1], [], []>} : vector<8x64xbf16>, vector<64x32xbf16>, vector<8x32xf32> -> vector<8x32xf32>
    %458 = vector.broadcast %453 : vector<1x32xf32> to vector<8x32xf32>
    %459 = arith.addf %457, %458 : vector<8x32xf32>
    %cst_90 = arith.constant 0.000000e+00 : f32
    %460 = vector.broadcast %cst_90 : f32 to vector<8x32xf32>
    %461 = arith.maximumf %459, %460 : vector<8x32xf32>
    %462 = arith.truncf %461 : vector<8x32xf32> to vector<8x32xbf16>
    %cst_91 = arith.constant dense<0.000000e+00> : vector<8x64xf32>
    %463 = tpu.matmul %462, %451, %cst_91 {dimension_numbers = #tpu.dot_dimension_numbers<[1], [0], [0], [1], [0, 0, 1, 1], [], []>} : vector<8x32xbf16>, vector<32x64xbf16>, vector<8x64xf32> -> vector<8x64xf32>
    %464 = vector.broadcast %455 : vector<1x64xf32> to vector<8x64xf32>
    %465 = arith.addf %463, %464 : vector<8x64xf32>
    %466 = math.tanh %465 : vector<8x64xf32>
    %c0_92 = arith.constant 0 : index
    %c0_93 = arith.constant 0 : index
    %467 = vector.load %arg2[%c0_92, %c0_93] : memref<8x64xf32, #tpu.memory_space<vmem>>, vector<8x64xf32>
    tpu.vector_store %arg2[%c0_92, %c0_93], %466 {strides = array<i32>} : memref<8x64xf32, #tpu.memory_space<vmem>>, vector<8x64xf32>,
    return
  }
}

</mosaic_0001>

<bundles_post_ra>
// kernel: emotion_detector_forward.1
= control target key start
LH: loop header
LB: loop body
LE: loop exit
PB: predicated region body
PF: predicated region fallthrough
CT: control target
= control target key end

     0   :  { %s3683_s9 = smov [#allocation2]   ;;  %s3684_s14 = smov [#allocation2 + $0xd0]   ;;  %s4394_s0 = inlined_call_operand.vmem [shape: f32[64,64], index: 0, kind: input, shape index: {}]   ;;  %s4395_s1 = inlined_call_operand.hbm [shape: bf16[976,256], index: 1, kind: input, shape index: {}]   ;;  %s4396_s2 = inlined_call_operand.vmem [shape: f32[8,64], index: 2, kind: output, shape index: {}]  }
   0x1   :  { %s17_s10 = sshll.u32 %s3683_s9, 4  ;;  %s21_s13 = scalar_lea.hbm %s4395_s1, 3328  ;;  %s18_s10 = int_to_ptr.vmem [resolvable:$true] %s17_s10 }
   0x2   :  { %s31_s15 = sshll.u32 %s3684_s14, 4  ;;  %s3644_s16 = scalar_lea.vmem %s18_s10, 3328  ;;  %s32_s15 = int_to_ptr.vmem [resolvable:$true] %s31_s15 }
   0x3   :  { %p3645_p0 = scmp.ne.s32.totalorder %s18_s10, %s3644_s16  ;;  %s3648_s17 = scalar_lea.vmem %s18_s10, 15616 }
   0x4   :  { %p3649_p1 = scmp.lt.s32.totalorder %s18_s10, %s18_s10  ;;  %p3650_p2 = scmp.lt.s32.totalorder %s3648_s17, %s3644_s16 }
   0x6   :  { %p3651_p3 = por %p3650_p2, %p3649_p1 }
   0x8   :  { %p3652_p4 = pnand %p3651_p3, %p3645_p0 }
   0xa   :  { %3655 = shalt.err (!%p3652_p4)  }
   0xb   :  { %20 = dma.hbm_to_vmem [thread:$0]  %s4395_s1, 3328, %s18_s10, [#allocation3] }
   0xc   :  { %s3666_s20 = scalar_lea.vmem %s32_s15, 12288  ;;  %p3671_p6 = scmp.lt.s32.totalorder %s32_s15, %s18_s10 }
   0xd   :  { %p3667_p5 = scmp.ne.s32.totalorder %s32_s15, %s3666_s20  ;;  %p3672_p7 = scmp.lt.s32.totalorder %s3648_s17, %s3666_s20 }
   0xf   :  { %p3673_p8 = por %p3672_p7, %p3671_p6 }
  0x11   :  { %p3674_p9 = pnand %p3673_p8, %p3667_p5 }
  0x13   :  { %3677 = shalt.err (!%p3674_p9)  }
  0x14   :  { %34 = dma.hbm_to_vmem [thread:$0]  %s21_s13, 12288, %s32_s15, [#allocation3 + $0x1] }
  0x15   :  { %3679 = dma.done.wait [#allocation3], 3328 }
  0x16   :  { %3680 = vsyncadd [#allocation3], 4294963968  ;;  %v3685_v0 = vmov 0   ;;  %v3323_v1 = vld [vmem:[#allocation2 + $0x34] ss:$8 sps:$4 sm:$0xff]   ;;  %v78_v15 = vlaneseq  ;;  %v39_v18 = vld [vmem:[%s4394_s0] sm:$0xff] }
  0x17   :  { %171 = vmatprep.mubr.bf16.mxu0 %v3685_v0  ;;  %284 = vmatprep.mubr.bf16.mxu1 %v3685_v0  ;;  %v3325_v2 = vld [vmem:[#allocation2 + $0x74] ss:$8 sps:$4 sm:$0xff]   ;;  %v3327_v3 = vld [vmem:[#allocation2 + $0x30] ss:$8 sps:$4 sm:$0xff]   ;;  %v3329_v5 = vld [vmem:[#allocation2 + $0x24] ss:$8 sps:$4 sm:$0xff]  }
  0x18   :  { %147 = vmatprep.subr.bf16.mxu0 %v3323_v1  ;;  %v3328_v4 = vld [vmem:[#allocation2 + $0x70] ss:$8 sps:$4 sm:$0xff]   ;;  %260 = vmatprep.subr.bf16.mxu1 %v3325_v2  ;;  %v3331_v6 = vld [vmem:[#allocation2 + $0x64] ss:$8 sps:$4 sm:$0xff]   ;;  %v3333_v7 = vld [vmem:[#allocation2 + $0x20] ss:$8 sps:$4 sm:$0xff]  }
  0x19   :  { %148 = vmatpush1.bf16.msra.mxu0 %v3327_v3  ;;  %261 = vmatpush1.bf16.msra.mxu1 %v3328_v4  ;;  %v3334_v8 = vld [vmem:[#allocation2 + $0x60] ss:$8 sps:$4 sm:$0xff]   ;;  %v3335_v9 = vld [vmem:[#allocation2 + $0x14] ss:$8 sps:$4 sm:$0xff]   ;;  %v3339_v11 = vld [vmem:[#allocation2 + $0x10] ss:$8 sps:$4 sm:$0xff]  }
  0x1a   :  { %149 = vmatprep.subr.bf16.mxu0 %v3329_v5  ;;  %262 = vmatprep.subr.bf16.mxu1 %v3331_v6  ;;  %v3337_v10 = vld [vmem:[#allocation2 + $0x54] ss:$8 sps:$4 sm:$0xff]   ;;  %v3340_v12 = vld [vmem:[#allocation2 + $0x50] ss:$8 sps:$4 sm:$0xff]   ;;  %v3341_v13 = vld [vmem:[#allocation2 + $0x4] ss:$8 sps:$4 sm:$0xff]  }
  0x1b   :  { %v3343_v14 = vld [vmem:[#allocation2 + $0x44] ss:$8 sps:$4 sm:$0xff]   ;;  %v3345_v16 = vld [vmem:[#allocation2] ss:$8 sps:$4 sm:$0xff]   ;;  %v3724_v20 = vld [vmem:[#allocation2 + $0xb4] ss:$8 sps:$4 sm:$0xff]  }
  0x1c   :  { %v3346_v17 = vld [vmem:[#allocation2 + $0x40] ss:$8 sps:$4 sm:$0xff]   ;;  %v3726_v21 = vshrl.u32 %v78_v15, 7  ;;  %vm126_vm0 = vcmask 523264   ;;  %v3728_v23 = vld [vmem:[#allocation2 + $0xb0] ss:$8 sps:$4 sm:$0xff]  }
  0x1d   :  { %150 = vmatpush1.bf16.msra.mxu0 %v3333_v7  ;;  %263 = vmatpush1.bf16.msra.mxu1 %v3334_v8  ;;  %v40_v19 = vld [vmem:[%s4394_s0 + $0x8] sm:$0xff]  ;;  %v3737_v26 = vld [vmem:[#allocation2 + $0xc0] sm:$0x11]  ;;  %v41_v28 = vld [vmem:[%s4394_s0 + $0x10] sm:$0xff]  ;;  %vm996_vm1 = vcmask 261120  }
  0x1e   :  { %151 = vmatprep.subr.bf16.mxu0 %v3335_v9  ;;  %264 = vmatprep.subr.bf16.mxu1 %v3337_v10  ;;  %v47_v22 = vpack.c.bf16 %v40_v19, %v39_v18  ;;  %v3731_v24 = vld [vmem:[#allocation2 + $0xa4] ss:$8 sps:$4 sm:$0xff]   ;;  %v3734_v25 = vsub.s32 0, %v3726_v21  ;;  %v76_v27 = vunpack.c.l.bf16 %v3737_v26  ;;  %v42_v29 = vld [vmem:[%s4394_s0 + $0x18] sm:$0xff]  ;;  %v3750_v30 = vld [vmem:[#allocation2 + $0xa0] ss:$8 sps:$4 sm:$0xff]   ;;  %v77_v46 = vunpack.c.h.bf16 %v3737_v26 }
  0x1f   :  { %v3754_v31 = vld [vmem:[#allocation2 + $0x94] ss:$8 sps:$4 sm:$0xff]   ;;  %v48_v33 = vpack.c.bf16 %v42_v29, %v41_v28  ;;  %v3763_v34 = vld [vmem:[#allocation2 + $0x90] ss:$8 sps:$4 sm:$0xff]   ;;  %v3765_v35 = vld [vmem:[#allocation2 + $0x84] ss:$8 sps:$4 sm:$0xff]  }
  0x20   :  { %v3757_v32 = vrot.slane %v76_v27, %v3734_v25  ;;  %v43_v36 = vld [vmem:[%s4394_s0 + $0x20] sm:$0xff]  ;;  %v44_v37 = vld [vmem:[%s4394_s0 + $0x28] sm:$0xff]  ;;  %v45_v40 = vld [vmem:[%s4394_s0 + $0x30] sm:$0xff]  ;;  %v85_v51 = vrot.slane %v77_v46, %v3734_v25 }
  0x21   :  { %152 = vmatpush1.bf16.msra.mxu0 %v3339_v11  ;;  %265 = vmatpush1.bf16.msra.mxu1 %v3340_v12  ;;  %v3779_v38 = vld [vmem:[#allocation2 + $0x80] ss:$8 sps:$4 sm:$0xff]   ;;  %v49_v39 = vpack.c.bf16 %v44_v37, %v43_v36  ;;  %v46_v41 = vld [vmem:[%s4394_s0 + $0x38] sm:$0xff]  ;;  %s3686_s0 = smov 64  }
  0x22   :  { %153 = vmatprep.subr.bf16.mxu0 %v3341_v13  ;;  %266 = vmatprep.subr.bf16.mxu1 %v3343_v14  ;;  %v50_v42 = vpack.c.bf16 %v46_v41, %v45_v40 }
  0x25   :  { %154 = vmatpush1.bf16.msra.mxu0 %v3345_v16  ;;  %267 = vmatpush1.bf16.msra.mxu1 %v3346_v17 }
  0x26   :  { %392 = vmatprep.subr.bf16.mxu0 %v3724_v20  ;;  %469 = vmatprep.subr.bf16.mxu1 %v3724_v20 }
  0x28   :  { %2967 = vmatmul.mubr.msk.bf16.vlgmr.msra.gmra.mxu0 %vm126_vm0, %v47_v22  ;;  %2979 = vmatmul.mubr.msk.bf16.vlgmr.msra.gmra.mxu1 %vm126_vm0, %v47_v22 }
  0x29   :  { %393 = vmatpush1.bf16.msra.mxu0 %v3728_v23  ;;  %181 = vmatprep.mubr.bf16.mxu0 %v3685_v0 }
  0x2a   :  { %294 = vmatprep.mubr.bf16.mxu1 %v3685_v0  ;;  %394 = vmatprep.subr.bf16.mxu0 %v3731_v24 }
  0x2b   :  { %470 = vmatpush1.bf16.msra.mxu1 %v3728_v23 }
  0x2c   :  { %471 = vmatprep.subr.bf16.mxu1 %v3731_v24 }
  0x2d   :  { %395 = vmatpush1.bf16.msra.mxu0 %v3750_v30 }
  0x2e   :  { %396 = vmatprep.subr.bf16.mxu0 %v3754_v31 }
  0x2f   :  { %472 = vmatpush1.bf16.msra.mxu1 %v3750_v30 }
  0x30   :  { %2968 = vmatmul.mubr.msk.bf16.gmra.mxu0 %vm126_vm0, %v48_v33  ;;  %2980 = vmatmul.mubr.msk.bf16.gmra.mxu1 %vm126_vm0, %v48_v33 }
  0x31   :  { %191 = vmatprep.mubr.bf16.mxu0 %v3685_v0  ;;  %304 = vmatprep.mubr.bf16.mxu1 %v3685_v0 }
  0x32   :  { %397 = vmatpush1.bf16.msra.mxu0 %v3763_v34  ;;  %473 = vmatprep.subr.bf16.mxu1 %v3754_v31 }
  0x33   :  { %398 = vmatprep.subr.bf16.mxu0 %v3765_v35  ;;  %474 = vmatpush1.bf16.msra.mxu1 %v3763_v34 }
  0x34   :  { %475 = vmatprep.subr.bf16.mxu1 %v3765_v35 }
  0x36   :  { %399 = vmatpush1.bf16.msra.mxu0 %v3779_v38 }
  0x37   :  { %476 = vmatpush1.bf16.msra.mxu1 %v3779_v38  ;;  %546 = vmatprep.subr.bf16.mxu0 %v3724_v20 }
  0x38   :  { %2969 = vmatmul.mubr.msk.bf16.gmra.mxu0 %vm126_vm0, %v49_v39  ;;  %2981 = vmatmul.mubr.msk.bf16.gmra.mxu1 %vm126_vm0, %v49_v39 }
  0x39   :  { %201 = vmatprep.mubr.bf16.mxu0 %v3685_v0  ;;  %314 = vmatprep.mubr.bf16.mxu1 %v3685_v0 }
  0x3a   :  { %623 = vmatprep.subr.bf16.mxu1 %v3724_v20 }
  0x40   :  { %2970 = vmatmul.mubr.msk.bf16.gmra.mxu0 %vm126_vm0, %v50_v42  ;;  %2982 = vmatmul.mubr.msk.bf16.gmra.mxu1 %vm126_vm0, %v50_v42 }
  0x41   :  { %416 = vmatprep.mubr.bf16.mxu0 %v3685_v0  ;;  %493 = vmatprep.mubr.bf16.mxu1 %v3685_v0 }
  0x48   :  { %417 = vmatmul.mubr.bf16.vlgmr.msra.gmra.mxu0 %v3685_v0 }
  0x49   :  { %547 = vmatpush1.bf16.msra.mxu0 %v3728_v23  ;;  %570 = vmatprep.mubr.bf16.mxu0 %v3685_v0 }
  0x4a   :  { %548 = vmatprep.subr.bf16.mxu0 %v3731_v24 }
  0x4d   :  { %549 = vmatpush1.bf16.msra.mxu0 %v3750_v30 }
  0x4e   :  { %550 = vmatprep.subr.bf16.mxu0 %v3754_v31 }
  0x51   :  { %551 = vmatpush1.bf16.msra.mxu0 %v3763_v34 }
  0x52   :  { %552 = vmatprep.subr.bf16.mxu0 %v3765_v35 }
  0x55   :  { %553 = vmatpush1.bf16.msra.mxu0 %v3779_v38 }
  0x56   :  { %700 = vmatprep.subr.bf16.mxu0 %v3724_v20 }
  0xe8   :  { %v173_v43 = vpop.f32.mrf.mxu0  ;;  %v286_v44 = vpop.f32.mrf.mxu1 }
  0xe9   :  { %v174_v45 = vadd.f32 %v173_v43, %v3757_v32 }
  0xea   :  { %v175_v47 = vpop.f32.mrf.mxu0  ;;  %v288_v48 = vpop.f32.mrf.mxu1 }
  0xec   :  { %v177_v49 = vpop.f32.mrf.mxu0  ;;  %v290_v50 = vpop.f32.mrf.mxu1 }
  0xed   :  { %v178_v52 = vadd.f32 %v177_v49, %v3757_v32 }
  0xee   :  { %v179_v53 = vpop.f32.mrf.mxu0  ;;  %v292_v54 = vpop.f32.mrf.mxu1 }
  0xef   :  { %v180_v55 = vadd.f32 %v179_v53, %v85_v51 }
  0xf0   :  { %v183_v56 = vpop.f32.mrf.mxu0  ;;  %v296_v57 = vpop.f32.mrf.mxu1 }
  0xf1   :  { %v184_v58 = vadd.f32 %v183_v56, %v3757_v32 }
  0xf2   :  { %v185_v59 = vpop.f32.mrf.mxu0  ;;  %v298_v60 = vpop.f32.mrf.mxu1 }
  0xf3   :  { %v186_v61 = vadd.f32 %v185_v59, %v85_v51 }
  0xf4   :  { %v187_v62 = vpop.f32.mrf.mxu0  ;;  %v300_v63 = vpop.f32.mrf.mxu1 }
  0xf5   :  { %v188_v1 = vadd.f32 %v187_v62, %v3757_v32  ;;  %v176_v62 = vadd.f32 %v175_v47, %v85_v51 }
  0xf6   :  { %v189_v2 = vpop.f32.mrf.mxu0  ;;  %v302_v3 = vpop.f32.mrf.mxu1 }
  0xf7   :  { %v190_v4 = vadd.f32 %v189_v2, %v85_v51 }
  0xf8   :  { %v193_v5 = vpop.f32.mrf.mxu0  ;;  %v306_v6 = vpop.f32.mrf.mxu1 }
  0xf9   :  { %v194_v7 = vadd.f32 %v193_v5, %v3757_v32  ;;  %v3820_v8 = vadd.f32 %v306_v6, %v188_v1 }
  0xfa   :  { %v195_v9 = vpop.f32.mrf.mxu0  ;;  %v308_v10 = vpop.f32.mrf.mxu1 }
  0xfb   :  { %v196_v11 = vadd.f32 %v195_v9, %v85_v51  ;;  %v3822_v12 = vadd.f32 %v308_v10, %v190_v4  ;;  %v3824_v13 = vadd.f32 %v300_v63, %v194_v7 }
  0xfc   :  { %v197_v14 = vpop.f32.mrf.mxu0  ;;  %v310_v15 = vpop.f32.mrf.mxu1 }
  0xfd   :  { %v198_v16 = vadd.f32 %v197_v14, %v3757_v32  ;;  %v3827_v17 = vadd.f32 %v310_v15, %v184_v58  ;;  %v3829_v18 = vadd.f32 %v302_v3, %v196_v11 }
  0xfe   :  { %v199_v19 = vpop.f32.mrf.mxu0  ;;  %v312_v22 = vpop.f32.mrf.mxu1 }
  0xff   :  { %v200_v26 = vadd.f32 %v199_v19, %v85_v51  ;;  %v3831_v27 = vadd.f32 %v312_v22, %v186_v61  ;;  %v3833_v28 = vadd.f32 %v296_v57, %v198_v16 }
 0x100   :  { %v203_v29 = vpop.f32.mrf.mxu0  ;;  %v316_v33 = vpop.f32.mrf.mxu1 }
 0x101   :  { %v204_v36 = vadd.f32 %v203_v29, %v3757_v32  ;;  %v3836_v37 = vadd.f32 %v316_v33, %v178_v52  ;;  %v3838_v39 = vadd.f32 %v298_v60, %v200_v26 }
 0x102   :  { %v205_v40 = vpop.f32.mrf.mxu0  ;;  %v318_v41 = vpop.f32.mrf.mxu1 }
 0x103   :  { %v206_v42 = vadd.f32 %v205_v40, %v85_v51  ;;  %v328_v43 = vadd.f32 %v318_v41, %v180_v55  ;;  %v3840_v46 = vadd.f32 %v290_v50, %v204_v36 }
 0x104   :  { %v207_v49 = vpop.f32.mrf.mxu0  ;;  %v320_v53 = vpop.f32.mrf.mxu1 }
 0x105   :  { %v208_v56 = vadd.f32 %v207_v49, %v3757_v32  ;;  %v325_v57 = vadd.f32 %v320_v53, %v174_v45  ;;  %v3843_v58 = vadd.f32 %v292_v54, %v206_v42 }
 0x106   :  { %v209_v59 = vpop.f32.mrf.mxu0  ;;  %v322_v61 = vpop.f32.mrf.mxu1 }
 0x107   :  { %v210_v52 = vadd.f32 %v209_v59, %v85_v51  ;;  %v3845_v63 = vadd.f32 %v286_v44, %v208_v56  ;;  %v326_v1 = vadd.f32 %v322_v61, %v176_v62 }
 0x108   :  { %v418_v60 = vpop.f32.mrf.mxu0 }
 0x109   :  { %v425_v2 = vadd.f32 %v418_v60, %v325_v57  ;;  %v3847_v3 = vadd.f32 %v288_v48, %v210_v52 }
 0x10a   :  { %v420_v50 = vpop.f32.mrf.mxu0 }
 0x10b   :  { %v426_v55 = vadd.f32 %v420_v50, %v326_v1  ;;  %v2991_v45 = vmul.f32 -1.442695, %v425_v2 }
 0x10c   :  { %v422_v4 = vpop.f32.mrf.mxu0 }
 0x10d   :  { %3359 = vtanh.f32 %v426_v55  ;;  %v2992_v11 = vmul.f32 -1.442695, %v426_v55 }
 0x10e   :  { %v423_v5 = vpop.f32.mrf.mxu0  ;;  %3361 = vpow2.f32 %v2991_v45 }
 0x11a   :  { %v3360_v32 = vpop.eup %3359 }
 0x11b   :  { %442 = vrot.lane.b32.xlu0 %v3360_v32, %s3686_s0  ;;  %v3362_v47 = vpop.eup %3361 }
 0x11c   :  { %v433_v51 = vadd.f32 1.0, %v3362_v47 }
 0x11e   :  { %3363 = vrcp.f32 %v433_v51 }
 0x12b   :  { %v3364_v44 = vpop.eup %3363 }
 0x12c   :  { %v440_v48 = vmul.f32 0.0, %v3364_v44 }
 0x18d   :  { %v443_v54 = vpop.permute.xlu0 %442 }
 0x18e   :  { %v445_v6 = vmul.f32 %v3364_v44, %v443_v54 }
 0x190   :  { %447 = vrot.lane.b32.xlu0 %v445_v6, %s3686_s0 }
 0x202   :  { %v448_v7 = vpop.permute.xlu0 %447 }
 0x203   :  { %v450_v9 = vadd.f32 %v448_v7, %v440_v48 }
 0x205   :  { %3365 = vtanh.f32 %v450_v9 }
 0x206   :  { %3367 = vpow2.f32 %v2992_v11 }
 0x212   :  { %v3366_v10 = vpop.eup %3365 }
 0x213   :  { %453 = vrot.lane.b32.xlu1 %v3366_v10, %s3686_s0  ;;  %v3368_v14 = vpop.eup %3367 }
 0x214   :  { %v434_v15 = vadd.f32 1.0, %v3368_v14 }
 0x216   :  { %3369 = vrcp.f32 %v434_v15 }
 0x223   :  { %v3370_v16 = vpop.eup %3369 }
 0x285   :  { %v454_v19 = vpop.permute.xlu1 %453 }
 0x286   :  { %v3852_v22 = vmul.f32 %v3370_v16, %v454_v19 }
 0x288   :  { %v457_v26 = vpack.c.bf16 %v3852_v22, %v3852_v22 }
 0x28a   :  { %2993 = vmatmul.mubr.msk.bf16.vlgmr.msra.gmra.mxu1 %vm126_vm0, %v457_v26 }
 0x28b   :  { %624 = vmatpush1.bf16.msra.mxu1 %v3728_v23  ;;  %647 = vmatprep.mubr.bf16.mxu1 %v3685_v0 }
 0x28c   :  { %625 = vmatprep.subr.bf16.mxu1 %v3731_v24 }
 0x28f   :  { %626 = vmatpush1.bf16.msra.mxu1 %v3750_v30 }
 0x290   :  { %627 = vmatprep.subr.bf16.mxu1 %v3754_v31 }
 0x293   :  { %628 = vmatpush1.bf16.msra.mxu1 %v3763_v34 }
 0x294   :  { %629 = vmatprep.subr.bf16.mxu1 %v3765_v35 }
 0x297   :  { %630 = vmatpush1.bf16.msra.mxu1 %v3779_v38 }
 0x298   :  { %777 = vmatprep.subr.bf16.mxu1 %v3724_v20 }
 0x34a   :  { %v495_v29 = vpop.f32.mrf.mxu1 }
 0x34b   :  { %v502_v33 = vadd.f32 %v495_v29, %v3836_v37 }
 0x34c   :  { %v497_v36 = vpop.f32.mrf.mxu1 }
 0x34d   :  { %v503_v40 = vadd.f32 %v497_v36, %v328_v43  ;;  %v2994_v53 = vmul.f32 -1.442695, %v502_v33 }
 0x34e   :  { %v499_v41 = vpop.f32.mrf.mxu1 }
 0x34f   :  { %3371 = vtanh.f32 %v503_v40  ;;  %v2995_v1 = vmul.f32 -1.442695, %v503_v40 }
 0x350   :  { %v500_v42 = vpop.f32.mrf.mxu1  ;;  %3373 = vpow2.f32 %v2994_v53 }
 0x35c   :  { %v3372_v49 = vpop.eup %3371 }
 0x35d   :  { %519 = vrot.lane.b32.xlu1 %v3372_v49, %s3686_s0  ;;  %v3374_v56 = vpop.eup %3373 }
 0x35e   :  { %v510_v57 = vadd.f32 1.0, %v3374_v56 }
 0x360   :  { %3375 = vrcp.f32 %v510_v57 }
 0x36d   :  { %v3376_v59 = vpop.eup %3375 }
 0x36e   :  { %v517_v52 = vmul.f32 %v3376_v59, %v450_v9 }
 0x3cf   :  { %v520_v61 = vpop.permute.xlu1 %519 }
 0x3d0   :  { %v522_v62 = vmul.f32 %v3376_v59, %v520_v61 }
 0x3d2   :  { %524 = vrot.lane.b32.xlu0 %v522_v62, %s3686_s0 }
 0x444   :  { %v525_v37 = vpop.permute.xlu0 %524 }
 0x445   :  { %v527_v60 = vadd.f32 %v525_v37, %v517_v52 }
 0x447   :  { %3377 = vtanh.f32 %v527_v60 }
 0x448   :  { %3379 = vpow2.f32 %v2995_v1 }
 0x454   :  { %v3378_v43 = vpop.eup %3377 }
 0x455   :  { %530 = vrot.lane.b32.xlu1 %v3378_v43, %s3686_s0  ;;  %v3380_v2 = vpop.eup %3379 }
 0x456   :  { %v511_v50 = vadd.f32 1.0, %v3380_v2 }
 0x458   :  { %3381 = vrcp.f32 %v511_v50 }
 0x465   :  { %v3382_v55 = vpop.eup %3381 }
 0x4c7   :  { %v531_v4 = vpop.permute.xlu1 %530 }
 0x4c8   :  { %v3870_v5 = vmul.f32 %v3382_v55, %v531_v4 }
 0x4ca   :  { %v534_v32 = vpack.c.bf16 %v3870_v5, %v3870_v5 }
 0x4cc   :  { %2996 = vmatmul.mubr.msk.bf16.vlgmr.msra.gmra.mxu0 %vm126_vm0, %v534_v32 }
 0x4cd   :  { %701 = vmatpush1.bf16.msra.mxu0 %v3728_v23  ;;  %724 = vmatprep.mubr.bf16.mxu0 %v3685_v0 }
 0x4ce   :  { %702 = vmatprep.subr.bf16.mxu0 %v3731_v24 }
 0x4d1   :  { %703 = vmatpush1.bf16.msra.mxu0 %v3750_v30 }
 0x4d2   :  { %704 = vmatprep.subr.bf16.mxu0 %v3754_v31 }
 0x4d5   :  { %705 = vmatpush1.bf16.msra.mxu0 %v3763_v34 }
 0x4d6   :  { %706 = vmatprep.subr.bf16.mxu0 %v3765_v35 }
 0x4d9   :  { %707 = vmatpush1.bf16.msra.mxu0 %v3779_v38 }
 0x4da   :  { %854 = vmatprep.subr.bf16.mxu0 %v3724_v20 }
 0x58c   :  { %v572_v45 = vpop.f32.mrf.mxu0 }
 0x58d   :  { %v579_v47 = vadd.f32 %v572_v45, %v3827_v17 }
 0x58e   :  { %v574_v51 = vpop.f32.mrf.mxu0 }
 0x58f   :  { %v580_v44 = vadd.f32 %v574_v51, %v3831_v27  ;;  %v2997_v7 = vmul.f32 -1.442695, %v579_v47 }
 0x590   :  { %v576_v54 = vpop.f32.mrf.mxu0 }
 0x591   :  { %3383 = vtanh.f32 %v580_v44  ;;  %v2998_v26 = vmul.f32 -1.442695, %v580_v44 }
 0x592   :  { %v577_v6 = vpop.f32.mrf.mxu0  ;;  %3385 = vpow2.f32 %v2997_v7 }
 0x59e   :  { %v3384_v48 = vpop.eup %3383 }
 0x59f   :  { %596 = vrot.lane.b32.xlu0 %v3384_v48, %s3686_s0  ;;  %v3386_v9 = vpop.eup %3385 }
 0x5a0   :  { %v587_v10 = vadd.f32 1.0, %v3386_v9 }
 0x5a2   :  { %3387 = vrcp.f32 %v587_v10 }
 0x5af   :  { %v3388_v11 = vpop.eup %3387 }
 0x5b0   :  { %v594_v17 = vmul.f32 %v3388_v11, %v527_v60 }
 0x611   :  { %v597_v14 = vpop.permute.xlu0 %596 }
 0x612   :  { %v599_v15 = vmul.f32 %v3388_v11, %v597_v14 }
 0x614   :  { %601 = vrot.lane.b32.xlu1 %v599_v15, %s3686_s0 }
 0x686   :  { %v602_v16 = vpop.permute.xlu1 %601 }
 0x687   :  { %v604_v19 = vadd.f32 %v602_v16, %v594_v17 }
 0x689   :  { %3389 = vtanh.f32 %v604_v19 }
 0x68a   :  { %3391 = vpow2.f32 %v2998_v26 }
 0x696   :  { %v3390_v27 = vpop.eup %3389 }
 0x697   :  { %607 = vrot.lane.b32.xlu0 %v3390_v27, %s3686_s0  ;;  %v3392_v29 = vpop.eup %3391 }
 0x698   :  { %v588_v33 = vadd.f32 1.0, %v3392_v29 }
 0x69a   :  { %3393 = vrcp.f32 %v588_v33 }
 0x6a7   :  { %v3394_v36 = vpop.eup %3393 }
 0x709   :  { %v608_v40 = vpop.permute.xlu0 %607 }
 0x70a   :  { %v3889_v41 = vmul.f32 %v3394_v36, %v608_v40 }
 0x70c   :  { %v611_v42 = vpack.c.bf16 %v3889_v41, %v3889_v41 }
 0x70e   :  { %2999 = vmatmul.mubr.msk.bf16.vlgmr.msra.gmra.mxu1 %vm126_vm0, %v611_v42 }
 0x70f   :  { %778 = vmatpush1.bf16.msra.mxu1 %v3728_v23  ;;  %801 = vmatprep.mubr.bf16.mxu1 %v3685_v0 }
 0x710   :  { %779 = vmatprep.subr.bf16.mxu1 %v3731_v24 }
 0x713   :  { %780 = vmatpush1.bf16.msra.mxu1 %v3750_v30 }
 0x714   :  { %781 = vmatprep.subr.bf16.mxu1 %v3754_v31 }
 0x717   :  { %782 = vmatpush1.bf16.msra.mxu1 %v3763_v34 }
 0x718   :  { %783 = vmatprep.subr.bf16.mxu1 %v3765_v35 }
 0x71b   :  { %784 = vmatpush1.bf16.msra.mxu1 %v3779_v38 }
 0x71c   :  { %931 = vmatprep.subr.bf16.mxu1 %v3724_v20 }
 0x7ce   :  { %v649_v49 = vpop.f32.mrf.mxu1 }
 0x7cf   :  { %v656_v53 = vadd.f32 %v649_v49, %v3820_v8 }
 0x7d0   :  { %v651_v56 = vpop.f32.mrf.mxu1 }
 0x7d1   :  { %v657_v57 = vadd.f32 %v651_v56, %v3822_v12  ;;  %v3000_v52 = vmul.f32 -1.442695, %v656_v53 }
 0x7d2   :  { %v653_v59 = vpop.f32.mrf.mxu1 }
 0x7d3   :  { %3395 = vtanh.f32 %v657_v57  ;;  %v3001_v55 = vmul.f32 -1.442695, %v657_v57 }
 0x7d4   :  { %v654_v61 = vpop.f32.mrf.mxu1  ;;  %3397 = vpow2.f32 %v3000_v52 }
 0x7e0   :  { %v3396_v62 = vpop.eup %3395 }
 0x7e1   :  { %673 = vrot.lane.b32.xlu1 %v3396_v62, %s3686_s0  ;;  %v3398_v37 = vpop.eup %3397 }
 0x7e2   :  { %v664_v60 = vadd.f32 1.0, %v3398_v37 }
 0x7e4   :  { %3399 = vrcp.f32 %v664_v60 }
 0x7f1   :  { %v3400_v43 = vpop.eup %3399 }
 0x7f2   :  { %v671_v8 = vmul.f32 %v3400_v43, %v604_v19 }
 0x853   :  { %v674_v1 = vpop.permute.xlu1 %673 }
 0x854   :  { %v676_v20 = vmul.f32 %v3400_v43, %v674_v1 }
 0x856   :  { %678 = vrot.lane.b32.xlu0 %v676_v20, %s3686_s0 }
 0x8c8   :  { %v679_v2 = vpop.permute.xlu0 %678 }
 0x8c9   :  { %v681_v50 = vadd.f32 %v679_v2, %v671_v8 }
 0x8cb   :  { %3401 = vtanh.f32 %v681_v50 }
 0x8cc   :  { %3403 = vpow2.f32 %v3001_v55 }
 0x8d8   :  { %v3402_v12 = vpop.eup %3401 }
 0x8d9   :  { %684 = vrot.lane.b32.xlu1 %v3402_v12, %s3686_s0  ;;  %v3404_v4 = vpop.eup %3403 }
 0x8da   :  { %v665_v32 = vadd.f32 1.0, %v3404_v4 }
 0x8dc   :  { %3405 = vrcp.f32 %v665_v32 }
 0x8e9   :  { %v3406_v45 = vpop.eup %3405 }
 0x94b   :  { %v685_v47 = vpop.permute.xlu1 %684 }
 0x94c   :  { %v687_v51 = vmul.f32 %v3406_v45, %v685_v47 }
 0x94e   :  { %v688_v44 = vpack.c.bf16 %v687_v51, %v687_v51 }
 0x950   :  { %3002 = vmatmul.mubr.msk.bf16.vlgmr.msra.gmra.mxu0 %vm126_vm0, %v688_v44 }
 0x951   :  { %855 = vmatpush1.bf16.msra.mxu0 %v3728_v23  ;;  %878 = vmatprep.mubr.bf16.mxu0 %v3685_v0 }
 0x952   :  { %856 = vmatprep.subr.bf16.mxu0 %v3731_v24 }
 0x955   :  { %857 = vmatpush1.bf16.msra.mxu0 %v3750_v30 }
 0x956   :  { %858 = vmatprep.subr.bf16.mxu0 %v3754_v31 }
 0x959   :  { %859 = vmatpush1.bf16.msra.mxu0 %v3763_v34 }
 0x95a   :  { %860 = vmatprep.subr.bf16.mxu0 %v3765_v35 }
 0x95d   :  { %861 = vmatpush1.bf16.msra.mxu0 %v3779_v38 }
 0xa10   :  { %v726_v54 = vpop.f32.mrf.mxu0 }
 0xa11   :  { %v733_v6 = vadd.f32 %v726_v54, %v3824_v13 }
 0xa12   :  { %v728_v48 = vpop.f32.mrf.mxu0 }
 0xa13   :  { %v734_v7 = vadd.f32 %v728_v48, %v3829_v18  ;;  %v3003_v14 = vmul.f32 -1.442695, %v733_v6 }
 0xa14   :  { %v730_v9 = vpop.f32.mrf.mxu0 }
 0xa15   :  { %3407 = vtanh.f32 %v734_v7  ;;  %v3004_v33 = vmul.f32 -1.442695, %v734_v7 }
 0xa16   :  { %v731_v10 = vpop.f32.mrf.mxu0  ;;  %3409 = vpow2.f32 %v3003_v14 }
 0xa22   :  { %v3408_v11 = vpop.eup %3407 }
 0xa23   :  { %750 = vrot.lane.b32.xlu0 %v3408_v11, %s3686_s0  ;;  %v3410_v15 = vpop.eup %3409 }
 0xa24   :  { %v741_v17 = vadd.f32 1.0, %v3410_v15 }
 0xa26   :  { %3411 = vrcp.f32 %v741_v17 }
 0xa33   :  { %v3412_v16 = vpop.eup %3411 }
 0xa34   :  { %v748_v13 = vmul.f32 %v3412_v16, %v681_v50 }
 0xa95   :  { %v751_v19 = vpop.permute.xlu0 %750 }
 0xa96   :  { %v753_v27 = vmul.f32 %v3412_v16, %v751_v19 }
 0xa98   :  { %755 = vrot.lane.b32.xlu1 %v753_v27, %s3686_s0 }
 0xb0a   :  { %v756_v26 = vpop.permute.xlu1 %755 }
 0xb0b   :  { %v758_v29 = vadd.f32 %v756_v26, %v748_v13 }
 0xb0d   :  { %3413 = vtanh.f32 %v758_v29 }
 0xb0e   :  { %3415 = vpow2.f32 %v3004_v33 }
 0xb1a   :  { %v3414_v18 = vpop.eup %3413 }
 0xb1b   :  { %761 = vrot.lane.b32.xlu0 %v3414_v18, %s3686_s0  ;;  %v3416_v36 = vpop.eup %3415 }
 0xb1c   :  { %v742_v40 = vadd.f32 1.0, %v3416_v36 }
 0xb1e   :  { %3417 = vrcp.f32 %v742_v40 }
 0xb2b   :  { %v3418_v42 = vpop.eup %3417 }
 0xb8d   :  { %v762_v49 = vpop.permute.xlu0 %761 }
 0xb8e   :  { %v764_v53 = vmul.f32 %v3418_v42, %v762_v49 }
 0xb90   :  { %v765_v56 = vpack.c.bf16 %v764_v53, %v764_v53  ;;  %v3923_v57 = vsel %vm996_vm1, %v687_v51, %v764_v53  ;;  %v3926_v59 = vsel %vm996_vm1, %v764_v53, %v687_v51 }
 0xb92   :  { %3005 = vmatmul.mubr.msk.bf16.vlgmr.msra.gmra.mxu1 %vm126_vm0, %v765_v56 }
 0xb93   :  { %932 = vmatpush1.bf16.msra.mxu1 %v3728_v23  ;;  %955 = vmatprep.mubr.bf16.mxu1 %v3685_v0 }
 0xb94   :  { %933 = vmatprep.subr.bf16.mxu1 %v3731_v24 }
 0xb97   :  { %934 = vmatpush1.bf16.msra.mxu1 %v3750_v30 }
 0xb98   :  { %935 = vmatprep.subr.bf16.mxu1 %v3754_v31 }
 0xb9b   :  { %936 = vmatpush1.bf16.msra.mxu1 %v3763_v34 }
 0xb9c   :  { %937 = vmatprep.subr.bf16.mxu1 %v3765_v35 }
 0xb9f   :  { %938 = vmatpush1.bf16.msra.mxu1 %v3779_v38 }
 0xc52   :  { %v803_v61 = vpop.f32.mrf.mxu1 }
 0xc53   :  { %v810_v62 = vadd.f32 %v803_v61, %v3833_v28 }
 0xc54   :  { %v805_v52 = vpop.f32.mrf.mxu1 }
 0xc55   :  { %v811_v23 = vadd.f32 %v805_v52, %v3838_v39  ;;  %v3006_v30 = vmul.f32 -1.442695, %v810_v62 }
 0xc56   :  { %v807_v37 = vpop.f32.mrf.mxu1 }
 0xc57   :  { %3419 = vtanh.f32 %v811_v23  ;;  %v3007_v8 = vmul.f32 -1.442695, %v811_v23 }
 0xc58   :  { %v808_v60 = vpop.f32.mrf.mxu1  ;;  %3421 = vpow2.f32 %v3006_v30 }
 0xc64   :  { %v3420_v24 = vpop.eup %3419 }
 0xc65   :  { %827 = vrot.lane.b32.xlu1 %v3420_v24, %s3686_s0  ;;  %v3422_v31 = vpop.eup %3421 }
 0xc66   :  { %v818_v34 = vadd.f32 1.0, %v3422_v31 }
 0xc68   :  { %3423 = vrcp.f32 %v818_v34 }
 0xc75   :  { %v3424_v35 = vpop.eup %3423 }
 0xc76   :  { %v825_v28 = vmul.f32 %v3424_v35, %v758_v29 }
 0xcd7   :  { %v828_v43 = vpop.permute.xlu1 %827 }
 0xcd8   :  { %v830_v38 = vmul.f32 %v3424_v35, %v828_v43 }
 0xcda   :  { %832 = vrot.lane.b32.xlu0 %v830_v38, %s3686_s0 }
 0xd4c   :  { %v833_v1 = vpop.permute.xlu0 %832 }
 0xd4d   :  { %v835_v20 = vadd.f32 %v833_v1, %v825_v28 }
 0xd4f   :  { %3425 = vtanh.f32 %v835_v20 }
 0xd50   :  { %3427 = vpow2.f32 %v3007_v8 }
 0xd5c   :  { %v3426_v39 = vpop.eup %3425 }
 0xd5d   :  { %838 = vrot.lane.b32.xlu1 %v3426_v39, %s3686_s0  ;;  %v3428_v2 = vpop.eup %3427 }
 0xd5e   :  { %v819_v50 = vadd.f32 1.0, %v3428_v2 }
 0xd60   :  { %3429 = vrcp.f32 %v819_v50 }
 0xd6d   :  { %v3430_v12 = vpop.eup %3429 }
 0xdcf   :  { %v839_v55 = vpop.permute.xlu1 %838 }
 0xdd0   :  { %v841_v4 = vmul.f32 %v3430_v12, %v839_v55 }
 0xdd2   :  { %v842_v32 = vpack.c.bf16 %v841_v4, %v841_v4  ;;  %v3944_v45 = vsel %vm996_vm1, %v3889_v41, %v841_v4  ;;  %v3948_v47 = vsel %vm996_vm1, %v841_v4, %v3889_v41 }
 0xdd4   :  { %3008 = vmatmul.mubr.msk.bf16.vlgmr.msra.gmra.mxu0 %vm126_vm0, %v842_v32 }
 0xe94   :  { %v880_v51 = vpop.f32.mrf.mxu0 }
 0xe95   :  { %v887_v44 = vadd.f32 %v880_v51, %v3840_v46 }
 0xe96   :  { %v882_v54 = vpop.f32.mrf.mxu0 }
 0xe97   :  { %v888_v6 = vadd.f32 %v882_v54, %v3843_v58  ;;  %v3009_v10 = vmul.f32 -1.442695, %v887_v44 }
 0xe98   :  { %v884_v48 = vpop.f32.mrf.mxu0 }
 0xe99   :  { %3431 = vtanh.f32 %v888_v6  ;;  %v3010_v27 = vmul.f32 -1.442695, %v888_v6 }
 0xe9a   :  { %v885_v7 = vpop.f32.mrf.mxu0  ;;  %3433 = vpow2.f32 %v3009_v10 }
 0xea6   :  { %v3432_v9 = vpop.eup %3431 }
 0xea7   :  { %904 = vrot.lane.b32.xlu0 %v3432_v9, %s3686_s0  ;;  %v3434_v11 = vpop.eup %3433 }
 0xea8   :  { %v895_v14 = vadd.f32 1.0, %v3434_v11 }
 0xeaa   :  { %3435 = vrcp.f32 %v895_v14 }
 0xeb7   :  { %v3436_v41 = vpop.eup %3435 }
 0xeb8   :  { %v902_v46 = vmul.f32 %v3436_v41, %v835_v20 }
 0xf19   :  { %v905_v15 = vpop.permute.xlu0 %904 }
 0xf1a   :  { %v907_v17 = vmul.f32 %v3436_v41, %v905_v15 }
 0xf1c   :  { %909 = vrot.lane.b32.xlu1 %v907_v17, %s3686_s0 }
 0xf8e   :  { %v910_v16 = vpop.permute.xlu1 %909 }
 0xf8f   :  { %v912_v19 = vadd.f32 %v910_v16, %v902_v46 }
 0xf91   :  { %3437 = vtanh.f32 %v912_v19 }
 0xf92   :  { %3439 = vpow2.f32 %v3010_v27 }
 0xf9e   :  { %v3438_v58 = vpop.eup %3437 }
 0xf9f   :  { %915 = vrot.lane.b32.xlu0 %v3438_v58, %s3686_s0  ;;  %v3440_v13 = vpop.eup %3439 }
 0xfa0   :  { %v896_v26 = vadd.f32 1.0, %v3440_v13 }
 0xfa2   :  { %3441 = vrcp.f32 %v896_v26 }
 0xfaf   :  { %v3442_v29 = vpop.eup %3441 }
0x1011   :  { %v916_v18 = vpop.permute.xlu0 %915 }
0x1012   :  { %v918_v33 = vmul.f32 %v3442_v29, %v916_v18 }
0x1014   :  { %v919_v36 = vpack.c.bf16 %v918_v33, %v918_v33  ;;  %v3958_v40 = vsel %vm996_vm1, %v3870_v5, %v918_v33  ;;  %v3962_v42 = vsel %vm996_vm1, %v918_v33, %v3870_v5 }
0x1016   :  { %3011 = vmatmul.mubr.msk.bf16.vlgmr.msra.gmra.mxu1 %vm126_vm0, %v919_v36 }
0x10d6   :  { %v957_v49 = vpop.f32.mrf.mxu1 }
0x10d7   :  { %v964_v53 = vadd.f32 %v957_v49, %v3845_v63 }
0x10d8   :  { %v959_v56 = vpop.f32.mrf.mxu1 }
0x10d9   :  { %v965_v61 = vadd.f32 %v959_v56, %v3847_v3  ;;  %v3012_v37 = vmul.f32 -1.442695, %v964_v53 }
0x10da   :  { %v961_v62 = vpop.f32.mrf.mxu1 }
0x10db   :  { %3443 = vtanh.f32 %v965_v61  ;;  %v3013_v43 = vmul.f32 -1.442695, %v965_v61 }
0x10dc   :  { %v962_v52 = vpop.f32.mrf.mxu1  ;;  %3445 = vpow2.f32 %v3012_v37 }
0x10e8   :  { %v3444_v23 = vpop.eup %3443 }
0x10e9   :  { %981 = vrot.lane.b32.xlu1 %v3444_v23, %s3686_s0  ;;  %v3446_v60 = vpop.eup %3445 }
0x10ea   :  { %v972_v24 = vadd.f32 1.0, %v3446_v60 }
0x10ec   :  { %3447 = vrcp.f32 %v972_v24 }
0x10f9   :  { %v3448_v5 = vpop.eup %3447 }
0x10fa   :  { %v979_v63 = vmul.f32 %v3448_v5, %v912_v19 }
0x115b   :  { %v982_v30 = vpop.permute.xlu1 %981 }
0x115c   :  { %v984_v31 = vmul.f32 %v3448_v5, %v982_v30 }
0x115e   :  { %986 = vrot.lane.b32.xlu0 %v984_v31, %s3686_s0 }
0x11d0   :  { %v987_v34 = vpop.permute.xlu0 %986 }
0x11d1   :  { %v989_v35 = vadd.f32 %v987_v34, %v979_v63 }
0x11d3   :  { %3449 = vtanh.f32 %v989_v35 }
0x11d4   :  { %3451 = vpow2.f32 %v3013_v43 }
0x11e0   :  { %v3450_v3 = vpop.eup %3449 }
0x11e1   :  { %992 = vrot.lane.b32.xlu1 %v3450_v3, %s3686_s0  ;;  %v3452_v38 = vpop.eup %3451 }
0x11e2   :  { %v973_v28 = vadd.f32 1.0, %v3452_v38 }
0x11e4   :  { %3453 = vrcp.f32 %v973_v28 }
0x11f1   :  { %v3454_v1 = vpop.eup %3453 }
0x1253   :  { %v993_v20 = vpop.permute.xlu1 %992 }
0x1254   :  { %v995_v39 = vmul.f32 %v3454_v1, %v993_v20 }
0x1256   :  { %v997_v8 = vsel %vm996_vm1, %v3852_v22, %v995_v39  ;;  %v3974_v2 = vsel %vm996_vm1, %v995_v39, %v3852_v22 }
0x1257   :  { %3681 = dma.done.wait [#allocation3 + $0x1], 12288 }
0x1258   :  { %3682 = vsyncadd [#allocation3 + $0x1], 4294955008  ;;  %1132 = vmatprep.mubr.bf16.mxu0 %v3685_v0  ;;  %1245 = vmatprep.mubr.bf16.mxu1 %v3685_v0  ;;  %v3455_v50 = vld [vmem:[#allocation2 + $0x104] ss:$8 sps:$4 sm:$0xff]   ;;  %v3459_v55 = vld [vmem:[#allocation2 + $0x100] ss:$8 sps:$4 sm:$0xff]   ;;  %v1009_v15 = vpack.c.bf16 %v3958_v40, %v997_v8  ;;  %v1010_v58 = vpack.c.bf16 %v3923_v57, %v3944_v45  ;;  %v1011_v57 = vpack.c.bf16 %v3948_v47, %v3926_v59 }
0x1259   :  { %v3457_v12 = vld [vmem:[#allocation2 + $0x144] ss:$8 sps:$4 sm:$0xff]   ;;  %1108 = vmatprep.subr.bf16.mxu0 %v3455_v50  ;;  %v3460_v4 = vld [vmem:[#allocation2 + $0x140] ss:$8 sps:$4 sm:$0xff]   ;;  %v3461_v32 = vld [vmem:[#allocation2 + $0xf4] ss:$8 sps:$4 sm:$0xff]   ;;  %v1012_v59 = vpack.c.bf16 %v3974_v2, %v3962_v42 }
0x125a   :  { %1221 = vmatprep.subr.bf16.mxu1 %v3457_v12  ;;  %1109 = vmatpush1.bf16.msra.mxu0 %v3459_v55  ;;  %v3463_v51 = vld [vmem:[#allocation2 + $0x134] ss:$8 sps:$4 sm:$0xff]   ;;  %v3465_v44 = vld [vmem:[#allocation2 + $0xf0] ss:$8 sps:$4 sm:$0xff]   ;;  %v3467_v54 = vld [vmem:[#allocation2 + $0xe4] ss:$8 sps:$4 sm:$0xff]  }
0x125b   :  { %1222 = vmatpush1.bf16.msra.mxu1 %v3460_v4  ;;  %1110 = vmatprep.subr.bf16.mxu0 %v3461_v32  ;;  %v3466_v22 = vld [vmem:[#allocation2 + $0x130] ss:$8 sps:$4 sm:$0xff]   ;;  %v3469_v6 = vld [vmem:[#allocation2 + $0x124] ss:$8 sps:$4 sm:$0xff]   ;;  %v3471_v48 = vld [vmem:[#allocation2 + $0xe0] ss:$8 sps:$4 sm:$0xff]  }
0x125c   :  { %1223 = vmatprep.subr.bf16.mxu1 %v3463_v51  ;;  %v3472_v7 = vld [vmem:[#allocation2 + $0x120] ss:$8 sps:$4 sm:$0xff]   ;;  %v3473_v9 = vld [vmem:[#allocation2 + $0xd4] ss:$8 sps:$4 sm:$0xff]   ;;  %v3477_v11 = vld [vmem:[#allocation2 + $0xd0] ss:$8 sps:$4 sm:$0xff]  }
0x125d   :  { %v3475_v10 = vld [vmem:[#allocation2 + $0x114] ss:$8 sps:$4 sm:$0xff]   ;;  %v3478_v14 = vld [vmem:[#allocation2 + $0x110] ss:$8 sps:$4 sm:$0xff]   ;;  %v3978_v41 = vld [vmem:[#allocation2 + $0x184] ss:$8 sps:$4 sm:$0xff]  }
0x125e   :  { %1111 = vmatpush1.bf16.msra.mxu0 %v3465_v44  ;;  %v3981_v17 = vld [vmem:[#allocation2 + $0x180] ss:$8 sps:$4 sm:$0xff]   ;;  %v3983_v46 = vld [vmem:[#allocation2 + $0x174] ss:$8 sps:$4 sm:$0xff]   ;;  %v3987_v16 = vld [vmem:[#allocation2 + $0x170] ss:$8 sps:$4 sm:$0xff]  }
0x125f   :  { %1224 = vmatpush1.bf16.msra.mxu1 %v3466_v22  ;;  %1112 = vmatprep.subr.bf16.mxu0 %v3467_v54  ;;  %v3991_v19 = vld [vmem:[#allocation2 + $0x164] ss:$8 sps:$4 sm:$0xff]   ;;  %v4000_v27 = vld [vmem:[#allocation2 + $0x160] ss:$8 sps:$4 sm:$0xff]   ;;  %v4004_v13 = vld [vmem:[#allocation2 + $0x154] ss:$8 sps:$4 sm:$0xff]  }
0x1260   :  { %1225 = vmatprep.subr.bf16.mxu1 %v3469_v6  ;;  %v4010_v26 = vld [vmem:[#allocation2 + $0x150] ss:$8 sps:$4 sm:$0xff]   ;;  %vm3688_vm2 = vmmov 0   ;;  %s3689_s8 = smov 16   ;;  %s3690_s9 = smov 32   ;;  %vm2342_vm3 = vcmask 130048  }
0x1261   :  { %v1037_v45 = vld [vmem:[#allocation2 + $0x190] sm:$0x11]  ;;  %s3691_s10 = smov 48   ;;  %s3692_s11 = smov 80   ;;  %vm2363_vm4 = vcmask 392192   ;;  %vm2380_vm5 = vcmask 654336  }
0x1262   :  { %1113 = vmatpush1.bf16.msra.mxu0 %v3471_v48  ;;  %v1038_v47 = vunpack.c.l.bf16 %v1037_v45  ;;  %v1039_v33 = vunpack.c.h.bf16 %v1037_v45  ;;  %s3693_s12 = smov 96   ;;  %s3694_s13 = smov 112   ;;  %vm2389_vm6 = vcmask 785408   ;;  %vm2398_vm7 = vcmask 916480  }
0x1263   :  { %1226 = vmatpush1.bf16.msra.mxu1 %v3472_v7  ;;  %1114 = vmatprep.subr.bf16.mxu0 %v3473_v9 }
0x1264   :  { %1227 = vmatprep.subr.bf16.mxu1 %v3475_v10  ;;  %v1043_v42 = vrot.slane %v1038_v47, %v3734_v25  ;;  %v1047_v56 = vrot.slane %v1039_v33, %v3734_v25 }
0x1266   :  { %1115 = vmatpush1.bf16.msra.mxu0 %v3477_v11 }
0x1267   :  { %1228 = vmatpush1.bf16.msra.mxu1 %v3478_v14  ;;  %1350 = vmatprep.subr.bf16.mxu0 %v3978_v41 }
0x1268   :  { %1427 = vmatprep.subr.bf16.mxu1 %v3978_v41 }
0x1269   :  { %3022 = vmatmul.mubr.msk.bf16.vlgmr.msra.gmra.mxu0 %vm126_vm0, %v1009_v15 }
0x126a   :  { %3034 = vmatmul.mubr.msk.bf16.vlgmr.msra.gmra.mxu1 %vm126_vm0, %v1009_v15  ;;  %1351 = vmatpush1.bf16.msra.mxu0 %v3981_v17 }
0x126b   :  { %1142 = vmatprep.mubr.bf16.mxu0 %v3685_v0  ;;  %1255 = vmatprep.mubr.bf16.mxu1 %v3685_v0 }
0x126c   :  { %1352 = vmatprep.subr.bf16.mxu0 %v3983_v46  ;;  %1428 = vmatpush1.bf16.msra.mxu1 %v3981_v17 }
0x126d   :  { %1429 = vmatprep.subr.bf16.mxu1 %v3983_v46 }
0x126e   :  { %1353 = vmatpush1.bf16.msra.mxu0 %v3987_v16 }
0x126f   :  { %1354 = vmatprep.subr.bf16.mxu0 %v3991_v19 }
0x1270   :  { %1430 = vmatpush1.bf16.msra.mxu1 %v3987_v16 }
0x1271   :  { %3023 = vmatmul.mubr.msk.bf16.gmra.mxu0 %vm126_vm0, %v1010_v58  ;;  %1431 = vmatprep.subr.bf16.mxu1 %v3991_v19 }
0x1272   :  { %3035 = vmatmul.mubr.msk.bf16.gmra.mxu1 %vm126_vm0, %v1010_v58  ;;  %1152 = vmatprep.mubr.bf16.mxu0 %v3685_v0 }
0x1273   :  { %1265 = vmatprep.mubr.bf16.mxu1 %v3685_v0  ;;  %1355 = vmatpush1.bf16.msra.mxu0 %v4000_v27 }
0x1274   :  { %1356 = vmatprep.subr.bf16.mxu0 %v4004_v13  ;;  %1432 = vmatpush1.bf16.msra.mxu1 %v4000_v27 }
0x1275   :  { %1433 = vmatprep.subr.bf16.mxu1 %v4004_v13 }
0x1277   :  { %1357 = vmatpush1.bf16.msra.mxu0 %v4010_v26 }
0x1278   :  { %1434 = vmatpush1.bf16.msra.mxu1 %v4010_v26  ;;  %1504 = vmatprep.subr.bf16.mxu0 %v3978_v41 }
0x1279   :  { %3024 = vmatmul.mubr.msk.bf16.gmra.mxu0 %vm126_vm0, %v1011_v57  ;;  %1581 = vmatprep.subr.bf16.mxu1 %v3978_v41 }
0x127a   :  { %3036 = vmatmul.mubr.msk.bf16.gmra.mxu1 %vm126_vm0, %v1011_v57  ;;  %1162 = vmatprep.mubr.bf16.mxu0 %v3685_v0 }
0x127b   :  { %1275 = vmatprep.mubr.bf16.mxu1 %v3685_v0 }
0x1281   :  { %3025 = vmatmul.mubr.msk.bf16.gmra.mxu0 %vm126_vm0, %v1012_v59 }
0x1282   :  { %3037 = vmatmul.mubr.msk.bf16.gmra.mxu1 %vm126_vm0, %v1012_v59  ;;  %1374 = vmatprep.mubr.bf16.mxu0 %v3685_v0 }
0x1283   :  { %1451 = vmatprep.mubr.bf16.mxu1 %v3685_v0 }
0x1289   :  { %1375 = vmatmul.mubr.bf16.vlgmr.msra.gmra.mxu0 %v3685_v0 }
0x128a   :  { %1505 = vmatpush1.bf16.msra.mxu0 %v3981_v17  ;;  %1528 = vmatprep.mubr.bf16.mxu0 %v3685_v0 }
0x128b   :  { %1506 = vmatprep.subr.bf16.mxu0 %v3983_v46 }
0x128e   :  { %1507 = vmatpush1.bf16.msra.mxu0 %v3987_v16 }
0x128f   :  { %1508 = vmatprep.subr.bf16.mxu0 %v3991_v19 }
0x1292   :  { %1509 = vmatpush1.bf16.msra.mxu0 %v4000_v27 }
0x1293   :  { %1510 = vmatprep.subr.bf16.mxu0 %v4004_v13 }
0x1296   :  { %1511 = vmatpush1.bf16.msra.mxu0 %v4010_v26 }
0x1297   :  { %1658 = vmatprep.subr.bf16.mxu0 %v3978_v41 }
0x1329   :  { %v1134_v29 = vpop.f32.mrf.mxu0 }
0x132a   :  { %v4045_v18 = vpop.f32.mrf.mxu1  ;;  %v1135_v45 = vadd.f32 %v1134_v29, %v1043_v42 }
0x132b   :  { %v1136_v36 = vpop.f32.mrf.mxu0 }
0x132c   :  { %v4047_v40 = vpop.f32.mrf.mxu1 }
0x132d   :  { %v1138_v49 = vpop.f32.mrf.mxu0 }
0x132e   :  { %v1251_v53 = vpop.f32.mrf.mxu1  ;;  %v1139_v61 = vadd.f32 %v1138_v49, %v1043_v42 }
0x132f   :  { %v1140_v62 = vpop.f32.mrf.mxu0 }
0x1330   :  { %v1253_v52 = vpop.f32.mrf.mxu1  ;;  %v1141_v23 = vadd.f32 %v1140_v62, %v1047_v56 }
0x1331   :  { %v1144_v37 = vpop.f32.mrf.mxu0 }
0x1332   :  { %v1257_v60 = vpop.f32.mrf.mxu1  ;;  %v1145_v24 = vadd.f32 %v1144_v37, %v1043_v42 }
0x1333   :  { %v1146_v5 = vpop.f32.mrf.mxu0 }
0x1334   :  { %v1259_v30 = vpop.f32.mrf.mxu1  ;;  %v1147_v31 = vadd.f32 %v1146_v5, %v1047_v56 }
0x1335   :  { %v1148_v63 = vpop.f32.mrf.mxu0 }
0x1336   :  { %v1261_v34 = vpop.f32.mrf.mxu1  ;;  %v1149_v35 = vadd.f32 %v1148_v63, %v1043_v42 }
0x1337   :  { %v1150_v3 = vpop.f32.mrf.mxu0 }
0x1338   :  { %v1263_v43 = vpop.f32.mrf.mxu1  ;;  %v1151_v38 = vadd.f32 %v1150_v3, %v1047_v56 }
0x1339   :  { %v1154_v28 = vpop.f32.mrf.mxu0 }
0x133a   :  { %v1267_v1 = vpop.f32.mrf.mxu1  ;;  %v1155_v20 = vadd.f32 %v1154_v28, %v1043_v42 }
0x133b   :  { %v4051_v39 = vadd.f32 %v1267_v1, %v1149_v35  ;;  %v1156_v8 = vpop.f32.mrf.mxu0 }
0x133c   :  { %v1269_v2 = vpop.f32.mrf.mxu1  ;;  %v1157_v50 = vadd.f32 %v1156_v8, %v1047_v56  ;;  %v4055_v55 = vadd.f32 %v1261_v34, %v1155_v20  ;;  %v1137_v34 = vadd.f32 %v1136_v36, %v1047_v56 }
0x133d   :  { %v4053_v12 = vadd.f32 %v1269_v2, %v1151_v38  ;;  %v1158_v4 = vpop.f32.mrf.mxu0 }
0x133e   :  { %v1271_v32 = vpop.f32.mrf.mxu1  ;;  %v1159_v51 = vadd.f32 %v1158_v4, %v1043_v42  ;;  %v4059_v22 = vadd.f32 %v1263_v43, %v1157_v50 }
0x133f   :  { %v4057_v44 = vadd.f32 %v1271_v32, %v1145_v24  ;;  %v1160_v54 = vpop.f32.mrf.mxu0 }
0x1340   :  { %v1273_v6 = vpop.f32.mrf.mxu1  ;;  %v1161_v48 = vadd.f32 %v1160_v54, %v1047_v56  ;;  %v4063_v9 = vadd.f32 %v1257_v60, %v1159_v51 }
0x1341   :  { %v4061_v7 = vadd.f32 %v1273_v6, %v1147_v31  ;;  %v1164_v10 = vpop.f32.mrf.mxu0 }
0x1342   :  { %v1277_v11 = vpop.f32.mrf.mxu1  ;;  %v1165_v14 = vadd.f32 %v1164_v10, %v1043_v42  ;;  %v4067_v58 = vadd.f32 %v1259_v30, %v1161_v48 }
0x1343   :  { %v4065_v15 = vadd.f32 %v1277_v11, %v1139_v61  ;;  %v1166_v57 = vpop.f32.mrf.mxu0 }
0x1344   :  { %v1279_v59 = vpop.f32.mrf.mxu1  ;;  %v1167_v47 = vadd.f32 %v1166_v57, %v1047_v56  ;;  %v4069_v49 = vadd.f32 %v1251_v53, %v1165_v14 }
0x1345   :  { %v1289_v33 = vadd.f32 %v1279_v59, %v1141_v23  ;;  %v1168_v62 = vpop.f32.mrf.mxu0 }
0x1346   :  { %v1281_v37 = vpop.f32.mrf.mxu1  ;;  %v1169_v24 = vadd.f32 %v1168_v62, %v1043_v42  ;;  %v4071_v60 = vadd.f32 %v1253_v52, %v1167_v47 }
0x1347   :  { %v1286_v5 = vadd.f32 %v1281_v37, %v1135_v45  ;;  %v1170_v31 = vpop.f32.mrf.mxu0 }
0x1348   :  { %v1283_v63 = vpop.f32.mrf.mxu1  ;;  %v1171_v61 = vadd.f32 %v1170_v31, %v1047_v56  ;;  %v4074_v30 = vadd.f32 %v4045_v18, %v1169_v24 }
0x1349   :  { %v1376_v35 = vpop.f32.mrf.mxu0  ;;  %v1287_v3 = vadd.f32 %v1283_v63, %v1137_v34 }
0x134a   :  { %v1383_v29 = vadd.f32 %v1376_v35, %v1286_v5  ;;  %v4077_v23 = vadd.f32 %v4047_v40, %v1171_v61 }
0x134b   :  { %v1378_v53 = vpop.f32.mrf.mxu0 }
0x134c   :  { %v1384_v43 = vadd.f32 %v1378_v53, %v1287_v3  ;;  %v3046_v28 = vmul.f32 -1.442695, %v1383_v29 }
0x134d   :  { %v1380_v38 = vpop.f32.mrf.mxu0 }
0x134e   :  { %3530 = vtanh.f32 %v1384_v43  ;;  %v3047_v4 = vmul.f32 -1.442695, %v1384_v43 }
0x134f   :  { %v1381_v42 = vpop.f32.mrf.mxu0  ;;  %3532 = vpow2.f32 %v3046_v28 }
0x135b   :  { %v3531_v52 = vpop.eup %3530 }
0x135c   :  { %1400 = vrot.lane.b32.xlu0 %v3531_v52, %s3686_s0  ;;  %v3533_v36 = vpop.eup %3532 }
0x135d   :  { %v1391_v56 = vadd.f32 1.0, %v3533_v36 }
0x135f   :  { %3534 = vrcp.f32 %v1391_v56 }
0x136c   :  { %v3535_v18 = vpop.eup %3534 }
0x136d   :  { %v1398_v40 = vmul.f32 0.0, %v3535_v18 }
0x13ce   :  { %v1401_v1 = vpop.permute.xlu0 %1400 }
0x13cf   :  { %v1403_v20 = vmul.f32 %v3535_v18, %v1401_v1 }
0x13d1   :  { %1405 = vrot.lane.b32.xlu0 %v1403_v20, %s3686_s0 }
0x1443   :  { %v1406_v8 = vpop.permute.xlu0 %1405 }
0x1444   :  { %v1408_v2 = vadd.f32 %v1406_v8, %v1398_v40 }
0x1446   :  { %3536 = vtanh.f32 %v1408_v2 }
0x1447   :  { %3538 = vpow2.f32 %v3047_v4 }
0x1453   :  { %v3537_v50 = vpop.eup %3536 }
0x1454   :  { %1411 = vrot.lane.b32.xlu1 %v3537_v50, %s3686_s0  ;;  %v3539_v32 = vpop.eup %3538 }
0x1455   :  { %v1392_v51 = vadd.f32 1.0, %v3539_v32 }
0x1457   :  { %3540 = vrcp.f32 %v1392_v51 }
0x1464   :  { %v3541_v54 = vpop.eup %3540 }
0x14c6   :  { %v1412_v6 = vpop.permute.xlu1 %1411 }
0x14c7   :  { %v4082_v48 = vmul.f32 %v3541_v54, %v1412_v6 }
0x14c9   :  { %v1415_v10 = vpack.c.bf16 %v4082_v48, %v4082_v48 }
0x14cb   :  { %3048 = vmatmul.mubr.msk.bf16.vlgmr.msra.gmra.mxu1 %vm126_vm0, %v1415_v10 }
0x14cc   :  { %1582 = vmatpush1.bf16.msra.mxu1 %v3981_v17  ;;  %1605 = vmatprep.mubr.bf16.mxu1 %v3685_v0 }
0x14cd   :  { %1583 = vmatprep.subr.bf16.mxu1 %v3983_v46 }
0x14d0   :  { %1584 = vmatpush1.bf16.msra.mxu1 %v3987_v16 }
0x14d1   :  { %1585 = vmatprep.subr.bf16.mxu1 %v3991_v19 }
0x14d4   :  { %1586 = vmatpush1.bf16.msra.mxu1 %v4000_v27 }
0x14d5   :  { %1587 = vmatprep.subr.bf16.mxu1 %v4004_v13 }
0x14d8   :  { %1588 = vmatpush1.bf16.msra.mxu1 %v4010_v26 }
0x14d9   :  { %1735 = vmatprep.subr.bf16.mxu1 %v3978_v41 }
0x158b   :  { %v1453_v11 = vpop.f32.mrf.mxu1 }
0x158c   :  { %v1460_v14 = vadd.f32 %v1453_v11, %v4065_v15 }
0x158d   :  { %v1455_v57 = vpop.f32.mrf.mxu1 }
0x158e   :  { %v1461_v59 = vadd.f32 %v1455_v57, %v1289_v33  ;;  %v3049_v37 = vmul.f32 -1.442695, %v1460_v14 }
0x158f   :  { %v1457_v45 = vpop.f32.mrf.mxu1 }
0x1590   :  { %3542 = vtanh.f32 %v1461_v59  ;;  %v3050_v3 = vmul.f32 -1.442695, %v1461_v59 }
0x1591   :  { %v1458_v47 = vpop.f32.mrf.mxu1  ;;  %3544 = vpow2.f32 %v3049_v37 }
0x159d   :  { %v3543_v62 = vpop.eup %3542 }
0x159e   :  { %1477 = vrot.lane.b32.xlu1 %v3543_v62, %s3686_s0  ;;  %v3545_v24 = vpop.eup %3544 }
0x159f   :  { %v1468_v5 = vadd.f32 1.0, %v3545_v24 }
0x15a1   :  { %3546 = vrcp.f32 %v1468_v5 }
0x15ae   :  { %v3547_v31 = vpop.eup %3546 }
0x15af   :  { %v1475_v61 = vmul.f32 %v3547_v31, %v1408_v2 }
0x1610   :  { %v1478_v63 = vpop.permute.xlu1 %1477 }
0x1611   :  { %v1480_v34 = vmul.f32 %v3547_v31, %v1478_v63 }
0x1613   :  { %1482 = vrot.lane.b32.xlu0 %v1480_v34, %s3686_s0 }
0x1685   :  { %v1483_v15 = vpop.permute.xlu0 %1482 }
0x1686   :  { %v1485_v35 = vadd.f32 %v1483_v15, %v1475_v61 }
0x1688   :  { %3548 = vtanh.f32 %v1485_v35 }
0x1689   :  { %3550 = vpow2.f32 %v3050_v3 }
0x1695   :  { %v3549_v33 = vpop.eup %3548 }
0x1696   :  { %1488 = vrot.lane.b32.xlu1 %v3549_v33, %s3686_s0  ;;  %v3551_v29 = vpop.eup %3550 }
0x1697   :  { %v1469_v53 = vadd.f32 1.0, %v3551_v29 }
0x1699   :  { %3552 = vrcp.f32 %v1469_v53 }
0x16a6   :  { %v3553_v43 = vpop.eup %3552 }
0x1708   :  { %v1489_v38 = vpop.permute.xlu1 %1488 }
0x1709   :  { %v4100_v42 = vmul.f32 %v3553_v43, %v1489_v38 }
0x170b   :  { %v1492_v52 = vpack.c.bf16 %v4100_v42, %v4100_v42 }
0x170d   :  { %3051 = vmatmul.mubr.msk.bf16.vlgmr.msra.gmra.mxu0 %vm126_vm0, %v1492_v52 }
0x170e   :  { %1659 = vmatpush1.bf16.msra.mxu0 %v3981_v17  ;;  %1682 = vmatprep.mubr.bf16.mxu0 %v3685_v0 }
0x170f   :  { %1660 = vmatprep.subr.bf16.mxu0 %v3983_v46 }
0x1712   :  { %1661 = vmatpush1.bf16.msra.mxu0 %v3987_v16 }
0x1713   :  { %1662 = vmatprep.subr.bf16.mxu0 %v3991_v19 }
0x1716   :  { %1663 = vmatpush1.bf16.msra.mxu0 %v4000_v27 }
0x1717   :  { %1664 = vmatprep.subr.bf16.mxu0 %v4004_v13 }
0x171a   :  { %1665 = vmatpush1.bf16.msra.mxu0 %v4010_v26 }
0x171b   :  { %1812 = vmatprep.subr.bf16.mxu0 %v3978_v41 }
0x17cd   :  { %v1530_v28 = vpop.f32.mrf.mxu0 }
0x17ce   :  { %v1537_v36 = vadd.f32 %v1530_v28, %v4057_v44 }
0x17cf   :  { %v1532_v56 = vpop.f32.mrf.mxu0 }
0x17d0   :  { %v1538_v18 = vadd.f32 %v1532_v56, %v4061_v7  ;;  %v3052_v8 = vmul.f32 -1.442695, %v1537_v36 }
0x17d1   :  { %v1534_v1 = vpop.f32.mrf.mxu0 }
0x17d2   :  { %3554 = vtanh.f32 %v1538_v18  ;;  %v3053_v10 = vmul.f32 -1.442695, %v1538_v18 }
0x17d3   :  { %v1535_v20 = vpop.f32.mrf.mxu0  ;;  %3556 = vpow2.f32 %v3052_v8 }
0x17df   :  { %v3555_v40 = vpop.eup %3554 }
0x17e0   :  { %1554 = vrot.lane.b32.xlu0 %v3555_v40, %s3686_s0  ;;  %v3557_v2 = vpop.eup %3556 }
0x17e1   :  { %v1545_v50 = vadd.f32 1.0, %v3557_v2 }
0x17e3   :  { %3558 = vrcp.f32 %v1545_v50 }
0x17f0   :  { %v3559_v4 = vpop.eup %3558 }
0x17f1   :  { %v1552_v44 = vmul.f32 %v3559_v4, %v1485_v35 }
0x1852   :  { %v1555_v32 = vpop.permute.xlu0 %1554 }
0x1853   :  { %v1557_v51 = vmul.f32 %v3559_v4, %v1555_v32 }
0x1855   :  { %1559 = vrot.lane.b32.xlu1 %v1557_v51, %s3686_s0 }
0x18c7   :  { %v1560_v54 = vpop.permute.xlu1 %1559 }
0x18c8   :  { %v1562_v6 = vadd.f32 %v1560_v54, %v1552_v44 }
0x18ca   :  { %3560 = vtanh.f32 %v1562_v6 }
0x18cb   :  { %3562 = vpow2.f32 %v3053_v10 }
0x18d7   :  { %v3561_v7 = vpop.eup %3560 }
0x18d8   :  { %1565 = vrot.lane.b32.xlu0 %v3561_v7, %s3686_s0  ;;  %v3563_v11 = vpop.eup %3562 }
0x18d9   :  { %v1546_v14 = vadd.f32 1.0, %v3563_v11 }
0x18db   :  { %3564 = vrcp.f32 %v1546_v14 }
0x18e8   :  { %v3565_v57 = vpop.eup %3564 }
0x194a   :  { %v1566_v59 = vpop.permute.xlu0 %1565 }
0x194b   :  { %v4119_v45 = vmul.f32 %v3565_v57, %v1566_v59 }
0x194d   :  { %v1569_v47 = vpack.c.bf16 %v4119_v45, %v4119_v45 }
0x194f   :  { %3054 = vmatmul.mubr.msk.bf16.vlgmr.msra.gmra.mxu1 %vm126_vm0, %v1569_v47 }
0x1950   :  { %1736 = vmatpush1.bf16.msra.mxu1 %v3981_v17  ;;  %1759 = vmatprep.mubr.bf16.mxu1 %v3685_v0 }
0x1951   :  { %1737 = vmatprep.subr.bf16.mxu1 %v3983_v46 }
0x1954   :  { %1738 = vmatpush1.bf16.msra.mxu1 %v3987_v16 }
0x1955   :  { %1739 = vmatprep.subr.bf16.mxu1 %v3991_v19 }
0x1958   :  { %1740 = vmatpush1.bf16.msra.mxu1 %v4000_v27 }
0x1959   :  { %1741 = vmatprep.subr.bf16.mxu1 %v4004_v13 }
0x195c   :  { %1742 = vmatpush1.bf16.msra.mxu1 %v4010_v26 }
0x195d   :  { %1889 = vmatprep.subr.bf16.mxu1 %v3978_v41 }
0x1a0f   :  { %v1607_v62 = vpop.f32.mrf.mxu1 }
0x1a10   :  { %v1614_v37 = vadd.f32 %v1607_v62, %v4051_v39 }
0x1a11   :  { %v1609_v24 = vpop.f32.mrf.mxu1 }
0x1a12   :  { %v1615_v5 = vadd.f32 %v1609_v24, %v4053_v12  ;;  %v3055_v61 = vmul.f32 -1.442695, %v1614_v37 }
0x1a13   :  { %v1611_v31 = vpop.f32.mrf.mxu1 }
0x1a14   :  { %3566 = vtanh.f32 %v1615_v5  ;;  %v3056_v43 = vmul.f32 -1.442695, %v1615_v5 }
0x1a15   :  { %v1612_v63 = vpop.f32.mrf.mxu1  ;;  %3568 = vpow2.f32 %v3055_v61 }
0x1a21   :  { %v3567_v34 = vpop.eup %3566 }
0x1a22   :  { %1631 = vrot.lane.b32.xlu1 %v3567_v34, %s3686_s0  ;;  %v3569_v15 = vpop.eup %3568 }
0x1a23   :  { %v1622_v35 = vadd.f32 1.0, %v3569_v15 }
0x1a25   :  { %3570 = vrcp.f32 %v1622_v35 }
0x1a32   :  { %v3571_v33 = vpop.eup %3570 }
0x1a33   :  { %v1629_v39 = vmul.f32 %v3571_v33, %v1562_v6 }
0x1a94   :  { %v1632_v3 = vpop.permute.xlu1 %1631 }
0x1a95   :  { %v1634_v41 = vmul.f32 %v3571_v33, %v1632_v3 }
0x1a97   :  { %1636 = vrot.lane.b32.xlu0 %v1634_v41, %s3686_s0 }
0x1b09   :  { %v1637_v29 = vpop.permute.xlu0 %1636 }
0x1b0a   :  { %v1639_v53 = vadd.f32 %v1637_v29, %v1629_v39 }
0x1b0c   :  { %3572 = vtanh.f32 %v1639_v53 }
0x1b0d   :  { %3574 = vpow2.f32 %v3056_v43 }
0x1b19   :  { %v3573_v12 = vpop.eup %3572 }
0x1b1a   :  { %1642 = vrot.lane.b32.xlu1 %v3573_v12, %s3686_s0  ;;  %v3575_v38 = vpop.eup %3574 }
0x1b1b   :  { %v1623_v52 = vadd.f32 1.0, %v3575_v38 }
0x1b1d   :  { %3576 = vrcp.f32 %v1623_v52 }
0x1b2a   :  { %v3577_v28 = vpop.eup %3576 }
0x1b8c   :  { %v1643_v36 = vpop.permute.xlu1 %1642 }
0x1b8d   :  { %v4138_v56 = vmul.f32 %v3577_v28, %v1643_v36 }
0x1b8f   :  { %v1646_v18 = vpack.c.bf16 %v4138_v56, %v4138_v56 }
0x1b91   :  { %3057 = vmatmul.mubr.msk.bf16.vlgmr.msra.gmra.mxu0 %vm126_vm0, %v1646_v18 }
0x1b92   :  { %1813 = vmatpush1.bf16.msra.mxu0 %v3981_v17  ;;  %1836 = vmatprep.mubr.bf16.mxu0 %v3685_v0 }
0x1b93   :  { %1814 = vmatprep.subr.bf16.mxu0 %v3983_v46 }
0x1b96   :  { %1815 = vmatpush1.bf16.msra.mxu0 %v3987_v16 }
0x1b97   :  { %1816 = vmatprep.subr.bf16.mxu0 %v3991_v19 }
0x1b9a   :  { %1817 = vmatpush1.bf16.msra.mxu0 %v4000_v27 }
0x1b9b   :  { %1818 = vmatprep.subr.bf16.mxu0 %v4004_v13 }
0x1b9e   :  { %1819 = vmatpush1.bf16.msra.mxu0 %v4010_v26 }
0x1c51   :  { %v1684_v1 = vpop.f32.mrf.mxu0 }
0x1c52   :  { %v1691_v20 = vadd.f32 %v1684_v1, %v4055_v55 }
0x1c53   :  { %v1686_v40 = vpop.f32.mrf.mxu0 }
0x1c54   :  { %v1692_v8 = vadd.f32 %v1686_v40, %v4059_v22  ;;  %v3058_v32 = vmul.f32 -1.442695, %v1691_v20 }
0x1c55   :  { %v1688_v2 = vpop.f32.mrf.mxu0 }
0x1c56   :  { %3578 = vtanh.f32 %v1692_v8  ;;  %v3059_v14 = vmul.f32 -1.442695, %v1692_v8 }
0x1c57   :  { %v1689_v50 = vpop.f32.mrf.mxu0  ;;  %3580 = vpow2.f32 %v3058_v32 }
0x1c63   :  { %v3579_v4 = vpop.eup %3578 }
0x1c64   :  { %1708 = vrot.lane.b32.xlu0 %v3579_v4, %s3686_s0  ;;  %v3581_v51 = vpop.eup %3580 }
0x1c65   :  { %v1699_v44 = vadd.f32 1.0, %v3581_v51 }
0x1c67   :  { %3582 = vrcp.f32 %v1699_v44 }
0x1c74   :  { %v3583_v54 = vpop.eup %3582 }
0x1c75   :  { %v1706_v55 = vmul.f32 %v3583_v54, %v1639_v53 }
0x1cd6   :  { %v1709_v6 = vpop.permute.xlu0 %1708 }
0x1cd7   :  { %v1711_v7 = vmul.f32 %v3583_v54, %v1709_v6 }
0x1cd9   :  { %1713 = vrot.lane.b32.xlu1 %v1711_v7, %s3686_s0 }
0x1d4b   :  { %v1714_v10 = vpop.permute.xlu1 %1713 }
0x1d4c   :  { %v1716_v11 = vadd.f32 %v1714_v10, %v1706_v55 }
0x1d4e   :  { %3584 = vtanh.f32 %v1716_v11 }
0x1d4f   :  { %3586 = vpow2.f32 %v3059_v14 }
0x1d5b   :  { %v3585_v22 = vpop.eup %3584 }
0x1d5c   :  { %1719 = vrot.lane.b32.xlu0 %v3585_v22, %s3686_s0  ;;  %v3587_v57 = vpop.eup %3586 }
0x1d5d   :  { %v1700_v59 = vadd.f32 1.0, %v3587_v57 }
0x1d5f   :  { %3588 = vrcp.f32 %v1700_v59 }
0x1d6c   :  { %v3589_v47 = vpop.eup %3588 }
0x1dce   :  { %v1720_v62 = vpop.permute.xlu0 %1719 }
0x1dcf   :  { %v1722_v37 = vmul.f32 %v3589_v47, %v1720_v62 }
0x1dd1   :  { %v1723_v24 = vpack.c.bf16 %v1722_v37, %v1722_v37  ;;  %v4172_v12 = vsel %vm996_vm1, %v4138_v56, %v1722_v37  ;;  %v4176_v43 = vsel %vm996_vm1, %v1722_v37, %v4138_v56 }
0x1dd3   :  { %3060 = vmatmul.mubr.msk.bf16.vlgmr.msra.gmra.mxu1 %vm126_vm0, %v1723_v24 }
0x1dd4   :  { %1890 = vmatpush1.bf16.msra.mxu1 %v3981_v17  ;;  %1913 = vmatprep.mubr.bf16.mxu1 %v3685_v0 }
0x1dd5   :  { %1891 = vmatprep.subr.bf16.mxu1 %v3983_v46 }
0x1dd8   :  { %1892 = vmatpush1.bf16.msra.mxu1 %v3987_v16 }
0x1dd9   :  { %1893 = vmatprep.subr.bf16.mxu1 %v3991_v19 }
0x1ddc   :  { %1894 = vmatpush1.bf16.msra.mxu1 %v4000_v27 }
0x1ddd   :  { %1895 = vmatprep.subr.bf16.mxu1 %v4004_v13 }
0x1de0   :  { %1896 = vmatpush1.bf16.msra.mxu1 %v4010_v26 }
0x1e93   :  { %v1761_v5 = vpop.f32.mrf.mxu1 }
0x1e94   :  { %v1768_v31 = vadd.f32 %v1761_v5, %v4063_v9 }
0x1e95   :  { %v1763_v63 = vpop.f32.mrf.mxu1 }
0x1e96   :  { %v1769_v17 = vadd.f32 %v1763_v63, %v4067_v58  ;;  %v3061_v16 = vmul.f32 -1.442695, %v1768_v31 }
0x1e97   :  { %v1765_v34 = vpop.f32.mrf.mxu1 }
0x1e98   :  { %3590 = vtanh.f32 %v1769_v17  ;;  %v3062_v33 = vmul.f32 -1.442695, %v1769_v17 }
0x1e99   :  { %v1766_v0 = vpop.f32.mrf.mxu1  ;;  %3592 = vpow2.f32 %v3061_v16 }
0x1ea5   :  { %v3591_v46 = vpop.eup %3590 }
0x1ea6   :  { %1785 = vrot.lane.b32.xlu1 %v3591_v46, %s3686_s0  ;;  %v3593_v19 = vpop.eup %3592 }
0x1ea7   :  { %v1776_v27 = vadd.f32 1.0, %v3593_v19 }
0x1ea9   :  { %3594 = vrcp.f32 %v1776_v27 }
0x1eb6   :  { %v3595_v13 = vpop.eup %3594 }
0x1eb7   :  { %v1783_v9 = vmul.f32 %v3595_v13, %v1716_v11 }
0x1f18   :  { %v1786_v61 = vpop.permute.xlu1 %1785 }
0x1f19   :  { %v1788_v26 = vmul.f32 %v3595_v13, %v1786_v61 }
0x1f1b   :  { %1790 = vrot.lane.b32.xlu0 %v1788_v26, %s3686_s0  ;;  %v3492_v26 = vld [vmem:[#allocation2 + $0x1d0] ss:$8 sps:$4 sm:$0xff]  }
0x1f8d   :  { %v1791_v15 = vpop.permute.xlu0 %1790 }
0x1f8e   :  { %v1793_v35 = vadd.f32 %v1791_v15, %v1783_v9  ;;  %v3495_v9 = vld [vmem:[#allocation2 + $0x1c0] ss:$8 sps:$4 sm:$0xff]   ;;  %v3498_v15 = vld [vmem:[#allocation2 + $0x1b0] ss:$8 sps:$4 sm:$0xff]  }
0x1f90   :  { %3596 = vtanh.f32 %v1793_v35 }
0x1f91   :  { %3598 = vpow2.f32 %v3062_v33 }
0x1f9d   :  { %v3597_v58 = vpop.eup %3596 }
0x1f9e   :  { %1796 = vrot.lane.b32.xlu1 %v3597_v58, %s3686_s0  ;;  %v3599_v3 = vpop.eup %3598 }
0x1f9f   :  { %v1777_v41 = vadd.f32 1.0, %v3599_v3 }
0x1fa1   :  { %3600 = vrcp.f32 %v1777_v41 }
0x1fae   :  { %v3601_v39 = vpop.eup %3600 }
0x2010   :  { %v1797_v29 = vpop.permute.xlu1 %1796 }
0x2011   :  { %v1799_v53 = vmul.f32 %v3601_v39, %v1797_v29 }
0x2013   :  { %v1800_v38 = vpack.c.bf16 %v1799_v53, %v1799_v53  ;;  %v4180_v52 = vsel %vm996_vm1, %v4119_v45, %v1799_v53  ;;  %v4184_v28 = vsel %vm996_vm1, %v1799_v53, %v4119_v45 }
0x2014   :  { %v1965_v36 = vpack.c.bf16 %v4172_v12, %v4180_v52  ;;  %v1966_v18 = vpack.c.bf16 %v4184_v28, %v4176_v43  ;;  %v2026_v52 = vld [vmem:[#allocation2 + $0x1e0] sm:$0x11] }
0x2015   :  { %3063 = vmatmul.mubr.msk.bf16.vlgmr.msra.gmra.mxu0 %vm126_vm0, %v1800_v38 }
0x20d5   :  { %v1838_v1 = vpop.f32.mrf.mxu0 }
0x20d6   :  { %v1845_v56 = vadd.f32 %v1838_v1, %v4069_v49 }
0x20d7   :  { %v1840_v20 = vpop.f32.mrf.mxu0 }
0x20d8   :  { %v1846_v40 = vadd.f32 %v1840_v20, %v4071_v60  ;;  %v3064_v45 = vmul.f32 -1.442695, %v1845_v56 }
0x20d9   :  { %v1842_v8 = vpop.f32.mrf.mxu0 }
0x20da   :  { %3602 = vtanh.f32 %v1846_v40  ;;  %v3065_v55 = vmul.f32 -1.442695, %v1846_v40 }
0x20db   :  { %v1843_v2 = vpop.f32.mrf.mxu0  ;;  %3604 = vpow2.f32 %v3064_v45 }
0x20e7   :  { %v3603_v50 = vpop.eup %3602 }
0x20e8   :  { %1862 = vrot.lane.b32.xlu0 %v3603_v50, %s3686_s0  ;;  %v3605_v4 = vpop.eup %3604  ;;  %v4243_v50 = vld [vmem:[#allocation2 + $0x1d4] ss:$8 sps:$4 sm:$0xff]  }
0x20e9   :  { %v1853_v32 = vadd.f32 1.0, %v3605_v4 }
0x20eb   :  { %3606 = vrcp.f32 %v1853_v32 }
0x20f8   :  { %v3607_v51 = vpop.eup %3606 }
0x20f9   :  { %v1860_v49 = vmul.f32 %v3607_v51, %v1793_v35  ;;  %v3501_v35 = vld [vmem:[#allocation2 + $0x1a0] ss:$8 sps:$4 sm:$0xff]  }
0x215a   :  { %v1863_v44 = vpop.permute.xlu0 %1862 }
0x215b   :  { %v1865_v54 = vmul.f32 %v3607_v51, %v1863_v44  ;;  %v4247_v51 = vld [vmem:[#allocation2 + $0x1c4] ss:$8 sps:$4 sm:$0xff]   ;;  %v4255_v44 = vld [vmem:[#allocation2 + $0x1b4] ss:$8 sps:$4 sm:$0xff]  }
0x215d   :  { %1867 = vrot.lane.b32.xlu1 %v1865_v54, %s3686_s0  ;;  %v4259_v54 = vld [vmem:[#allocation2 + $0x1a4] ss:$8 sps:$4 sm:$0xff]  }
0x21cf   :  { %v1868_v6 = vpop.permute.xlu1 %1867 }
0x21d0   :  { %v1870_v7 = vadd.f32 %v1868_v6, %v1860_v49 }
0x21d2   :  { %3608 = vtanh.f32 %v1870_v7 }
0x21d3   :  { %3610 = vpow2.f32 %v3065_v55 }
0x21df   :  { %v3609_v60 = vpop.eup %3608 }
0x21e0   :  { %1873 = vrot.lane.b32.xlu0 %v3609_v60, %s3686_s0  ;;  %v3611_v10 = vpop.eup %3610 }
0x21e1   :  { %v1854_v11 = vadd.f32 1.0, %v3611_v10 }
0x21e3   :  { %3612 = vrcp.f32 %v1854_v11 }
0x21f0   :  { %v3613_v22 = vpop.eup %3612 }
0x2252   :  { %v1874_v14 = vpop.permute.xlu0 %1873 }
0x2253   :  { %v1876_v57 = vmul.f32 %v3613_v22, %v1874_v14 }
0x2255   :  { %v1877_v59 = vpack.c.bf16 %v1876_v57, %v1876_v57  ;;  %v1955_v53 = vsel %vm996_vm1, %v4100_v42, %v1876_v57  ;;  %v1960_v38 = vsel %vm996_vm1, %v1876_v57, %v4100_v42  ;;  %v3491_v42 = vld [vmem:[#allocation2 + $0x260] ss:$8 sps:$4 sm:$0xff]  }
0x2257   :  { %3066 = vmatmul.mubr.msk.bf16.vlgmr.msra.gmra.mxu1 %vm126_vm0, %v1877_v59 }
0x2317   :  { %v1915_v47 = vpop.f32.mrf.mxu1 }
0x2318   :  { %v1922_v62 = vadd.f32 %v1915_v47, %v4074_v30 }
0x2319   :  { %v1917_v37 = vpop.f32.mrf.mxu1 }
0x231a   :  { %v1923_v24 = vadd.f32 %v1917_v37, %v4077_v23  ;;  %v3067_v17 = vmul.f32 -1.442695, %v1922_v62  ;;  %v3687_v23 = vmov 0.0  }
0x231b   :  { %v1919_v5 = vpop.f32.mrf.mxu1  ;;  %3173 = vmatprep.subr.bf16.mxu0 %v3687_v23  ;;  %3185 = vmatprep.subr.bf16.mxu1 %v3687_v23 }
0x231c   :  { %3614 = vtanh.f32 %v1923_v24  ;;  %3181 = vmatprep.mubr.msk.bf16.mxu0 %vm3688_vm2, %v3687_v23  ;;  %3193 = vmatprep.mubr.msk.bf16.mxu1 %vm3688_vm2, %v3687_v23  ;;  %v3068_v58 = vmul.f32 -1.442695, %v1923_v24 }
0x231d   :  { %v1920_v31 = vpop.f32.mrf.mxu1  ;;  %3616 = vpow2.f32 %v3067_v17  ;;  %3186 = vmatpush3.bf16.msra.mxu1 %v3492_v26 }
0x231e   :  { %3187 = vmatprep.subr.bf16.mxu1 %v3687_v23 }
0x2321   :  { %3188 = vmatpush3.bf16.msra.mxu1 %v3495_v9 }
0x2322   :  { %3189 = vmatprep.subr.bf16.mxu1 %v3687_v23 }
0x2325   :  { %3190 = vmatpush3.bf16.msra.mxu1 %v3498_v15 }
0x2326   :  { %3191 = vmatprep.subr.bf16.mxu1 %v3687_v23 }
0x2329   :  { %v3615_v63 = vpop.eup %3614  ;;  %3192 = vmatpush3.bf16.msra.mxu1 %v3501_v35 }
0x232a   :  { %1939 = vrot.lane.b32.xlu1 %v3615_v63, %s3686_s0  ;;  %v3617_v34 = vpop.eup %3616  ;;  %3209 = vmatprep.subr.bf16.mxu1 %v3687_v23  ;;  %v2028_v63 = vunpack.c.h.bf16 %v2026_v52 }
0x232b   :  { %v1930_v0 = vadd.f32 1.0, %v3617_v34 }
0x232c   :  { %v4275_v34 = vrot.slane %v2028_v63, %v3734_v25 }
0x232d   :  { %3618 = vrcp.f32 %v1930_v0 }
0x233a   :  { %v3619_v46 = vpop.eup %3618 }
0x233b   :  { %v1937_v30 = vmul.f32 %v3619_v46, %v1870_v7 }
0x239c   :  { %v1940_v16 = vpop.permute.xlu1 %1939 }
0x239d   :  { %v1942_v19 = vmul.f32 %v3619_v46, %v1940_v16 }
0x239f   :  { %1944 = vrot.lane.b32.xlu0 %v1942_v19, %s3686_s0 }
0x23a3   :  { %2109 = vrot.lane.b32.xlu0 %v3492_v26, %s3686_s0 }
0x23a7   :  { %2105 = vrot.lane.b32.xlu0 %v3498_v15, %s3686_s0 }
0x2411   :  { %v1945_v27 = vpop.permute.xlu0 %1944 }
0x2412   :  { %v1947_v13 = vadd.f32 %v1945_v27, %v1937_v30 }
0x2414   :  { %3620 = vtanh.f32 %v1947_v13 }
0x2415   :  { %3622 = vpow2.f32 %v3068_v58 }
0x2421   :  { %v3621_v61 = vpop.eup %3620 }
0x2422   :  { %1950 = vrot.lane.b32.xlu1 %v3621_v61, %s3686_s0  ;;  %v3623_v33 = vpop.eup %3622 }
0x2423   :  { %v1931_v3 = vadd.f32 1.0, %v3623_v33 }
0x2425   :  { %3624 = vrcp.f32 %v1931_v3 }
0x2426   :  { %2107 = vrot.lane.b32.xlu1 %v3495_v9, %s3686_s0 }
0x242a   :  { %2103 = vrot.lane.b32.xlu1 %v3501_v35, %s3686_s0 }
0x2432   :  { %v3625_v41 = vpop.eup %3624 }
0x2494   :  { %v1951_v39 = vpop.permute.xlu1 %1950 }
0x2495   :  { %v1953_v29 = vmul.f32 %v3625_v41, %v1951_v39 }
0x2497   :  { %v1954_v1 = vsel %vm996_vm1, %v4082_v48, %v1953_v29  ;;  %v1961_v56 = vsel %vm996_vm1, %v1953_v29, %v4082_v48  ;;  %v2110_v48 = vpop.permute.xlu0 %2109 }
0x2498   :  { %v1964_v20 = vpack.c.bf16 %v1955_v53, %v1954_v1  ;;  %v1967_v40 = vpack.c.bf16 %v1961_v56, %v1960_v38  ;;  %v2108_v43 = vpop.permute.xlu1 %2107 }
0x249a   :  { %3174 = vmatpush3.bf16.msra.mxu0 %v1967_v40 }
0x249b   :  { %3175 = vmatprep.subr.bf16.mxu0 %v3687_v23  ;;  %v2106_v28 = vpop.permute.xlu0 %2105 }
0x249c   :  { %v2104_v12 = vpop.permute.xlu1 %2103 }
0x249e   :  { %3176 = vmatpush3.bf16.msra.mxu0 %v1966_v18 }
0x249f   :  { %3177 = vmatprep.subr.bf16.mxu0 %v3687_v23 }
0x24a2   :  { %3178 = vmatpush3.bf16.msra.mxu0 %v1965_v36  ;;  %v2027_v36 = vunpack.c.l.bf16 %v2026_v52 }
0x24a3   :  { %3179 = vmatprep.subr.bf16.mxu0 %v3687_v23 }
0x24a4   :  { %v2032_v18 = vrot.slane %v2027_v36, %v3734_v25 }
0x24a6   :  { %3180 = vmatpush3.bf16.msra.mxu0 %v1964_v20  ;;  %2116 = vrot.lane.b32.xlu0 %v2032_v18, %s3686_s0 }
0x24a7   :  { %3197 = vmatprep.subr.bf16.mxu0 %v3687_v23 }
0x24a9   :  { %3182 = vmatmul.mubr.msk.bf16.vlgmr.msra.gmra.mxu0 %vm126_vm0, %v3491_v42 }
0x24aa   :  { %3198 = vmatpush3.bf16.msra.mxu0 %v2110_v48  ;;  %3205 = vmatprep.mubr.msk.bf16.mxu0 %vm3688_vm2, %v3687_v23 }
0x24ab   :  { %3199 = vmatprep.subr.bf16.mxu0 %v3687_v23 }
0x24ae   :  { %3200 = vmatpush3.bf16.msra.mxu0 %v2108_v43 }
0x24af   :  { %3201 = vmatprep.subr.bf16.mxu0 %v3687_v23 }
0x24b2   :  { %3202 = vmatpush3.bf16.msra.mxu0 %v2106_v28 }
0x24b3   :  { %3203 = vmatprep.subr.bf16.mxu0 %v3687_v23 }
0x24b6   :  { %3204 = vmatpush3.bf16.msra.mxu0 %v2104_v12 }
0x24b7   :  { %3221 = vmatprep.subr.bf16.mxu0 %v3687_v23 }
0x2518   :  { %v2117_v7 = vpop.permute.xlu0 %2116 }
0x2569   :  { %v2010_v8 = vpop.f32.mrf.mxu0 }
0x256b   :  { %v3183_v2 = vpop.f32.mrf.mxu0 }
0x256d   :  { %v2013_v45 = vpop.f32.mrf.mxu0 }
0x256e   :  { %v2017_v4 = vpack.c.bf16 %v2013_v45, %v2010_v8 }
0x256f   :  { %v3184_v32 = vpop.f32.mrf.mxu0 }
0x2570   :  { %3194 = vmatmul.mubr.msk.bf16.vlgmr.msra.gmra.mxu1 %vm126_vm0, %v2017_v4  ;;  %3206 = vmatmul.mubr.msk.bf16.vlgmr.msra.gmra.mxu0 %vm126_vm0, %v2017_v4 }
0x2571   :  { %3210 = vmatpush3.bf16.msra.mxu1 %v4243_v50  ;;  %3217 = vmatprep.mubr.msk.bf16.mxu1 %vm3688_vm2, %v3687_v23 }
0x2572   :  { %3211 = vmatprep.subr.bf16.mxu1 %v3687_v23  ;;  %3229 = vmatprep.mubr.msk.bf16.mxu0 %vm3688_vm2, %v3687_v23 }
0x2575   :  { %3212 = vmatpush3.bf16.msra.mxu1 %v4247_v51 }
0x2576   :  { %3213 = vmatprep.subr.bf16.mxu1 %v3687_v23 }
0x2579   :  { %3214 = vmatpush3.bf16.msra.mxu1 %v4255_v44 }
0x257a   :  { %3215 = vmatprep.subr.bf16.mxu1 %v3687_v23 }
0x257d   :  { %3216 = vmatpush3.bf16.msra.mxu1 %v4259_v54 }
0x257e   :  { %3233 = vmatprep.subr.bf16.mxu1 %v3687_v23 }
0x2580   :  { %3218 = vmatmul.mubr.msk.bf16.vlgmr.msra.gmra.mxu1 %vm126_vm0, %v2017_v4 }
0x2581   :  { %3249 = vmatprep.mubr.msk.bf16.mxu1 %vm3688_vm2, %v3687_v23 }
0x2630   :  { %v2094_v49 = vpop.f32.mrf.mxu1  ;;  %v2153_v6 = vpop.f32.mrf.mxu0 }
0x2631   :  { %v2095_v10 = vadd.f32 %v2094_v49, %v2032_v18  ;;  %v2154_v14 = vadd.f32 %v2153_v6, %v2117_v7 }
0x2632   :  { %v3195_v60 = vpop.f32.mrf.mxu1  ;;  %v3207_v55 = vpop.f32.mrf.mxu0 }
0x2633   :  { %v4268_v37 = vmul.f32 0.35355338, %v2095_v10 }
0x2634   :  { %v2097_v11 = vpop.f32.mrf.mxu1  ;;  %v2156_v22 = vpop.f32.mrf.mxu0 }
0x2635   :  { %v2098_v57 = vadd.f32 %v2097_v11, %v2032_v18  ;;  %v2157_v59 = vadd.f32 %v2156_v22, %v2117_v7  ;;  %v3506_v11 = vld [vmem:[#allocation2 + $0x2a0] ss:$8 sps:$4 sm:$0xff]  }
0x2636   :  { %v3196_v47 = vpop.f32.mrf.mxu1  ;;  %v3208_v62 = vpop.f32.mrf.mxu0 }
0x2637   :  { %v4270_v24 = vmul.f32 0.35355338, %v2098_v57  ;;  %v2265_v5 = vpack.c.bf16 %v2157_v59, %v2154_v14 }
0x2639   :  { %v2439_v31 = vpack.c.bf16 %v4270_v24, %v4268_v37  ;;  %2266 = vxpose.xlu1.c.b16.start.end [1/1] (short) (narrow) %v2265_v5, 64  ;;  %v3512_v24 = vld [vmem:[#allocation2 + $0x370] ss:$8 sps:$4 sm:$0xff]  }
0x2640   :  { %v2214_v17 = vpop.f32.mrf.mxu1 }
0x2641   :  { %v2215_v16 = vadd.f32 %v2214_v17, %v4275_v34  ;;  %v3505_v17 = vld [vmem:[#allocation2 + $0x290] ss:$8 sps:$4 sm:$0xff]  }
0x2642   :  { %v3219_v0 = vpop.f32.mrf.mxu1 }
0x2644   :  { %v2217_v46 = vpop.f32.mrf.mxu1 }
0x2645   :  { %v2218_v19 = vadd.f32 %v2217_v46, %v4275_v34 }
0x2646   :  { %v3220_v30 = vpop.f32.mrf.mxu1 }
0x2647   :  { %v4279_v27 = vpack.c.bf16 %v2218_v19, %v2215_v16 }
0x269b   :  { %v2274_v13 = vpop.trf.xlu1 }
0x269c   :  { %2286 = vrot.lane.b32.xlu0 %v2274_v13, %s3689_s8 }
0x269f   :  { %v4281_v61 = vpop.trf.xlu1 }
0x26a0   :  { %2294 = vrot.lane.b32.xlu0 %v2274_v13, %s3690_s9  ;;  %2296 = vrot.lane.b32.xlu1 %v4281_v61, %s3690_s9 }
0x26a3   :  { %v2276_v26 = vpop.trf.xlu1 }
0x26a4   :  { %2304 = vrot.lane.b32.xlu1 %v4281_v61, %s3691_s10  ;;  %2288 = vrot.lane.b32.xlu0 %v4281_v61, %s3689_s8 }
0x26a7   :  { %v2277_v9 = vpop.trf.xlu1 }
0x26a8   :  { %2312 = vrot.lane.b32.xlu1 %v4281_v61, %s3686_s0  ;;  %2290 = vrot.lane.b32.xlu0 %v2276_v26, %s3689_s8 }
0x26ac   :  { %2320 = vrot.lane.b32.xlu1 %v4281_v61, %s3692_s11  ;;  %2298 = vrot.lane.b32.xlu0 %v2276_v26, %s3690_s9 }
0x26b0   :  { %2328 = vrot.lane.b32.xlu1 %v4281_v61, %s3693_s12  ;;  %2314 = vrot.lane.b32.xlu0 %v2276_v26, %s3686_s0 }
0x26b4   :  { %2306 = vrot.lane.b32.xlu1 %v2276_v26, %s3691_s10  ;;  %2322 = vrot.lane.b32.xlu0 %v2276_v26, %s3692_s11 }
0x26b8   :  { %2336 = vrot.lane.b32.xlu1 %v4281_v61, %s3694_s13  ;;  %2330 = vrot.lane.b32.xlu0 %v2276_v26, %s3693_s12 }
0x26bc   :  { %2318 = vrot.lane.b32.xlu1 %v2274_v13, %s3692_s11  ;;  %2338 = vrot.lane.b32.xlu0 %v2276_v26, %s3694_s13 }
0x26c0   :  { %2334 = vrot.lane.b32.xlu1 %v2274_v13, %s3694_s13  ;;  %2292 = vrot.lane.b32.xlu0 %v2277_v9, %s3689_s8 }
0x26c4   :  { %2300 = vrot.lane.b32.xlu0 %v2277_v9, %s3690_s9 }
0x26c8   :  { %2308 = vrot.lane.b32.xlu0 %v2277_v9, %s3691_s10 }
0x26cc   :  { %2316 = vrot.lane.b32.xlu0 %v2277_v9, %s3686_s0 }
0x26d0   :  { %2324 = vrot.lane.b32.xlu0 %v2277_v9, %s3692_s11 }
0x26d4   :  { %2332 = vrot.lane.b32.xlu0 %v2277_v9, %s3693_s12 }
0x26d8   :  { %2340 = vrot.lane.b32.xlu0 %v2277_v9, %s3694_s13 }
0x26dc   :  { %2302 = vrot.lane.b32.xlu0 %v2274_v13, %s3691_s10 }
0x26e0   :  { %2310 = vrot.lane.b32.xlu0 %v2274_v13, %s3686_s0 }
0x26e4   :  { %2326 = vrot.lane.b32.xlu0 %v2274_v13, %s3693_s12 }
0x270e   :  { %v2287_v15 = vpop.permute.xlu0 %2286 }
0x270f   :  { %v2345_v35 = vsel %vm2342_vm3, %v2274_v13, %v2287_v15 }
0x2712   :  { %v2295_v58 = vpop.permute.xlu0 %2294  ;;  %v2297_v29 = vpop.permute.xlu1 %2296 }
0x2713   :  { %v2356_v33 = vsel %vm996_vm1, %v2345_v35, %v2295_v58 }
0x2716   :  { %v2289_v3 = vpop.permute.xlu0 %2288  ;;  %v2305_v1 = vpop.permute.xlu1 %2304 }
0x2717   :  { %v2348_v4 = vsel %vm2342_vm3, %v4281_v61, %v2289_v3  ;;  %v3504_v61 = vld [vmem:[#allocation2 + $0x280] ss:$8 sps:$4 sm:$0xff]  }
0x2718   :  { %v2358_v55 = vsel %vm996_vm1, %v2348_v4, %v2297_v29  ;;  %v3516_v4 = vld [vmem:[#allocation2 + $0x330] ss:$8 sps:$4 sm:$0xff]  }
0x2719   :  { %v2367_v47 = vsel %vm2363_vm4, %v2358_v55, %v2305_v1  ;;  %3234 = vmatpush3.bf16.msra.mxu1 %v3516_v4 }
0x271a   :  { %v2291_v41 = vpop.permute.xlu0 %2290  ;;  %v2313_v20 = vpop.permute.xlu1 %2312  ;;  %3235 = vmatprep.subr.bf16.mxu1 %v3687_v23 }
0x271b   :  { %v2351_v18 = vsel %vm2342_vm3, %v2276_v26, %v2291_v41  ;;  %v2375_v16 = vsel %vm126_vm0, %v2367_v47, %v2313_v20  ;;  %v3508_v20 = vld [vmem:[#allocation2 + $0x3b0] ss:$8 sps:$4 sm:$0xff]   ;;  %v3521_v47 = vld [vmem:[#allocation2 + $0x2e0] ss:$8 sps:$4 sm:$0xff]  }
0x271e   :  { %v2299_v39 = vpop.permute.xlu0 %2298  ;;  %v2321_v48 = vpop.permute.xlu1 %2320 }
0x271f   :  { %v2360_v8 = vsel %vm996_vm1, %v2351_v18, %v2299_v39  ;;  %v2384_v30 = vsel %vm2380_vm5, %v2375_v16, %v2321_v48  ;;  %v3507_v39 = vld [vmem:[#allocation2 + $0x270] ss:$8 sps:$4 sm:$0xff]  }
0x2720   :  { %v3514_v18 = vld [vmem:[#allocation2 + $0x350] ss:$8 sps:$4 sm:$0xff]  }
0x2722   :  { %v2315_v53 = vpop.permute.xlu0 %2314  ;;  %v2329_v28 = vpop.permute.xlu1 %2328 }
0x2723   :  { %v2393_v13 = vsel %vm2389_vm6, %v2384_v30, %v2329_v28 }
0x2726   :  { %v2323_v38 = vpop.permute.xlu0 %2322  ;;  %v2307_v36 = vpop.permute.xlu1 %2306 }
0x2727   :  { %v2369_v45 = vsel %vm2363_vm4, %v2360_v8, %v2307_v36  ;;  %v2638_v8 = vmul.bf16 %v3514_v18, %v4279_v27 }
0x2728   :  { %v2377_v49 = vsel %vm126_vm0, %v2369_v45, %v2315_v53 }
0x2729   :  { %v2386_v22 = vsel %vm2380_vm5, %v2377_v49, %v2323_v38  ;;  %v2229_v49 = vld [vmem:[#allocation2 + $0x2b0] ss:$8 sps:$4 sm:$0xff]  }
0x272a   :  { %v2331_v56 = vpop.permute.xlu0 %2330  ;;  %v2337_v62 = vpop.permute.xlu1 %2336  ;;  %v2232_v55 = vunpack.c.h.bf16 %v2229_v49 }
0x272b   :  { %v2395_v63 = vsel %vm2389_vm6, %v2386_v22, %v2331_v56 }
0x272e   :  { %v2339_v40 = vpop.permute.xlu0 %2338  ;;  %v2319_v15 = vpop.permute.xlu1 %2318 }
0x272f   :  { %v2406_v46 = vsel %vm2398_vm7, %v2395_v63, %v2339_v40  ;;  %v2644_v40 = vmul.bf16 %v3508_v20, %v4279_v27  ;;  %v3525_v20 = vld [vmem:[#allocation2 + $0x210] ss:$8 sps:$4 sm:$0xff]  }
0x2730   :  { %v2437_v26 = vmul.bf16 %v3505_v17, %v2406_v46 }
0x2732   :  { %v2293_v42 = vpop.permute.xlu0 %2292  ;;  %v2335_v38 = vpop.permute.xlu1 %2334 }
0x2733   :  { %v2354_v32 = vsel %vm2342_vm3, %v2277_v9, %v2293_v42  ;;  %v2403_v9 = vsel %vm2398_vm7, %v2393_v13, %v2337_v62  ;;  %v3509_v42 = vld [vmem:[#allocation2 + $0x3a0] ss:$8 sps:$4 sm:$0xff]   ;;  %v3522_v62 = vld [vmem:[#allocation2 + $0x2d0] ss:$8 sps:$4 sm:$0xff]  }
0x2734   :  { %v2436_v41 = vmul.bf16 %v3504_v61, %v2403_v9  ;;  %v2643_v48 = vmul.bf16 %v3509_v42, %v4279_v27 }
0x2736   :  { %v2301_v43 = vpop.permute.xlu0 %2300 }
0x2737   :  { %v2362_v6 = vsel %vm996_vm1, %v2354_v32, %v2301_v43  ;;  %v3510_v43 = vld [vmem:[#allocation2 + $0x390] ss:$8 sps:$4 sm:$0xff]   ;;  %v3517_v32 = vld [vmem:[#allocation2 + $0x320] ss:$8 sps:$4 sm:$0xff]  }
0x2738   :  { %v2642_v28 = vmul.bf16 %v3510_v43, %v4279_v27  ;;  %3236 = vmatpush3.bf16.msra.mxu1 %v3517_v32  ;;  %v3528_v32 = vld [vmem:[#allocation2 + $0x240] ss:$8 sps:$4 sm:$0xff]  }
0x2739   :  { %3237 = vmatprep.subr.bf16.mxu1 %v3687_v23 }
0x273a   :  { %v2309_v12 = vpop.permute.xlu0 %2308 }
0x273b   :  { %v2371_v60 = vsel %vm2363_vm4, %v2362_v6, %v2309_v12  ;;  %v3511_v12 = vld [vmem:[#allocation2 + $0x380] ss:$8 sps:$4 sm:$0xff]   ;;  %v2231_v6 = vunpack.c.l.bf16 %v2229_v49  ;;  %v3529_v49 = vld [vmem:[#allocation2 + $0x230] ss:$8 sps:$4 sm:$0xff]  }
0x273c   :  { %v2641_v37 = vmul.bf16 %v3511_v12, %v4279_v27 }
0x273e   :  { %v2317_v52 = vpop.permute.xlu0 %2316 }
0x273f   :  { %v2379_v10 = vsel %vm126_vm0, %v2371_v60, %v2317_v52  ;;  %v3513_v52 = vld [vmem:[#allocation2 + $0x360] ss:$8 sps:$4 sm:$0xff]  }
0x2740   :  { %v2639_v36 = vmul.bf16 %v3513_v52, %v4279_v27  ;;  %v2748_v52 = vld [vmem:[#allocation2 + $0x3c0] sm:$0xf] }
0x2742   :  { %v2325_v2 = vpop.permute.xlu0 %2324 }
0x2743   :  { %v2388_v14 = vsel %vm2380_vm5, %v2379_v10, %v2325_v2  ;;  %v3515_v2 = vld [vmem:[#allocation2 + $0x340] ss:$8 sps:$4 sm:$0xff]  }
0x2744   :  { %v2637_v45 = vmul.bf16 %v3515_v2, %v4279_v27 }
0x2746   :  { %v2333_v7 = vpop.permute.xlu0 %2332 }
0x2747   :  { %v2397_v57 = vsel %vm2389_vm6, %v2388_v14, %v2333_v7  ;;  %v3518_v14 = vld [vmem:[#allocation2 + $0x310] ss:$8 sps:$4 sm:$0xff]  }
0x2748   :  { %3238 = vmatpush3.bf16.msra.mxu1 %v3518_v14 }
0x2749   :  { %3239 = vmatprep.subr.bf16.mxu1 %v3687_v23 }
0x274a   :  { %v2341_v59 = vpop.permute.xlu0 %2340 }
0x274b   :  { %v2409_v5 = vsel %vm2398_vm7, %v2397_v57, %v2341_v59  ;;  %v3519_v57 = vld [vmem:[#allocation2 + $0x300] ss:$8 sps:$4 sm:$0xff]   ;;  %v3520_v59 = vld [vmem:[#allocation2 + $0x2f0] ss:$8 sps:$4 sm:$0xff]  }
0x274c   :  { %v2438_v0 = vmul.bf16 %v3506_v11, %v2409_v5  ;;  %3240 = vmatpush3.bf16.msra.mxu1 %v3519_v57  ;;  %v3523_v5 = vld [vmem:[#allocation2 + $0x2c0] ss:$8 sps:$4 sm:$0xff]  }
0x274d   :  { %3241 = vmatprep.subr.bf16.mxu1 %v3687_v23 }
0x274e   :  { %3222 = vmatpush3.bf16.msra.mxu0 %v2438_v0  ;;  %v2303_v19 = vpop.permute.xlu0 %2302 }
0x274f   :  { %3223 = vmatprep.subr.bf16.mxu0 %v3687_v23  ;;  %v2365_v35 = vsel %vm2363_vm4, %v2356_v33, %v2303_v19 }
0x2750   :  { %3242 = vmatpush3.bf16.msra.mxu1 %v3520_v59  ;;  %v2883_v59 = vsub.s32 1, %v3726_v21 }
0x2751   :  { %3243 = vmatprep.subr.bf16.mxu1 %v3687_v23 }
0x2752   :  { %v2311_v58 = vpop.permute.xlu0 %2310  ;;  %3224 = vmatpush3.bf16.msra.mxu0 %v2437_v26 }
0x2753   :  { %v2373_v3 = vsel %vm126_vm0, %v2365_v35, %v2311_v58  ;;  %3225 = vmatprep.subr.bf16.mxu0 %v3687_v23 }
0x2754   :  { %v2382_v29 = vsel %vm2380_vm5, %v2373_v3, %v2319_v15  ;;  %3244 = vmatpush3.bf16.msra.mxu1 %v3521_v47 }
0x2755   :  { %3245 = vmatprep.subr.bf16.mxu1 %v3687_v23 }
0x2756   :  { %v2327_v53 = vpop.permute.xlu0 %2326  ;;  %3226 = vmatpush3.bf16.msra.mxu0 %v2436_v41 }
0x2757   :  { %v2391_v1 = vsel %vm2389_vm6, %v2382_v29, %v2327_v53  ;;  %3227 = vmatprep.subr.bf16.mxu0 %v3687_v23 }
0x2758   :  { %v2400_v56 = vsel %vm2398_vm7, %v2391_v1, %v2335_v38  ;;  %3246 = vmatpush3.bf16.msra.mxu1 %v3522_v62 }
0x2759   :  { %v2435_v33 = vmul.bf16 %v3507_v39, %v2400_v56  ;;  %3247 = vmatprep.subr.bf16.mxu1 %v3687_v23 }
0x275b   :  { %3228 = vmatpush3.bf16.msra.mxu0 %v2435_v33  ;;  %v3524_v33 = vld [vmem:[#allocation2 + $0x220] ss:$8 sps:$4 sm:$0xff]  }
0x275c   :  { %3253 = vmatprep.subr.bf16.mxu0 %v3687_v23  ;;  %3248 = vmatpush3.bf16.msra.mxu1 %v3523_v5 }
0x275d   :  { %3273 = vmatprep.subr.bf16.mxu1 %v3687_v23 }
0x275e   :  { %3230 = vmatmul.mubr.msk.bf16.vlgmr.msra.gmra.mxu0 %vm126_vm0, %v2439_v31  ;;  %v2640_v31 = vmul.bf16 %v3512_v24, %v4279_v27 }
0x275f   :  { %3254 = vmatpush3.bf16.msra.mxu0 %v2644_v40  ;;  %3269 = vmatprep.mubr.msk.bf16.mxu0 %vm3688_vm2, %v3687_v23  ;;  %v3526_v40 = vld [vmem:[#allocation2 + $0x200] ss:$8 sps:$4 sm:$0xff]  }
0x2760   :  { %3255 = vmatprep.subr.bf16.mxu0 %v3687_v23 }
0x2763   :  { %3256 = vmatpush3.bf16.msra.mxu0 %v2643_v48 }
0x2764   :  { %3257 = vmatprep.subr.bf16.mxu0 %v3687_v23 }
0x2767   :  { %3258 = vmatpush3.bf16.msra.mxu0 %v2642_v28 }
0x2768   :  { %3259 = vmatprep.subr.bf16.mxu0 %v3687_v23 }
0x276b   :  { %3260 = vmatpush3.bf16.msra.mxu0 %v2641_v37 }
0x276c   :  { %3261 = vmatprep.subr.bf16.mxu0 %v3687_v23 }
0x276f   :  { %3262 = vmatpush3.bf16.msra.mxu0 %v2640_v31 }
0x2770   :  { %3263 = vmatprep.subr.bf16.mxu0 %v3687_v23 }
0x2773   :  { %3264 = vmatpush3.bf16.msra.mxu0 %v2639_v36  ;;  %v3527_v36 = vld [vmem:[#allocation2 + $0x1f0] ss:$8 sps:$4 sm:$0xff]  }
0x2774   :  { %3265 = vmatprep.subr.bf16.mxu0 %v3687_v23 }
0x2777   :  { %3266 = vmatpush3.bf16.msra.mxu0 %v2638_v8 }
0x2778   :  { %3267 = vmatprep.subr.bf16.mxu0 %v3687_v23 }
0x277b   :  { %3268 = vmatpush3.bf16.msra.mxu0 %v2637_v45 }
0x277c   :  { %3285 = vmatprep.subr.bf16.mxu0 %v3687_v23 }
0x281e   :  { %v2477_v7 = vpop.f32.mrf.mxu0 }
0x281f   :  { %v2478_v60 = vadd.f32 %v2477_v7, %v2231_v6  ;;  %v2805_v6 = vld [vmem:[#allocation2 + $0x250] sm:$0x1] }
0x2820   :  { %v3231_v10 = vpop.f32.mrf.mxu0  ;;  %v2806_v7 = vunpack.c.l.bf16 %v2805_v6 }
0x2821   :  { %2484 = vmax.xlane.f32.xlu0 %v2478_v60 }
0x2822   :  { %v2480_v11 = vpop.f32.mrf.mxu0  ;;  %v2884_v47 = vrot.slane %v2806_v7, %v2883_v59 }
0x2823   :  { %v2481_v27 = vadd.f32 %v2480_v11, %v2232_v55 }
0x2824   :  { %v3232_v22 = vpop.f32.mrf.mxu0 }
0x2825   :  { %2486 = vmax.xlane.f32.xlu1 %v2481_v27 }
0x2836   :  { %2692 = vrot.lane.b32.xlu1 %v4247_v51, %s3686_s0 }
0x2837   :  { %2694 = vrot.lane.b32.xlu0 %v4243_v50, %s3686_s0 }
0x283a   :  { %2688 = vrot.lane.b32.xlu1 %v4259_v54, %s3686_s0 }
0x283b   :  { %2690 = vrot.lane.b32.xlu0 %v4255_v44, %s3686_s0 }
0x283f   :  { %2701 = vrot.lane.b32.xlu0 %v4275_v34, %s3686_s0 }
0x28aa   :  { %v2485_v50 = vpop.xlane.xlu0 %2484 }
0x28ab   :  { %v2488_v51 = vsub.f32 %v2478_v60, %v2485_v50  ;;  %v2811_v60 = vrot.slane %v2806_v7, %v3734_v25 }
0x28ad   :  { %v2490_v63 = vmul.f32 1.442695, %v2488_v51 }
0x28ae   :  { %v2487_v17 = vpop.xlane.xlu1 %2486  ;;  %v2695_v19 = vpop.permute.xlu0 %2694 }
0x28af   :  { %v2489_v54 = vsub.f32 %v2481_v27, %v2487_v17  ;;  %3626 = vpow2.f32 %v2490_v63 }
0x28b1   :  { %v2492_v0 = vmul.f32 1.442695, %v2489_v54 }
0x28b2   :  { %v2693_v34 = vpop.permute.xlu1 %2692  ;;  %v2691_v30 = vpop.permute.xlu0 %2690 }
0x28b3   :  { %3628 = vpow2.f32 %v2492_v0 }
0x28b6   :  { %v2689_v39 = vpop.permute.xlu1 %2688  ;;  %v2702_v48 = vpop.permute.xlu0 %2701 }
0x28bc   :  { %v3627_v46 = vpop.eup %3626 }
0x28c0   :  { %v3629_v44 = vpop.eup %3628 }
0x28c1   :  { %v2494_v16 = vpack.c.bf16 %v3629_v44, %v3627_v46 }
0x28c3   :  { %3250 = vmatmul.mubr.bf16.vlgmr.msra.gmra.mxu1 %v2494_v16 }
0x28c4   :  { %3281 = vmatprep.mubr.msk.bf16.mxu1 %vm3688_vm2, %v3687_v23  ;;  %3274 = vmatpush3.bf16.msra.mxu1 %v2695_v19 }
0x28c5   :  { %3275 = vmatprep.subr.bf16.mxu1 %v3687_v23 }
0x28c8   :  { %3276 = vmatpush3.bf16.msra.mxu1 %v2693_v34 }
0x28c9   :  { %3277 = vmatprep.subr.bf16.mxu1 %v3687_v23 }
0x28cc   :  { %3278 = vmatpush3.bf16.msra.mxu1 %v2691_v30 }
0x28cd   :  { %3279 = vmatprep.subr.bf16.mxu1 %v3687_v23 }
0x28d0   :  { %3280 = vmatpush3.bf16.msra.mxu1 %v2689_v39 }
0x28d1   :  { %3291 = vmatprep.subr.bf16.mxu1 %v3687_v23 }
0x2983   :  { %v2577_v13 = vpop.f32.mrf.mxu1 }
0x2984   :  { %3630 = vrcp.f32 %v2577_v13 }
0x2985   :  { %v3251_v61 = vpop.f32.mrf.mxu1 }
0x2987   :  { %v2580_v26 = vpop.f32.mrf.mxu1 }
0x2988   :  { %3632 = vrcp.f32 %v2580_v26 }
0x2989   :  { %v3252_v9 = vpop.f32.mrf.mxu1 }
0x2991   :  { %v3631_v15 = vpop.eup %3630 }
0x2992   :  { %v2586_v58 = vmul.f32 %v3631_v15, %v3627_v46 }
0x2995   :  { %v3633_v35 = vpop.eup %3632 }
0x2996   :  { %v2587_v3 = vmul.f32 %v3633_v35, %v3629_v44 }
0x2998   :  { %v2645_v41 = vpack.c.bf16 %v2587_v3, %v2586_v58 }
0x299a   :  { %3270 = vmatmul.mubr.bf16.vlgmr.msra.gmra.mxu0 %v2645_v41 }
0x299b   :  { %3287 = vmatprep.mubr.msk.bf16.mxu0 %vm3688_vm2, %v3687_v23 }
0x2a5a   :  { %v2680_v29 = vpop.f32.mrf.mxu0 }
0x2a5c   :  { %v3271_v53 = vpop.f32.mrf.mxu0 }
0x2a5e   :  { %v2683_v38 = vpop.f32.mrf.mxu0 }
0x2a5f   :  { %v2687_v1 = vpack.c.bf16 %v2683_v38, %v2680_v29 }
0x2a60   :  { %v3272_v56 = vpop.f32.mrf.mxu0 }
0x2a61   :  { %3282 = vmatmul.mubr.msk.bf16.vlgmr.msra.gmra.mxu1 %vm126_vm0, %v2687_v1 }
0x2a62   :  { %3299 = vmatprep.mubr.msk.bf16.mxu1 %vm3688_vm2, %v3687_v23  ;;  %3292 = vmatpush3.bf16.msra.mxu1 %v3524_v33 }
0x2a63   :  { %3293 = vmatprep.subr.bf16.mxu1 %v3687_v23 }
0x2a66   :  { %3294 = vmatpush3.bf16.msra.mxu1 %v3525_v20 }
0x2a67   :  { %3295 = vmatprep.subr.bf16.mxu1 %v3687_v23 }
0x2a6a   :  { %3296 = vmatpush3.bf16.msra.mxu1 %v3526_v40 }
0x2a6b   :  { %3297 = vmatprep.subr.bf16.mxu1 %v3687_v23 }
0x2a6e   :  { %3298 = vmatpush3.bf16.msra.mxu1 %v3527_v36 }
0x2b21   :  { %v2741_v42 = vpop.f32.mrf.mxu1 }
0x2b22   :  { %v2742_v12 = vadd.f32 %v2741_v42, %v2702_v48 }
0x2b23   :  { %v3283_v43 = vpop.f32.mrf.mxu1 }
0x2b25   :  { %v2744_v28 = vpop.f32.mrf.mxu1 }
0x2b26   :  { %v2745_v37 = vadd.f32 %v2744_v28, %v2702_v48 }
0x2b27   :  { %v3284_v24 = vpop.f32.mrf.mxu1 }
0x2b28   :  { %v2749_v31 = vpack.c.bf16 %v2745_v37, %v2742_v12 }
0x2b2a   :  { %3286 = vmatpush3.bf16.msra.mxu0 %v2749_v31 }
0x2b2b   :  { %3303 = vmatprep.subr.bf16.mxu0 %v3687_v23 }
0x2b2d   :  { %3288 = vmatmul.mubr.msk.bf16.vlgmr.msra.gmra.mxu0 %vm2342_vm3, %v2748_v52 }
0x2b2e   :  { %3307 = vmatprep.mubr.msk.bf16.mxu0 %vm3688_vm2, %v3687_v23  ;;  %3304 = vmatpush3.bf16.msra.mxu0 %v3528_v32 }
0x2b2f   :  { %3305 = vmatprep.subr.bf16.mxu0 %v3687_v23 }
0x2b32   :  { %3306 = vmatpush3.bf16.msra.mxu0 %v3529_v49 }
0x2bed   :  { %v2787_v18 = vpop.f32.mrf.mxu0 }
0x2bee   :  { %v2807_v8 = vpack.c.bf16 %v2787_v18, %v2787_v18 }
0x2bef   :  { %v3289_v2 = vpop.f32.mrf.mxu0 }
0x2bf0   :  { %3300 = vmatmul.mubr.msk.bf16.vlgmr.msra.gmra.mxu1 %vm126_vm0, %v2807_v8 }
0x2bf1   :  { %v2790_v45 = vpop.f32.mrf.mxu0 }
0x2bf3   :  { %v3290_v4 = vpop.f32.mrf.mxu0 }
0x2cb0   :  { %v2873_v55 = vpop.f32.mrf.mxu1 }
0x2cb1   :  { %v2874_v10 = vadd.f32 %v2873_v55, %v2811_v60 }
0x2cb2   :  { %v3301_v11 = vpop.f32.mrf.mxu1 }
0x2cb3   :  { %v2879_v27 = vmax.f32 %v2874_v10, 0.0 }
0x2cb4   :  { %v2876_v22 = vpop.f32.mrf.mxu1 }
0x2cb5   :  { %v2880_v14 = vpack.c.bf16 %v2879_v27, %v2879_v27 }
0x2cb6   :  { %v3302_v57 = vpop.f32.mrf.mxu1 }
0x2cb7   :  { %3308 = vmatmul.mubr.msk.bf16.vlgmr.msra.gmra.mxu0 %vm996_vm1, %v2880_v14 }
0x2d77   :  { %v2934_v62 = vpop.f32.mrf.mxu0 }
0x2d78   :  { %v2935_v23 = vadd.f32 %v2934_v62, %v2884_v47 }
0x2d79   :  { %v3309_v5 = vpop.f32.mrf.mxu0 }
0x2d7a   :  { %3634 = vtanh.f32 %v2935_v23 }
0x2d7b   :  { %v2937_v50 = vpop.f32.mrf.mxu0 }
0x2d7d   :  { %v3310_v51 = vpop.f32.mrf.mxu0 }
0x2d87   :  { %v3635_v63 = vpop.eup %3634 }
0x2d88   :  { %2941 = vst.msk [vmem:[%s4396_s2] sm:$0xff] %vm126_vm0, %v3635_v63 }
0x2d89   :  { %2946 = vsyncmov [#allocation3] }
0x2d8c   :  { %s2947_s16 = vpop.sfrf %2946 }
0x2d8d   :  { %p3113_p10 = scmp.ne.s32.totalorder %s2947_s16, 0 }
0x2d8f   :  { %2951 = shalt.err (%p3113_p10)  }
0x2d90   :  { %2953 = vsyncmov [#allocation3 + $0x1] }
0x2d93   :  { %s2954_s17 = vpop.sfrf %2953 }
0x2d94   :  { %p3114_p11 = scmp.ne.s32.totalorder %s2954_s17, 0 }
0x2d96   :  { %2958 = shalt.err (%p3114_p11)  }

</bundles_post_ra>
